<compile_context>
chip_gen: v7x
topology: tpu7x:2x2x1
jax: 0.10.0
libtpu: 0.0.40
codegen_flags: <defaults>
</compile_context>

<pallas_src>
import numpy as np
import jax
import jax.numpy as jnp
from jax.experimental import pallas as pl
from jax.experimental.pallas import tpu as pltpu


def make_stsgcl_kernel(num_gc_layers, out_T):
    def kernel(x_ref, emb_ref, adj_ref, wt_ref, bt_ref, wp_ref, bp_ref, *rest):
        gc_refs = rest[:-1]
        out_ref = rest[-1]
        Bp, T, N, C = x_ref.shape
        G = out_T
        F = wt_ref.shape[2] // 2          # filters[-1]
        F0 = wp_ref.shape[1]              # filters[0]

        def mm(a, w):
            # f32 MXU matmul; may differ slightly from an XLA HIGHEST-precision
            # einsum (validated to rtol/atol=1e-3 in __main__).
            return jnp.dot(a, w, preferred_element_type=jnp.float32)

        # ---- positional embedding: single add vs. precomputed (T,N,C) table ----
        x = x_ref[...] + emb_ref[...]                               # (Bp,T,N,C)

        # ---- gated temporal conv: Conv2d k=(1,2), dilation=(1,3) ----
        # taps t / t+3 as two K=C matmuls summed (no lane-axis concat); the
        # left|right convs are fused along the output dim (2F wide), split after.
        xt = x[:, 0:G].reshape(Bp * G * N, C)
        xt3 = x[:, 3:3 + G].reshape(Bp * G * N, C)
        wt = wt_ref[...]                                            # (2, C, 2F)
        zt = mm(xt, wt[0]) + mm(xt3, wt[1]) + bt_ref[...]           # (BpGN, 2F)
        y = jax.nn.sigmoid(zt[:, :F]) * jnp.tanh(zt[:, F:])
        y = y.reshape(Bp, G, N, F)

        # ---- Conv1d(k=1) projection BEFORE windowing (k=1 commutes with it) ----
        h_full = mm(x.reshape(Bp * T * N, C), wp_ref[...]) + bp_ref[...]
        h_full = h_full.reshape(Bp, T, N, F0)

        # ---- all G sliding windows at once, on projected (F0-lane) data ----
        # hw[b, g, j*N + n, :] = h_full[b, g + j, n, :]
        hw = jnp.concatenate([h_full[:, j:j + G] for j in range(4)], axis=2)
        h2 = hw.reshape(Bp * G * 4 * N, F0)                         # (BpG4N, F0)

        # ---- STSGCM graph-convolution chain ----
        pooled = None
        for k in range(num_gc_layers):
            wk = gc_refs[2 * k][...]                                # (fin, 2*fout)
            bk = gc_refs[2 * k + 1][...]                            # (1, 2*fout)
            fout = wk.shape[1] // 2
            # A @ x for every (batch-in-step, window) block via ONE 2D matmul
            # against the block-diagonal adjacency (M = K = Bp*G*4N >= 256).
            ah = mm(adj_ref[...], h2)
            z = mm(ah, wk) + bk                                     # fused GLU matmul
            h2 = z[:, :fout] * jax.nn.sigmoid(z[:, fout:])          # GLU(dim=-1)
            crop = h2.reshape(Bp, G, 4 * N, fout)[:, :, N:2 * N, :]
            pooled = crop if pooled is None else jnp.maximum(pooled, crop)

        # TODO(synk): dropout omitted -- p=0.0 default / eval mode => identity
        res = pooled + y                                            # (Bp,G,N,F)
        # lane-densify the store: (Bp,G,N,F) -> (Bp,G,N*F) via sublane-extract +
        # minor-dim concat so the output writeback uses full 128-lane stores.
        dense = jnp.concatenate([res[:, :, n, :] for n in range(N)], axis=-1)
        out_ref[...] = dense.astype(out_ref.dtype)

    return kernel


def init_params(key, T, N, C, filters):
    F = filters[-1]
    n_keys = 12 + 2 * (len(filters) - 1)
    keys = iter(jax.random.split(key, n_keys))

    def nrm(shape, scale=0.1):
        return (scale * jax.random.normal(next(keys), shape)).astype(jnp.float32)

    p = dict(
        temb=nrm((T, C)),                   # (1, T, 1, C) squeezed
        semb=nrm((N, C)),                   # (1, 1, N, C) squeezed
        wl0=nrm((C, F)), wl1=nrm((C, F)), bl=nrm((1, F), 0.01),
        wr0=nrm((C, F)), wr1=nrm((C, F)), br=nrm((1, F), 0.01),
        wp=nrm((C, filters[0])), bp=nrm((1, filters[0]), 0.01),
        gc=[(nrm((filters[k], 2 * filters[k + 1])),
             nrm((1, 2 * filters[k + 1]), 0.01))
            for k in range(len(filters) - 1)],
    )
    return p


def stsgcl_pallas(x, adj, params, filters):
    B, T, N, C = x.shape
    F = filters[-1]
    num_layers = len(filters) - 1
    out_T = T - 3
    assert T >= 4 and out_T > 0, "window_size must be >= 4 for the (1,2)/dil-3 conv"
    assert adj.shape == (4 * N, 4 * N)
    # NOTE: dropout (p=0.0 default / eval mode) is an identity and is not applied.

    # Grid sized to the core count (2 TensorCores on v7x); the rest of the batch
    # is folded into the matmul row dimension.  B=2 -> grid=(2,), Bp=1.
    grid_b = 2 if (B >= 2 and B % 2 == 0) else 1
    Bp = B // grid_b

    # ---- wrapper-side packing (layout plumbing; all constant index maps) ----
    emb = params['temb'][:, None, :] + params['semb'][None, :, :]           # (T,N,C)
    wt = jnp.stack([jnp.concatenate([params['wl0'], params['wr0']], axis=1),
                    jnp.concatenate([params['wl1'], params['wr1']], axis=1)],
                   axis=0)                                                   # (2,C,2F)
    bt = jnp.concatenate([params['bl'], params['br']], axis=1)               # (1,2F)
    # Block-diagonal adjacency: one (4N,4N) block per (batch-in-step, window).
    # O((Bp*out_T*4N)^2) memory -- 320x320 here; for production-scale N fall
    # back to a stationary (4N,4N) adjacency einsum instead.
    adj_bd = jnp.kron(jnp.eye(Bp * out_T, dtype=adj.dtype), adj)

    gc_args = []
    for (w, b) in params['gc']:
        gc_args.append(w)        # (fin, 2*fout) -- GLU kept fused, no split
        gc_args.append(b)        # (1, 2*fout)

    args = [x, emb, adj_bd, wt, bt, params['wp'], params['bp']] + gc_args

    def rep_spec(arr):
        nd = arr.ndim
        # TODO(synk): at production N, consider pipeline_mode=pl.Buffered(1) on
        # these replicated operands (esp. adj) to halve their VMEM footprint.
        return pl.BlockSpec(arr.shape, lambda g, nd=nd: (0,) * nd)

    in_specs = ([pl.BlockSpec((Bp, T, N, C), lambda g: (g, 0, 0, 0))]
                + [rep_spec(a) for a in args[1:]])
    # Lane-dense output slab: last dim N*F (512 = 4*128) -> unmasked vst.
    out_spec = pl.BlockSpec((Bp, out_T, N * F), lambda g: (g, 0, 0))

    kernel = make_stsgcl_kernel(num_layers, out_T)
    out = pl.pallas_call(
        kernel,
        out_shape=jax.ShapeDtypeStruct((B, out_T, N * F), jnp.float32),
        grid_spec=pltpu.PrefetchScalarGridSpec(
            num_scalar_prefetch=0,
            grid=(grid_b,),
            in_specs=in_specs,
            out_specs=out_spec),
        compiler_params=pltpu.CompilerParams(
            dimension_semantics=("parallel",)),
    )(*args)
    return out.reshape(B, out_T, N, F)


def stsgcl_reference(x, adj, p, filters):
    """Pure-JAX reference matching the PyTorch forward semantics."""
    B, T, N, C = x.shape
    hp = jax.lax.Precision.HIGHEST
    x = x + p['temb'][None, :, None, :] + p['semb'][None, None, :, :]
    ys = []
    for j in range(T - 3):
        left = (jnp.einsum('bnc,cf->bnf', x[:, j], p['wl0'], precision=hp)
                + jnp.einsum('bnc,cf->bnf', x[:, j + 3], p['wl1'], precision=hp) + p['bl'])
        right = (jnp.einsum('bnc,cf->bnf', x[:, j], p['wr0'], precision=hp)
                 + jnp.einsum('bnc,cf->bnf', x[:, j + 3], p['wr1'], precision=hp) + p['br'])
        ys.append(jax.nn.sigmoid(left) * jnp.tanh(right))
    y = jnp.stack(ys, axis=1)                                   # (B, T-3, N, F)
    outs = []
    for i in range(T - 3):
        t = x[:, i:i + 4].reshape(B, 4 * N, C)
        h = jnp.einsum('bmc,cf->bmf', t, p['wp'], precision=hp) + p['bp']
        crops = []
        for (w, b) in p['gc']:
            h = jnp.einsum('mn,bnf->bmf', adj, h, precision=hp)
            z = jnp.einsum('bmf,fg->bmg', h, w, precision=hp) + b
            fo = z.shape[-1] // 2
            h = z[..., :fo] * jax.nn.sigmoid(z[..., fo:])
            crops.append(h[:, N:2 * N, :])
        outs.append(jnp.max(jnp.stack(crops, axis=0), axis=0))
    out = jnp.stack(outs, axis=1)
    return out + y                                              # dropout p=0 -> identity


if __name__ == "__main__":
    B, T, N, C = 2, 8, 16, 4          # batch, window_size, num_nodes, input_channels
    filters = [32, 32, 32]            # two GraphConvolution layers, F = 32

    key = jax.random.PRNGKey(0)
    kx, ka, kp = jax.random.split(key, 3)
    x = jax.random.normal(kx, (B, T, N, C), dtype=jnp.float32)
    adj = (jax.random.uniform(ka, (4 * N, 4 * N)) < 0.2).astype(jnp.float32)
    adj = adj / jnp.maximum(adj.sum(axis=-1, keepdims=True), 1.0)
    params = init_params(kp, T, N, C, filters)

    out = stsgcl_pallas(x, adj, params, filters)
    out = jax.block_until_ready(out)

    assert out.shape == (B, T - 3, N, filters[-1])
    ref = stsgcl_reference(x, adj, params, filters)
    np.testing.assert_allclose(np.asarray(out), np.asarray(ref), rtol=1e-3, atol=1e-3)
    print("KERNEL_OK")
</pallas_src>

<mosaic_0001>
module attributes {stable_mosaic.version = 11 : i64} {
  func.func @kernel(%arg0: i32, %arg1: memref<1x8x16x4xf32, #tpu.memory_space<vmem>>, %arg2: memref<8x16x4xf32, #tpu.memory_space<vmem>>, %arg3: memref<320x320xf32, #tpu.memory_space<vmem>>, %arg4: memref<2x4x64xf32, #tpu.memory_space<vmem>>, %arg5: memref<1x64xf32, #tpu.memory_space<vmem>>, %arg6: memref<4x32xf32, #tpu.memory_space<vmem>>, %arg7: memref<1x32xf32, #tpu.memory_space<vmem>>, %arg8: memref<32x64xf32, #tpu.memory_space<vmem>>, %arg9: memref<1x64xf32, #tpu.memory_space<vmem>>, %arg10: memref<32x64xf32, #tpu.memory_space<vmem>>, %arg11: memref<1x64xf32, #tpu.memory_space<vmem>>, %arg12: memref<1x5x512xf32, #tpu.memory_space<vmem>>) attributes {dimension_semantics = [#tpu.dimension_semantics<parallel>], iteration_bounds = array<i64: 2>, scalar_prefetch = 0 : i64, scratch_operands = 0 : i64, tpu.core_type = #tpu.core_type<tc>, window_params = [{transform_indices = @transform_0, window_bounds = array<i64: 1, 8, 16, 4>}, {pipeline_mode = #tpu.pipeline_mode<synchronous>, transform_indices = @transform_1, window_bounds = array<i64: 8, 16, 4>}, {pipeline_mode = #tpu.pipeline_mode<synchronous>, transform_indices = @transform_2, window_bounds = array<i64: 320, 320>}, {pipeline_mode = #tpu.pipeline_mode<synchronous>, transform_indices = @transform_3, window_bounds = array<i64: 2, 4, 64>}, {pipeline_mode = #tpu.pipeline_mode<synchronous>, transform_indices = @transform_4, window_bounds = array<i64: 1, 64>}, {pipeline_mode = #tpu.pipeline_mode<synchronous>, transform_indices = @transform_5, window_bounds = array<i64: 4, 32>}, {pipeline_mode = #tpu.pipeline_mode<synchronous>, transform_indices = @transform_6, window_bounds = array<i64: 1, 32>}, {pipeline_mode = #tpu.pipeline_mode<synchronous>, transform_indices = @transform_7, window_bounds = array<i64: 32, 64>}, {pipeline_mode = #tpu.pipeline_mode<synchronous>, transform_indices = @transform_8, window_bounds = array<i64: 1, 64>}, {pipeline_mode = #tpu.pipeline_mode<synchronous>, transform_indices = @transform_9, window_bounds = array<i64: 32, 64>}, {pipeline_mode = #tpu.pipeline_mode<synchronous>, transform_indices = @transform_10, window_bounds = array<i64: 1, 64>}, {transform_indices = @transform_11, window_bounds = array<i64: 1, 5, 512>}]} {
    %c0 = arith.constant 0 : index
    %c0_0 = arith.constant 0 : index
    %c0_1 = arith.constant 0 : index
    %c0_2 = arith.constant 0 : index
    %0 = vector.load %arg1[%c0, %c0_0, %c0_1, %c0_2] : memref<1x8x16x4xf32, #tpu.memory_space<vmem>>, vector<1x8x16x4xf32>
    %c0_3 = arith.constant 0 : index
    %c0_4 = arith.constant 0 : index
    %c0_5 = arith.constant 0 : index
    %1 = vector.load %arg2[%c0_3, %c0_4, %c0_5] : memref<8x16x4xf32, #tpu.memory_space<vmem>>, vector<8x16x4xf32>
    %2 = vector.shape_cast %1 : vector<8x16x4xf32> to vector<1x8x16x4xf32>
    %3 = arith.addf %0, %2 : vector<1x8x16x4xf32>
    %4 = vector.extract_strided_slice %3 {offsets = [0, 0, 0, 0], sizes = [1, 5, 16, 4], strides = [1, 1, 1, 1]} : vector<1x8x16x4xf32> to vector<1x5x16x4xf32>
    %5 = vector.shape_cast %4 : vector<1x5x16x4xf32> to vector<80x4xf32>
    %6 = vector.extract_strided_slice %3 {offsets = [0, 3, 0, 0], sizes = [1, 5, 16, 4], strides = [1, 1, 1, 1]} : vector<1x8x16x4xf32> to vector<1x5x16x4xf32>
    %7 = vector.shape_cast %6 : vector<1x5x16x4xf32> to vector<80x4xf32>
    %c0_6 = arith.constant 0 : index
    %c0_7 = arith.constant 0 : index
    %c0_8 = arith.constant 0 : index
    %8 = vector.load %arg4[%c0_6, %c0_7, %c0_8] : memref<2x4x64xf32, #tpu.memory_space<vmem>>, vector<2x4x64xf32>
    %9 = vector.extract_strided_slice %8 {offsets = [0, 0, 0], sizes = [1, 4, 64], strides = [1, 1, 1]} : vector<2x4x64xf32> to vector<1x4x64xf32>
    %10 = vector.shape_cast %9 : vector<1x4x64xf32> to vector<4x64xf32>
    %cst = arith.constant dense<0.000000e+00> : vector<80x64xf32>
    %11 = tpu.matmul %5, %10, %cst {dimension_numbers = #tpu.dot_dimension_numbers<[1], [0], [0], [1], [0, 0, 1, 1], [], []>} : vector<80x4xf32>, vector<4x64xf32>, vector<80x64xf32> -> vector<80x64xf32>
    %12 = vector.extract_strided_slice %8 {offsets = [1, 0, 0], sizes = [1, 4, 64], strides = [1, 1, 1]} : vector<2x4x64xf32> to vector<1x4x64xf32>
    %13 = vector.shape_cast %12 : vector<1x4x64xf32> to vector<4x64xf32>
    %cst_9 = arith.constant dense<0.000000e+00> : vector<80x64xf32>
    %14 = tpu.matmul %7, %13, %cst_9 {dimension_numbers = #tpu.dot_dimension_numbers<[1], [0], [0], [1], [0, 0, 1, 1], [], []>} : vector<80x4xf32>, vector<4x64xf32>, vector<80x64xf32> -> vector<80x64xf32>
    %15 = arith.addf %11, %14 : vector<80x64xf32>
    %c0_10 = arith.constant 0 : index
    %c0_11 = arith.constant 0 : index
    %16 = vector.load %arg5[%c0_10, %c0_11] : memref<1x64xf32, #tpu.memory_space<vmem>>, vector<1x64xf32>
    %17 = vector.broadcast %16 : vector<1x64xf32> to vector<80x64xf32>
    %18 = arith.addf %15, %17 : vector<80x64xf32>
    %19 = vector.extract_strided_slice %18 {offsets = [0, 0], sizes = [80, 32], strides = [1, 1]} : vector<80x64xf32> to vector<80x32xf32>
    %20 = arith.negf %19 : vector<80x32xf32>
    %21 = math.exp %20 : vector<80x32xf32>
    %cst_12 = arith.constant 1.000000e+00 : f32
    %22 = vector.broadcast %cst_12 : f32 to vector<80x32xf32>
    %23 = arith.addf %22, %21 : vector<80x32xf32>
    %24 = arith.divf %22, %23 : vector<80x32xf32>
    %25 = vector.extract_strided_slice %18 {offsets = [0, 32], sizes = [80, 32], strides = [1, 1]} : vector<80x64xf32> to vector<80x32xf32>
    %26 = math.tanh %25 : vector<80x32xf32>
    %27 = arith.mulf %24, %26 : vector<80x32xf32>
    %28 = vector.shape_cast %27 : vector<80x32xf32> to vector<1x5x16x32xf32>
    %29 = vector.shape_cast %3 : vector<1x8x16x4xf32> to vector<128x4xf32>
    %c0_13 = arith.constant 0 : index
    %c0_14 = arith.constant 0 : index
    %30 = vector.load %arg6[%c0_13, %c0_14] : memref<4x32xf32, #tpu.memory_space<vmem>>, vector<4x32xf32>
    %cst_15 = arith.constant dense<0.000000e+00> : vector<128x32xf32>
    %31 = tpu.matmul %29, %30, %cst_15 {dimension_numbers = #tpu.dot_dimension_numbers<[1], [0], [0], [1], [0, 0, 1, 1], [], []>} : vector<128x4xf32>, vector<4x32xf32>, vector<128x32xf32> -> vector<128x32xf32>
    %c0_16 = arith.constant 0 : index
    %c0_17 = arith.constant 0 : index
    %32 = vector.load %arg7[%c0_16, %c0_17] : memref<1x32xf32, #tpu.memory_space<vmem>>, vector<1x32xf32>
    %33 = vector.broadcast %32 : vector<1x32xf32> to vector<128x32xf32>
    %34 = arith.addf %31, %33 : vector<128x32xf32>
    %35 = vector.shape_cast %34 : vector<128x32xf32> to vector<1x8x16x32xf32>
    %36 = vector.extract_strided_slice %35 {offsets = [0, 0, 0, 0], sizes = [1, 5, 16, 32], strides = [1, 1, 1, 1]} : vector<1x8x16x32xf32> to vector<1x5x16x32xf32>
    %37 = vector.extract_strided_slice %35 {offsets = [0, 1, 0, 0], sizes = [1, 5, 16, 32], strides = [1, 1, 1, 1]} : vector<1x8x16x32xf32> to vector<1x5x16x32xf32>
    %38 = vector.extract_strided_slice %35 {offsets = [0, 2, 0, 0], sizes = [1, 5, 16, 32], strides = [1, 1, 1, 1]} : vector<1x8x16x32xf32> to vector<1x5x16x32xf32>
    %39 = vector.extract_strided_slice %35 {offsets = [0, 3, 0, 0], sizes = [1, 5, 16, 32], strides = [1, 1, 1, 1]} : vector<1x8x16x32xf32> to vector<1x5x16x32xf32>
    %40 = tpu.concatenate %36, %37, %38, %39 in 2 : vector<1x5x16x32xf32>, vector<1x5x16x32xf32>, vector<1x5x16x32xf32>, vector<1x5x16x32xf32> -> vector<1x5x64x32xf32>
    %41 = vector.shape_cast %40 : vector<1x5x64x32xf32> to vector<320x32xf32>
    %c0_18 = arith.constant 0 : index
    %c0_19 = arith.constant 0 : index
    %42 = vector.load %arg8[%c0_18, %c0_19] : memref<32x64xf32, #tpu.memory_space<vmem>>, vector<32x64xf32>
    %c0_20 = arith.constant 0 : index
    %c0_21 = arith.constant 0 : index
    %43 = vector.load %arg9[%c0_20, %c0_21] : memref<1x64xf32, #tpu.memory_space<vmem>>, vector<1x64xf32>
    %c0_22 = arith.constant 0 : index
    %c0_23 = arith.constant 0 : index
    %44 = vector.load %arg3[%c0_22, %c0_23] : memref<320x320xf32, #tpu.memory_space<vmem>>, vector<320x320xf32>
    %cst_24 = arith.constant dense<0.000000e+00> : vector<320x32xf32>
    %45 = tpu.matmul %44, %41, %cst_24 {dimension_numbers = #tpu.dot_dimension_numbers<[1], [0], [0], [1], [0, 0, 1, 1], [], []>} : vector<320x320xf32>, vector<320x32xf32>, vector<320x32xf32> -> vector<320x32xf32>
    %cst_25 = arith.constant dense<0.000000e+00> : vector<320x64xf32>
    %46 = tpu.matmul %45, %42, %cst_25 {dimension_numbers = #tpu.dot_dimension_numbers<[1], [0], [0], [1], [0, 0, 1, 1], [], []>} : vector<320x32xf32>, vector<32x64xf32>, vector<320x64xf32> -> vector<320x64xf32>
    %47 = vector.broadcast %43 : vector<1x64xf32> to vector<320x64xf32>
    %48 = arith.addf %46, %47 : vector<320x64xf32>
    %49 = vector.extract_strided_slice %48 {offsets = [0, 0], sizes = [320, 32], strides = [1, 1]} : vector<320x64xf32> to vector<320x32xf32>
    %50 = vector.extract_strided_slice %48 {offsets = [0, 32], sizes = [320, 32], strides = [1, 1]} : vector<320x64xf32> to vector<320x32xf32>
    %51 = arith.negf %50 : vector<320x32xf32>
    %52 = math.exp %51 : vector<320x32xf32>
    %cst_26 = arith.constant 1.000000e+00 : f32
    %53 = vector.broadcast %cst_26 : f32 to vector<320x32xf32>
    %54 = arith.addf %53, %52 : vector<320x32xf32>
    %55 = arith.divf %53, %54 : vector<320x32xf32>
    %56 = arith.mulf %49, %55 : vector<320x32xf32>
    %57 = vector.shape_cast %56 : vector<320x32xf32> to vector<1x5x64x32xf32>
    %58 = vector.extract_strided_slice %57 {offsets = [0, 0, 16, 0], sizes = [1, 5, 16, 32], strides = [1, 1, 1, 1]} : vector<1x5x64x32xf32> to vector<1x5x16x32xf32>
    %c0_27 = arith.constant 0 : index
    %c0_28 = arith.constant 0 : index
    %59 = vector.load %arg10[%c0_27, %c0_28] : memref<32x64xf32, #tpu.memory_space<vmem>>, vector<32x64xf32>
    %c0_29 = arith.constant 0 : index
    %c0_30 = arith.constant 0 : index
    %60 = vector.load %arg11[%c0_29, %c0_30] : memref<1x64xf32, #tpu.memory_space<vmem>>, vector<1x64xf32>
    %c0_31 = arith.constant 0 : index
    %c0_32 = arith.constant 0 : index
    %61 = vector.load %arg3[%c0_31, %c0_32] : memref<320x320xf32, #tpu.memory_space<vmem>>, vector<320x320xf32>
    %cst_33 = arith.constant dense<0.000000e+00> : vector<320x32xf32>
    %62 = tpu.matmul %61, %56, %cst_33 {dimension_numbers = #tpu.dot_dimension_numbers<[1], [0], [0], [1], [0, 0, 1, 1], [], []>} : vector<320x320xf32>, vector<320x32xf32>, vector<320x32xf32> -> vector<320x32xf32>
    %cst_34 = arith.constant dense<0.000000e+00> : vector<320x64xf32>
    %63 = tpu.matmul %62, %59, %cst_34 {dimension_numbers = #tpu.dot_dimension_numbers<[1], [0], [0], [1], [0, 0, 1, 1], [], []>} : vector<320x32xf32>, vector<32x64xf32>, vector<320x64xf32> -> vector<320x64xf32>
    %64 = vector.broadcast %60 : vector<1x64xf32> to vector<320x64xf32>
    %65 = arith.addf %63, %64 : vector<320x64xf32>
    %66 = vector.extract_strided_slice %65 {offsets = [0, 0], sizes = [320, 32], strides = [1, 1]} : vector<320x64xf32> to vector<320x32xf32>
    %67 = vector.extract_strided_slice %65 {offsets = [0, 32], sizes = [320, 32], strides = [1, 1]} : vector<320x64xf32> to vector<320x32xf32>
    %68 = arith.negf %67 : vector<320x32xf32>
    %69 = math.exp %68 : vector<320x32xf32>
    %cst_35 = arith.constant 1.000000e+00 : f32
    %70 = vector.broadcast %cst_35 : f32 to vector<320x32xf32>
    %71 = arith.addf %70, %69 : vector<320x32xf32>
    %72 = arith.divf %70, %71 : vector<320x32xf32>
    %73 = arith.mulf %66, %72 : vector<320x32xf32>
    %74 = vector.shape_cast %73 : vector<320x32xf32> to vector<1x5x64x32xf32>
    %75 = vector.extract_strided_slice %74 {offsets = [0, 0, 16, 0], sizes = [1, 5, 16, 32], strides = [1, 1, 1, 1]} : vector<1x5x64x32xf32> to vector<1x5x16x32xf32>
    %76 = arith.maximumf %58, %75 : vector<1x5x16x32xf32>
    %77 = arith.addf %76, %28 : vector<1x5x16x32xf32>
    %78 = vector.extract_strided_slice %77 {offsets = [0, 0, 0, 0], sizes = [1, 5, 1, 32], strides = [1, 1, 1, 1]} : vector<1x5x16x32xf32> to vector<1x5x1x32xf32>
    %79 = vector.shape_cast %78 : vector<1x5x1x32xf32> to vector<1x5x32xf32>
    %80 = vector.extract_strided_slice %77 {offsets = [0, 0, 1, 0], sizes = [1, 5, 1, 32], strides = [1, 1, 1, 1]} : vector<1x5x16x32xf32> to vector<1x5x1x32xf32>
    %81 = vector.shape_cast %80 : vector<1x5x1x32xf32> to vector<1x5x32xf32>
    %82 = vector.extract_strided_slice %77 {offsets = [0, 0, 2, 0], sizes = [1, 5, 1, 32], strides = [1, 1, 1, 1]} : vector<1x5x16x32xf32> to vector<1x5x1x32xf32>
    %83 = vector.shape_cast %82 : vector<1x5x1x32xf32> to vector<1x5x32xf32>
    %84 = vector.extract_strided_slice %77 {offsets = [0, 0, 3, 0], sizes = [1, 5, 1, 32], strides = [1, 1, 1, 1]} : vector<1x5x16x32xf32> to vector<1x5x1x32xf32>
    %85 = vector.shape_cast %84 : vector<1x5x1x32xf32> to vector<1x5x32xf32>
    %86 = vector.extract_strided_slice %77 {offsets = [0, 0, 4, 0], sizes = [1, 5, 1, 32], strides = [1, 1, 1, 1]} : vector<1x5x16x32xf32> to vector<1x5x1x32xf32>
    %87 = vector.shape_cast %86 : vector<1x5x1x32xf32> to vector<1x5x32xf32>
    %88 = vector.extract_strided_slice %77 {offsets = [0, 0, 5, 0], sizes = [1, 5, 1, 32], strides = [1, 1, 1, 1]} : vector<1x5x16x32xf32> to vector<1x5x1x32xf32>
    %89 = vector.shape_cast %88 : vector<1x5x1x32xf32> to vector<1x5x32xf32>
    %90 = vector.extract_strided_slice %77 {offsets = [0, 0, 6, 0], sizes = [1, 5, 1, 32], strides = [1, 1, 1, 1]} : vector<1x5x16x32xf32> to vector<1x5x1x32xf32>
    %91 = vector.shape_cast %90 : vector<1x5x1x32xf32> to vector<1x5x32xf32>
    %92 = vector.extract_strided_slice %77 {offsets = [0, 0, 7, 0], sizes = [1, 5, 1, 32], strides = [1, 1, 1, 1]} : vector<1x5x16x32xf32> to vector<1x5x1x32xf32>
    %93 = vector.shape_cast %92 : vector<1x5x1x32xf32> to vector<1x5x32xf32>
    %94 = vector.extract_strided_slice %77 {offsets = [0, 0, 8, 0], sizes = [1, 5, 1, 32], strides = [1, 1, 1, 1]} : vector<1x5x16x32xf32> to vector<1x5x1x32xf32>
    %95 = vector.shape_cast %94 : vector<1x5x1x32xf32> to vector<1x5x32xf32>
    %96 = vector.extract_strided_slice %77 {offsets = [0, 0, 9, 0], sizes = [1, 5, 1, 32], strides = [1, 1, 1, 1]} : vector<1x5x16x32xf32> to vector<1x5x1x32xf32>
    %97 = vector.shape_cast %96 : vector<1x5x1x32xf32> to vector<1x5x32xf32>
    %98 = vector.extract_strided_slice %77 {offsets = [0, 0, 10, 0], sizes = [1, 5, 1, 32], strides = [1, 1, 1, 1]} : vector<1x5x16x32xf32> to vector<1x5x1x32xf32>
    %99 = vector.shape_cast %98 : vector<1x5x1x32xf32> to vector<1x5x32xf32>
    %100 = vector.extract_strided_slice %77 {offsets = [0, 0, 11, 0], sizes = [1, 5, 1, 32], strides = [1, 1, 1, 1]} : vector<1x5x16x32xf32> to vector<1x5x1x32xf32>
    %101 = vector.shape_cast %100 : vector<1x5x1x32xf32> to vector<1x5x32xf32>
    %102 = vector.extract_strided_slice %77 {offsets = [0, 0, 12, 0], sizes = [1, 5, 1, 32], strides = [1, 1, 1, 1]} : vector<1x5x16x32xf32> to vector<1x5x1x32xf32>
    %103 = vector.shape_cast %102 : vector<1x5x1x32xf32> to vector<1x5x32xf32>
    %104 = vector.extract_strided_slice %77 {offsets = [0, 0, 13, 0], sizes = [1, 5, 1, 32], strides = [1, 1, 1, 1]} : vector<1x5x16x32xf32> to vector<1x5x1x32xf32>
    %105 = vector.shape_cast %104 : vector<1x5x1x32xf32> to vector<1x5x32xf32>
    %106 = vector.extract_strided_slice %77 {offsets = [0, 0, 14, 0], sizes = [1, 5, 1, 32], strides = [1, 1, 1, 1]} : vector<1x5x16x32xf32> to vector<1x5x1x32xf32>
    %107 = vector.shape_cast %106 : vector<1x5x1x32xf32> to vector<1x5x32xf32>
    %108 = vector.extract_strided_slice %77 {offsets = [0, 0, 15, 0], sizes = [1, 5, 1, 32], strides = [1, 1, 1, 1]} : vector<1x5x16x32xf32> to vector<1x5x1x32xf32>
    %109 = vector.shape_cast %108 : vector<1x5x1x32xf32> to vector<1x5x32xf32>
    %110 = tpu.concatenate %79, %81, %83, %85, %87, %89, %91, %93, %95, %97, %99, %101, %103, %105, %107, %109 in 2 : vector<1x5x32xf32>, vector<1x5x32xf32>, vector<1x5x32xf32>, vector<1x5x32xf32>, vector<1x5x32xf32>, vector<1x5x32xf32>, vector<1x5x32xf32>, vector<1x5x32xf32>, vector<1x5x32xf32>, vector<1x5x32xf32>, vector<1x5x32xf32>, vector<1x5x32xf32>, vector<1x5x32xf32>, vector<1x5x32xf32>, vector<1x5x32xf32>, vector<1x5x32xf32> -> vector<1x5x512xf32>
    %c0_36 = arith.constant 0 : index
    %c0_37 = arith.constant 0 : index
    %c0_38 = arith.constant 0 : index
    %111 = vector.load %arg12[%c0_36, %c0_37, %c0_38] : memref<1x5x512xf32, #tpu.memory_space<vmem>>, vector<1x5x512xf32>
    tpu.vector_store %arg12[%c0_36, %c0_37, %c0_38], %110 {strides = array<i32>} : memref<1x5x512xf32, #tpu.memory_space<vmem>>, vector<1x5x512xf32>,
    return
  }
  func.func @transform_0(%arg0: i32) -> (i32, i32, i32, i32) {
    %c0_i32 = arith.constant 0 : i32
    %c0_i32_0 = arith.constant 0 : i32
    %c0_i32_1 = arith.constant 0 : i32
    %c0_i32_2 = arith.constant 0 : i32
    return %arg0, %c0_i32, %c0_i32_0, %c0_i32_1 : i32, i32, i32, i32
  }
  func.func @transform_1(%arg0: i32) -> (i32, i32, i32) {
    %c0_i32 = arith.constant 0 : i32
    %c0_i32_0 = arith.constant 0 : i32
    %c0_i32_1 = arith.constant 0 : i32
    %c0_i32_2 = arith.constant 0 : i32
    return %c0_i32, %c0_i32_0, %c0_i32_1 : i32, i32, i32
  }
  func.func @transform_2(%arg0: i32) -> (i32, i32) {
    %c0_i32 = arith.constant 0 : i32
    %c0_i32_0 = arith.constant 0 : i32
    %c0_i32_1 = arith.constant 0 : i32
    return %c0_i32, %c0_i32_0 : i32, i32
  }
  func.func @transform_3(%arg0: i32) -> (i32, i32, i32) {
    %c0_i32 = arith.constant 0 : i32
    %c0_i32_0 = arith.constant 0 : i32
    %c0_i32_1 = arith.constant 0 : i32
    %c0_i32_2 = arith.constant 0 : i32
    return %c0_i32, %c0_i32_0, %c0_i32_1 : i32, i32, i32
  }
  func.func @transform_4(%arg0: i32) -> (i32, i32) {
    %c0_i32 = arith.constant 0 : i32
    %c0_i32_0 = arith.constant 0 : i32
    %c0_i32_1 = arith.constant 0 : i32
    return %c0_i32, %c0_i32_0 : i32, i32
  }
  func.func @transform_5(%arg0: i32) -> (i32, i32) {
    %c0_i32 = arith.constant 0 : i32
    %c0_i32_0 = arith.constant 0 : i32
    %c0_i32_1 = arith.constant 0 : i32
    return %c0_i32, %c0_i32_0 : i32, i32
  }
  func.func @transform_6(%arg0: i32) -> (i32, i32) {
    %c0_i32 = arith.constant 0 : i32
    %c0_i32_0 = arith.constant 0 : i32
    %c0_i32_1 = arith.constant 0 : i32
    return %c0_i32, %c0_i32_0 : i32, i32
  }
  func.func @transform_7(%arg0: i32) -> (i32, i32) {
    %c0_i32 = arith.constant 0 : i32
    %c0_i32_0 = arith.constant 0 : i32
    %c0_i32_1 = arith.constant 0 : i32
    return %c0_i32, %c0_i32_0 : i32, i32
  }
  func.func @transform_8(%arg0: i32) -> (i32, i32) {
    %c0_i32 = arith.constant 0 : i32
    %c0_i32_0 = arith.constant 0 : i32
    %c0_i32_1 = arith.constant 0 : i32
    return %c0_i32, %c0_i32_0 : i32, i32
  }
  func.func @transform_9(%arg0: i32) -> (i32, i32) {
    %c0_i32 = arith.constant 0 : i32
    %c0_i32_0 = arith.constant 0 : i32
    %c0_i32_1 = arith.constant 0 : i32
    return %c0_i32, %c0_i32_0 : i32, i32
  }
  func.func @transform_10(%arg0: i32) -> (i32, i32) {
    %c0_i32 = arith.constant 0 : i32
    %c0_i32_0 = arith.constant 0 : i32
    %c0_i32_1 = arith.constant 0 : i32
    return %c0_i32, %c0_i32_0 : i32, i32
  }
  func.func @transform_11(%arg0: i32) -> (i32, i32, i32) {
    %c0_i32 = arith.constant 0 : i32
    %c0_i32_0 = arith.constant 0 : i32
    %c0_i32_1 = arith.constant 0 : i32
    return %arg0, %c0_i32, %c0_i32_0 : i32, i32, i32
  }
}

</mosaic_0001>

<bundles_post_ra>
// kernel: tpu_custom_call.1
= control target key start
LH: loop header
LB: loop body
LE: loop exit
PB: predicated region body
PF: predicated region fallthrough
CT: control target
= control target key end

     0   :  { %16 = vsyncpa [#allocation3], 0  ;;  %s5460_s17 = smov 0   ;;  %s6635_s0 = inlined_call_operand.vmem [shape: f32[2,8,16,4], index: 0, kind: input, shape index: {}]   ;;  %s6636_s1 = inlined_call_operand.vmem [shape: f32[8,16,4], index: 1, kind: input, shape index: {}]   ;;  %s6637_s2 = inlined_call_operand.hbm [shape: f32[320,320], index: 2, kind: input, shape index: {}]   ;;  %s6638_s3 = inlined_call_operand.vmem [shape: f32[2,4,64], index: 3, kind: input, shape index: {}]   ;;  %s6639_s4 = inlined_call_operand.vmem [shape: f32[1,64], index: 4, kind: input, shape index: {}]   ;;  %s6640_s5 = inlined_call_operand.vmem [shape: f32[4,32], index: 5, kind: input, shape index: {}]   ;;  %s6641_s6 = inlined_call_operand.vmem [shape: f32[1,32], index: 6, kind: input, shape index: {}]   ;;  %s6642_s7 = inlined_call_operand.vmem [shape: f32[32,64], index: 7, kind: input, shape index: {}]   ;;  %s6643_s8 = inlined_call_operand.vmem [shape: f32[1,64], index: 8, kind: input, shape index: {}]   ;;  %s6644_s9 = inlined_call_operand.vmem [shape: f32[32,64], index: 9, kind: input, shape index: {}]   ;;  %s6645_s10 = inlined_call_operand.vmem [shape: f32[1,64], index: 10, kind: input, shape index: {}]   ;;  %s6646_s11 = inlined_call_operand.vmem [shape: f32[2,5,512], index: 11, kind: output, shape index: {}]  }
   0x1 LB: > { %s5466_s18 = sadd.s32 4294967295, %s5391_s17   ;;  %p3939_p0 = scmp.ge.s32.totalorder %s5391_s17, 1  ;;  %s5391_s17 = sphi %s5460_s17, %s22_s17  }
   0x2   : > { %p289_p1 = scmp.lt.s32.totalorder %s5391_s17, 3  ;;  %s5393_s19 = smov [#allocation2]  }
   0x3   : > { %s304_s20 = sshll.u32 %s5393_s19, 4  ;;  %p6647_p3 = scmp.eq.s32.totalorder %s5466_s18, 0  ;;  %s305_s20 = int_to_ptr.vmem [resolvable:$true] %s304_s20 }
   0x4   : > { %p5470_p2 = pnand %p3939_p0, %p289_p1  ;;  %s5353_s25 = scalar_lea.hbm %s6637_s2, 15360 }
   0x5   : > { %p5354_p6 = scmp.ne.s32.totalorder %s6637_s2, %s5353_s25  ;;  %p5360_p10 = scmp.lt.u32.totalorder %s5353_s25, %s6637_s2 }
   0x6   : > { %s6667_s21 = scalar_select %p5470_p2, 1, 0 }
   0x7   : > { %p4952_p4 = pneg %p5470_p2 }
   0x9   : > { %p5479_p5 = pnand %p6647_p3, %p4952_p4 }
   0xb   : > { %p5355_p7 = pneg %p5479_p5 }
   0xd   : > { %p5356_p8 = pnand %p5355_p7, %p5354_p6 }
   0xf   : > { %p5357_p9 = pneg %p5356_p8 }
  0x11   : > { %p5362_p11 = pnand %p5360_p10, %p5357_p9 }
  0x13   : > { %5365 = shalt.err (!%p5362_p11)
}
  0x14   : > { %s5366_s30 = scalar_lea.vmem %s305_s20, 15360  ;;  %p5374_p1 = scmp.lt.s32.totalorder %s305_s20, %s305_s20 }
  0x15   : > { %p5367_p12 = scmp.ne.s32.totalorder %s305_s20, %s5366_s30  ;;  %p5375_p4 = scmp.lt.s32.totalorder %s5366_s30, %s5366_s30 }
  0x17   : > { %p5369_p13 = pnand %p5367_p12, %p5355_p7  ;;  %p5376_p3 = por %p5375_p4, %p5374_p1 }
  0x19   : > { %p5370_p0 = pneg %p5369_p13 }
  0x1b   : > { %p5377_p2 = pnand %p5376_p3, %p5370_p0 }
  0x1d   : > { %5380 = shalt.err (!%p5377_p2)
}
  0x1e   : > { %s5394_s12 = smov 384   ;;  %s5395_s13 = smov 24  }
  0x1f   : > { %4955 = dma.hbm_to_vmem [thread:$0]  (!%p5479_p5), %s6637_s2, 15360, %s305_s20, [#allocation3], %s5394_s12, %s5394_s12, %s5395_s13  }
  0x20   : > { %p6669_p6 = scmp.ne.s32.totalorder %s6667_s21, 0 }
  0x22   : > { %352 = sbr.rel (%p6669_p6) target bundleno = 1981 (0x7bd), region = 64 }
  0x29   : > { %p6670_p8 = scmp.eq.s32.totalorder %s5466_s18, 0 }
  0x2b   : > { %5386 = dma.done.wait (%p6670_p8), [#allocation3], 15360   ;;  %p6671_p7 = pmov %p6670_p8 }
  0x2c   : > { %p392_p2 = scmp.lt.s32.totalorder %s5466_s18, 1  ;;  %vm483_vm0 = vcmask 1043456   ;;  %v875_v0 = vld [vmem:[%s6640_s5] sm:$0xf]  ;;  %vm452_vm1 = vcmask 31744   ;;  %v419_v5 = vld [vmem:[%s6636_s1 + $0x8] sm:$0xff] }
  0x2d   : > { %5388 = vsyncadd (%p6671_p7), [#allocation3], 4294951936  ;;  %v418_v2 = vld [vmem:[%s6636_s1] sm:$0xff]  ;;  %4472 = vmatprep.subr.msk.mxu1 %vm483_vm0, %v875_v0  ;;  %v420_v8 = vld [vmem:[%s6636_s1 + $0x10] sm:$0xff]  ;;  %v6649_v49 = vmov 0.0|0.0   ;;  %vm1156_vm2 = vcmask 523264  }
  0x2e   : > { %s6706_s18 = smov (!%p392_p2, %s5466_s18), 1  ;;  %4473 = vmatpush3.msk.msra.mxu1 %vm483_vm0, %v875_v0  ;;  %v421_v10 = vld [vmem:[%s6636_s1 + $0x18] sm:$0xff]  ;;  %v422_v13 = vld [vmem:[%s6636_s1 + $0x20] sm:$0xff]  ;;  %v424_v16 = vld [vmem:[%s6636_s1 + $0x30] sm:$0xff]  ;;  %vm1813_vm3 = vcmask 261120   ;;  %s5397_s25 = smov 96  }
  0x2f   : > { %s4213_s16 = sshll.u32 %s6706_s18, 7  ;;  %v423_v19 = vld [vmem:[%s6636_s1 + $0x28] sm:$0xff]  ;;  %v425_v23 = vld [vmem:[%s6636_s1 + $0x38] sm:$0xff]  ;;  %v426_v25 = vld [vmem:[%s6636_s1 + $0x40] sm:$0xff]  ;;  %4786 = vmatprep.subr.bf16.mxu1 %v6649_v49  ;;  %vm3671_vm4 = vcmask 1041409   ;;  %vm3674_vm5 = vcmask 1042434  }
  0x30   : > { %s5513_s20 = scalar_lea.vmem %s6635_s0, %s4213_s16  ;;  %v427_v29 = vld [vmem:[%s6636_s1 + $0x48] sm:$0xff]  ;;  %v428_v31 = vld [vmem:[%s6636_s1 + $0x50] sm:$0xff]  ;;  %v429_v35 = vld [vmem:[%s6636_s1 + $0x58] sm:$0xff]  ;;  %vm3677_vm6 = vcmask 1043459   ;;  %vm3680_vm7 = vcmask 1044484   ;;  %s5398_s22 = smov 32  }
  0x31   : > { %v402_v1 = vld [vmem:[%s5513_s20] sm:$0xff]  ;;  %v403_v4 = vld [vmem:[%s5513_s20 + $0x8] sm:$0xff]  ;;  %v404_v6 = vld [vmem:[%s5513_s20 + $0x10] sm:$0xff]  ;;  %s5399_s21 = smov 64   ;;  %s4214_s23 = sshll.u32 %s6706_s18, 5  ;;  %vm3855_vm8 = vcmask 785408  }
  0x32   : > { %v5523_v3 = vadd.f32 %v418_v2, %v402_v1  ;;  %v5531_v7 = vadd.f32 %v419_v5, %v403_v4  ;;  %v405_v9 = vld [vmem:[%s5513_s20 + $0x18] sm:$0xff]  ;;  %v5542_v11 = vadd.f32 %v420_v8, %v404_v6  ;;  %v406_v12 = vld [vmem:[%s5513_s20 + $0x20] sm:$0xff]  ;;  %v408_v15 = vld [vmem:[%s5513_s20 + $0x30] sm:$0xff]  ;;  %s401_s26 = scalar_lea.vmem %s6646_s11, %s4214_s23 }
  0x33   : > { %v5550_v14 = vadd.f32 %v421_v10, %v405_v9  ;;  %v5558_v17 = vadd.f32 %v422_v13, %v406_v12  ;;  %v407_v18 = vld [vmem:[%s5513_s20 + $0x28] sm:$0xff]  ;;  %v5564_v20 = vadd.f32 %v424_v16, %v408_v15  ;;  %v409_v22 = vld [vmem:[%s5513_s20 + $0x38] sm:$0xff]  ;;  %v410_v24 = vld [vmem:[%s5513_s20 + $0x40] sm:$0xff] }
  0x34   : > { %4474 = vmatprep.mubr.msk.f32.mxu1 %vm452_vm1, %v5523_v3  ;;  %v439_v21 = vadd.f32 %v423_v19, %v407_v18  ;;  %v441_v26 = vadd.f32 %v425_v23, %v409_v22  ;;  %v442_v27 = vadd.f32 %v426_v25, %v410_v24  ;;  %v411_v28 = vld [vmem:[%s5513_s20 + $0x48] sm:$0xff]  ;;  %v412_v30 = vld [vmem:[%s5513_s20 + $0x50] sm:$0xff]  ;;  %v413_v34 = vld [vmem:[%s5513_s20 + $0x58] sm:$0xff] }
  0x35   : > { %4475 = vmatmul.mubr.msk.f32.vlgmr.msra.gmra.mrb[0].mxu1 %vm452_vm1, %v5531_v7  ;;  %4440 = vmatprep.mubr.msk.f32.mxu0 %vm452_vm1, %v5564_v20  ;;  %v443_v32 = vadd.f32 %v427_v29, %v411_v28  ;;  %v444_v33 = vadd.f32 %v428_v31, %v412_v30  ;;  %v414_v36 = vld [vmem:[%s5513_s20 + $0x60] sm:$0xff]  ;;  %v445_v38 = vadd.f32 %v429_v35, %v413_v34  ;;  %v415_v40 = vld [vmem:[%s5513_s20 + $0x68] sm:$0xff]  ;;  %v416_v42 = vld [vmem:[%s5513_s20 + $0x70] sm:$0xff] }
  0x36   : > { %4477 = vmatprep.mubr.msk.f32.mxu1 %vm452_vm1, %v5542_v11  ;;  %v430_v37 = vld [vmem:[%s6636_s1 + $0x60] sm:$0xff]  ;;  %v431_v41 = vld [vmem:[%s6636_s1 + $0x68] sm:$0xff]  ;;  %v432_v43 = vld [vmem:[%s6636_s1 + $0x70] sm:$0xff] }
  0x37   : > { %v446_v39 = vadd.f32 %v430_v37, %v414_v36  ;;  %v447_v44 = vadd.f32 %v431_v41, %v415_v40  ;;  %v448_v45 = vadd.f32 %v432_v43, %v416_v42  ;;  %v417_v46 = vld [vmem:[%s5513_s20 + $0x78] sm:$0xff]  ;;  %v451_v50 = vld [vmem:[%s6638_s3 + $0x4] sm:$0xf]  ;;  %v450_v51 = vld [vmem:[%s6638_s3] sm:$0xf] }
  0x38   : > { %v433_v47 = vld [vmem:[%s6636_s1 + $0x78] sm:$0xff]  ;;  %4438 = vmatprep.subr.msk.mxu0 %vm483_vm0, %v451_v50  ;;  %v1038_v52 = vld [vmem:[#allocation2 + $0x10] sm:$0xff]  ;;  %v1037_v53 = vld [vmem:[#allocation2 + $0x8] sm:$0xff] }
  0x39   : > { %4478 = vmatmul.mubr.msk.f32.gmra.mrb[2].mxu1 %vm452_vm1, %v5550_v14  ;;  %v449_v48 = vadd.f32 %v433_v47, %v417_v46  ;;  %4439 = vmatpush3.msk.msra.mxu0 %vm483_vm0, %v451_v50  ;;  %v3981_v54 = vld [vmem:[%s6641_s6] ss:$0 sm:$0xff]  ;;  %v1041_v31 = vld [vmem:[#allocation2 + $0x28] sm:$0xff]  ;;  %v1050_v34 = vld [vmem:[#allocation2 + $0x70] sm:$0xff] }
  0x3a   : > { %4480 = vmatprep.mubr.msk.f32.mxu1 %vm452_vm1, %v5558_v17  ;;  %4441 = vmatmul.mubr.msk.f32.vlgmr.msra.gmra.mrb[0].mxu0 %vm452_vm1, %v441_v26  ;;  %v1053_v35 = vld [vmem:[#allocation2 + $0x88] sm:$0xff]  ;;  %v5684_v36 = vld [vmem:[#allocation2 + $0xa0] sm:$0xff]  ;;  %v1059_v37 = vld [vmem:[#allocation2 + $0xb8] sm:$0xff] }
  0x3b   : > { %4443 = vmatprep.mubr.msk.f32.mxu0 %vm452_vm1, %v442_v27  ;;  %4455 = vmatprep.subr.msk.mxu0 %vm483_vm0, %v450_v51  ;;  %v1068_v40 = vld [vmem:[#allocation2 + $0x100] sm:$0xff]  ;;  %v1071_v41 = vld [vmem:[#allocation2 + $0x118] sm:$0xff]  ;;  %v1074_v42 = vld [vmem:[#allocation2 + $0x130] sm:$0xff] }
  0x3c   : > { %4456 = vmatpush3.msk.msra.mxu0 %vm483_vm0, %v450_v51  ;;  %v1077_v43 = vld [vmem:[#allocation2 + $0x148] sm:$0xff]  ;;  %v1086_v46 = vld [vmem:[#allocation2 + $0x190] sm:$0xff]  ;;  %v1036_v47 = vld [vmem:[#allocation2] sm:$0xff] }
  0x3d   : > { %4481 = vmatmul.mubr.msk.f32.gmra.mrb[4].mxu1 %vm452_vm1, %v439_v21  ;;  %v1089_v50 = vld [vmem:[#allocation2 + $0x1a8] sm:$0xff]  ;;  %v1092_v51 = vld [vmem:[#allocation2 + $0x1c0] sm:$0xff] }
  0x3e   : > { %4483 = vmatprep.mubr.msk.f32.mxu1 %vm452_vm1, %v5564_v20  ;;  %4444 = vmatmul.mubr.msk.f32.gmra.mrb[2].mxu0 %vm452_vm1, %v443_v32 }
  0x3f   : > { %4446 = vmatprep.mubr.msk.f32.mxu0 %vm452_vm1, %v444_v33 }
  0x41   : > { %4484 = vmatmul.mubr.msk.f32.gmra.mrb[6].mxu1 %vm452_vm1, %v441_v26 }
  0x42   : > { %4486 = vmatprep.mubr.msk.f32.mxu1 %vm452_vm1, %v442_v27  ;;  %4447 = vmatmul.mubr.msk.f32.gmra.mrb[4].mxu0 %vm452_vm1, %v445_v38 }
  0x43   : > { %4449 = vmatprep.mubr.msk.f32.mxu0 %vm452_vm1, %v446_v39 }
  0x45   : > { %4487 = vmatmul.mubr.msk.f32.gmra.mrb[8].mxu1 %vm452_vm1, %v443_v32 }
  0x46   : > { %4489 = vmatprep.mubr.msk.f32.mxu1 %vm452_vm1, %v444_v33  ;;  %4450 = vmatmul.mubr.msk.f32.gmra.mrb[6].mxu0 %vm452_vm1, %v447_v44  ;;  %v1047_v33 = vld [vmem:[#allocation2 + $0x58] sm:$0xff] }
  0x47   : > { %4452 = vmatprep.mubr.msk.f32.mxu0 %vm452_vm1, %v448_v45 }
  0x49   : > { %4490 = vmatmul.mubr.msk.f32.gmra.mrb[10].mxu1 %vm452_vm1, %v445_v38  ;;  %v1062_v38 = vld [vmem:[#allocation2 + $0xd0] sm:$0xff] }
  0x4a   : > { %4492 = vmatprep.mubr.msk.f32.mxu1 %vm452_vm1, %v446_v39  ;;  %4453 = vmatmul.mubr.msk.f32.gmra.mrb[8].mxu0 %vm452_vm1, %v449_v48  ;;  %v1065_v39 = vld [vmem:[#allocation2 + $0xe8] sm:$0xff] }
  0x4b   : > { %4457 = vmatprep.mubr.msk.f32.mxu0 %vm452_vm1, %v5523_v3 }
  0x4d   : > { %4493 = vmatmul.mubr.msk.f32.gmra.mrb[12].mxu1 %vm452_vm1, %v447_v44  ;;  %v1080_v44 = vld [vmem:[#allocation2 + $0x160] sm:$0xff] }
  0x4e   : > { %4495 = vmatprep.mubr.msk.f32.mxu1 %vm452_vm1, %v448_v45  ;;  %4458 = vmatmul.mubr.msk.f32.vlgmr.msra.gmra.mrb[0].mxu0 %vm452_vm1, %v5531_v7  ;;  %v1083_v45 = vld [vmem:[#allocation2 + $0x178] sm:$0xff] }
  0x4f   : > { %4460 = vmatprep.mubr.msk.f32.mxu0 %vm452_vm1, %v5542_v11 }
  0x51   : > { %4496 = vmatmul.mubr.msk.f32.gmra.mrb[14].mxu1 %vm452_vm1, %v449_v48  ;;  %v1040_v48 = vld [vmem:[#allocation2 + $0x20] sm:$0xff] }
  0x52   : > { %4461 = vmatmul.mubr.msk.f32.gmra.mrb[2].mxu0 %vm452_vm1, %v5550_v14  ;;  %1341 = vmatprep.mubr.f32.mxu1 %v1037_v53  ;;  %v1043_v53 = vld [vmem:[#allocation2 + $0x38] sm:$0xff] }
  0x53   : > { %4463 = vmatprep.mubr.msk.f32.mxu0 %vm452_vm1, %v5558_v17 }
  0x56   : > { %4464 = vmatmul.mubr.msk.f32.gmra.mrb[4].mxu0 %vm452_vm1, %v439_v21 }
  0x57   : > { %4466 = vmatprep.mubr.msk.f32.mxu0 %vm452_vm1, %v5564_v20 }
  0x5a   : > { %4467 = vmatmul.mubr.msk.f32.gmra.mrb[6].mxu0 %vm452_vm1, %v441_v26 }
  0x5b   : > { %4469 = vmatprep.mubr.msk.f32.mxu0 %vm452_vm1, %v442_v27 }
  0x5e   : > { %4470 = vmatmul.mubr.msk.f32.gmra.mrb[8].mxu0 %vm452_vm1, %v443_v32  ;;  %v1044_v32 = vld [vmem:[#allocation2 + $0x40] sm:$0xff] }
  0x5f   : > { %4514 = vmatprep.mubr.msk.f32.mxu0 %vm1156_vm2, %v1038_v52  ;;  %v1039_v52 = vld [vmem:[#allocation2 + $0x18] sm:$0xff] }
 0x108   : > { %v4476_v55 = vpop.f32.mrb[0].mxu1 }
 0x109   : > { %v958_v56 = vadd.f32 %v4476_v55, %v3981_v54  ;;  %v952_v57 = vpop.f32.mrb[1].mxu1  ;;  %v1098_v55 = vld [vmem:[#allocation2 + $0x1f0] sm:$0xff] }
 0x10a   : > { %v953_v58 = vadd.f32 %v3981_v54, %v952_v57  ;;  %v1046_v57 = vld [vmem:[#allocation2 + $0x50] sm:$0xff] }
 0x10c   : > { %v4787_v59 = vpack.c.bf16 %v958_v56, %v953_v58  ;;  %v4479_v60 = vpop.f32.mrb[2].mxu1  ;;  %v1042_v56 = vld [vmem:[#allocation2 + $0x30] sm:$0xff]  ;;  %v1101_v58 = vld [vmem:[#allocation2 + $0x208] sm:$0xff] }
 0x10d   : > { %v968_v61 = vadd.f32 %v4479_v60, %v3981_v54  ;;  %v962_v62 = vpop.f32.mrb[3].mxu1  ;;  %v1045_v60 = vld [vmem:[#allocation2 + $0x48] sm:$0xff] }
 0x10e   : > { %v963_v63 = vadd.f32 %v3981_v54, %v962_v62  ;;  %4788 = vmatpush1.bf16.msra.mxu1 %v4787_v59  ;;  %v1104_v59 = vld [vmem:[#allocation2 + $0x220] sm:$0xff]  ;;  %v1107_v62 = vld [vmem:[#allocation2 + $0x238] sm:$0xff] }
 0x10f   : > { %4789 = vmatprep.subr.bf16.mxu1 %v6649_v49 }
 0x110   : > { %v4790_v0 = vpack.c.bf16 %v968_v61, %v963_v63  ;;  %v4482_v1 = vpop.f32.mrb[4].mxu1  ;;  %v1049_v61 = vld [vmem:[#allocation2 + $0x68] sm:$0xff]  ;;  %v1110_v63 = vld [vmem:[#allocation2 + $0x250] sm:$0xff] }
 0x111   : > { %v978_v2 = vadd.f32 %v4482_v1, %v3981_v54  ;;  %v972_v3 = vpop.f32.mrb[5].mxu1  ;;  %v1052_v1 = vld [vmem:[#allocation2 + $0x80] sm:$0xff] }
 0x112   : > { %v973_v4 = vadd.f32 %v3981_v54, %v972_v3  ;;  %4791 = vmatpush1.bf16.msra.mxu1 %v4790_v0  ;;  %v1116_v3 = vld [vmem:[#allocation2 + $0x280] sm:$0xff] }
 0x113   : > { %4792 = vmatprep.subr.bf16.mxu1 %v6649_v49 }
 0x114   : > { %v4793_v5 = vpack.c.bf16 %v978_v2, %v973_v4  ;;  %v4485_v6 = vpop.f32.mrb[6].mxu1  ;;  %v1113_v2 = vld [vmem:[#allocation2 + $0x268] sm:$0xff]  ;;  %v1051_v4 = vld [vmem:[#allocation2 + $0x78] sm:$0xff] }
 0x115   : > { %v988_v7 = vadd.f32 %v4485_v6, %v3981_v54  ;;  %v982_v8 = vpop.f32.mrb[7].mxu1  ;;  %v1119_v6 = vld [vmem:[#allocation2 + $0x298] sm:$0xff] }
 0x116   : > { %v983_v9 = vadd.f32 %v3981_v54, %v982_v8  ;;  %4794 = vmatpush1.bf16.msra.mxu1 %v4793_v5  ;;  %v1054_v8 = vld [vmem:[#allocation2 + $0x90] sm:$0xff] }
 0x117   : > { %4795 = vmatprep.subr.bf16.mxu1 %v6649_v49 }
 0x118   : > { %v5663_v10 = vpack.c.bf16 %v988_v7, %v983_v9  ;;  %v4488_v11 = vpop.f32.mrb[8].mxu1  ;;  %v1122_v7 = vld [vmem:[#allocation2 + $0x2b0] sm:$0xff] }
 0x119   : > { %v998_v12 = vadd.f32 %v4488_v11, %v3981_v54  ;;  %v992_v13 = vpop.f32.mrb[9].mxu1  ;;  %v1058_v9 = vld [vmem:[#allocation2 + $0xb0] sm:$0xff]  ;;  %v1128_v11 = vld [vmem:[#allocation2 + $0x2e0] sm:$0xff] }
 0x11a   : > { %4797 = vmatpush1.bf16.msra.mxu1 %v5663_v10  ;;  %v993_v14 = vadd.f32 %v3981_v54, %v992_v13  ;;  %v1061_v13 = vld [vmem:[#allocation2 + $0xc8] sm:$0xff] }
 0x11b   : > { %4798 = vmatprep.subr.bf16.mxu1 %v6649_v49 }
 0x11c   : > { %v5667_v15 = vpack.c.bf16 %v998_v12, %v993_v14  ;;  %v4491_v16 = vpop.f32.mrb[10].mxu1  ;;  %v1057_v12 = vld [vmem:[#allocation2 + $0xa8] sm:$0xff]  ;;  %v1131_v14 = vld [vmem:[#allocation2 + $0x2f8] sm:$0xff] }
 0x11d   : > { %v1008_v17 = vadd.f32 %v4491_v16, %v3981_v54  ;;  %v1002_v18 = vpop.f32.mrb[11].mxu1  ;;  %v1031_v16 = vld [vmem:[%s6642_s7] sm:$0xff] }
 0x11e   : > { %4800 = vmatpush1.bf16.msra.mxu1 %v4790_v0  ;;  %4835 = vmatprep.subr.bf16.mxu0 %v5667_v15  ;;  %v1003_v19 = vadd.f32 %v3981_v54, %v1002_v18  ;;  %v1048_v0 = vld [vmem:[#allocation2 + $0x60] sm:$0xff] }
 0x11f   : > { %4801 = vmatprep.subr.bf16.mxu1 %v6649_v49  ;;  %4837 = vmatpush3.bf16.msra.mxu0 %v5667_v15  ;;  %v1060_v18 = vld [vmem:[#allocation2 + $0xc0] sm:$0xff] }
 0x120   : > { %v4820_v20 = vpack.c.bf16 %v1008_v17, %v1003_v19  ;;  %v4494_v21 = vpop.f32.mrb[12].mxu1  ;;  %v1032_v17 = vld [vmem:[%s6642_s7 + $0x8] sm:$0xff] }
 0x121   : > { %v1018_v22 = vadd.f32 %v4494_v21, %v3981_v54  ;;  %v1012_v23 = vpop.f32.mrb[13].mxu1  ;;  %v4850_v19 = vpack.c.bf16 %v1032_v17, %v1031_v16  ;;  %v1137_v21 = vld [vmem:[#allocation2 + $0x328] sm:$0xff]  ;;  %v1114_v16 = vld [vmem:[#allocation2 + $0x270] sm:$0xff] }
 0x122   : > { %4803 = vmatpush1.bf16.msra.mxu1 %v4793_v5  ;;  %4839 = vmatprep.subr.bf16.mxu0 %v4820_v20  ;;  %v1013_v24 = vadd.f32 %v3981_v54, %v1012_v23  ;;  %v1063_v23 = vld [vmem:[#allocation2 + $0xd8] sm:$0xff]  ;;  %v1118_v17 = vld [vmem:[#allocation2 + $0x290] sm:$0xff] }
 0x123   : > { %4804 = vmatprep.subr.bf16.mxu1 %v6649_v49  ;;  %4841 = vmatpush3.bf16.msra.mxu0 %v4820_v20 }
 0x124   : > { %v4832_v25 = vpack.c.bf16 %v1018_v22, %v1013_v24  ;;  %v4497_v26 = vpop.f32.mrb[14].mxu1  ;;  %v1140_v22 = vld [vmem:[#allocation2 + $0x340] sm:$0xff]  ;;  %v1067_v24 = vld [vmem:[#allocation2 + $0xf8] sm:$0xff] }
 0x125   : > { %v1028_v27 = vadd.f32 %v4497_v26, %v3981_v54  ;;  %v1022_v28 = vpop.f32.mrb[15].mxu1  ;;  %v1146_v26 = vld [vmem:[#allocation2 + $0x370] sm:$0xff] }
 0x126   : > { %4806 = vmatpush1.bf16.msra.mxu1 %v5663_v10  ;;  %v1023_v29 = vadd.f32 %v3981_v54, %v1022_v28  ;;  %4843 = vmatprep.subr.bf16.mxu0 %v4832_v25  ;;  %v1095_v54 = vld [vmem:[#allocation2 + $0x1d8] sm:$0xff]  ;;  %v1070_v28 = vld [vmem:[#allocation2 + $0x110] sm:$0xff] }
 0x127   : > { %4807 = vmatprep.subr.bf16.mxu1 %v6649_v49  ;;  %4845 = vmatpush3.bf16.msra.mxu0 %v4832_v25 }
 0x128   : > { %v4846_v30 = vpack.c.bf16 %v1028_v27, %v1023_v29  ;;  %v1066_v27 = vld [vmem:[#allocation2 + $0xf0] sm:$0xff]  ;;  %v1149_v29 = vld [vmem:[#allocation2 + $0x388] sm:$0xff] }
 0x12a   : > { %4809 = vmatpush1.bf16.msra.mxu1 %v5667_v15  ;;  %4847 = vmatprep.subr.bf16.mxu0 %v4846_v30 }
 0x12b   : > { %4810 = vmatprep.subr.bf16.mxu1 %v6649_v49  ;;  %4849 = vmatpush3.bf16.msra.mxu0 %v4846_v30  ;;  %v1152_v30 = vld [vmem:[#allocation2 + $0x3a0] sm:$0xff] }
 0x12c   : > { %4851 = vmatprep.subr.bf16.mxu0 %v4850_v19 }
 0x12e   : > { %4812 = vmatpush1.bf16.msra.mxu1 %v4793_v5  ;;  %4515 = vmatmul.mubr.msk.f32.vlgmr.msra.gmra.mrb[10].mxu0 %vm1156_vm2, %v1041_v31  ;;  %v1055_v5 = vld [vmem:[#allocation2 + $0x98] sm:$0xff]  ;;  %v1069_v31 = vld [vmem:[#allocation2 + $0x108] sm:$0xff] }
 0x12f   : > { %4813 = vmatprep.subr.bf16.mxu1 %v6649_v49  ;;  %4517 = vmatprep.mubr.msk.f32.mxu0 %vm1156_vm2, %v1044_v32  ;;  %v1073_v32 = vld [vmem:[#allocation2 + $0x128] sm:$0xff] }
 0x130   : > { %4853 = vmatpush3.bf16.msra.mxu0 %v4850_v19  ;;  %v1121_v19 = vld [vmem:[#allocation2 + $0x2a8] sm:$0xff] }
 0x132   : > { %4815 = vmatpush1.bf16.msra.mxu1 %v5663_v10  ;;  %4518 = vmatmul.mubr.msk.f32.gmra.mrb[12].mxu0 %vm1156_vm2, %v1047_v33  ;;  %v1155_v33 = vld [vmem:[#allocation2 + $0x3b8] sm:$0xff] }
 0x133   : > { %4816 = vmatprep.subr.bf16.mxu1 %v6649_v49  ;;  %4520 = vmatprep.mubr.msk.f32.mxu0 %vm1156_vm2, %v1050_v34  ;;  %v1072_v34 = vld [vmem:[#allocation2 + $0x120] sm:$0xff] }
 0x136   : > { %4818 = vmatpush1.bf16.msra.mxu1 %v5667_v15  ;;  %4521 = vmatmul.mubr.msk.f32.gmra.mrb[14].mxu0 %vm1156_vm2, %v1053_v35  ;;  %v1076_v35 = vld [vmem:[#allocation2 + $0x140] sm:$0xff] }
 0x137   : > { %4819 = vmatprep.subr.bf16.mxu1 %v6649_v49  ;;  %4523 = vmatprep.mubr.msk.f32.mxu0 %vm1156_vm2, %v5684_v36 }
 0x13a   : > { %4821 = vmatpush1.bf16.msra.mxu1 %v4820_v20  ;;  %4524 = vmatmul.mubr.msk.f32.gmra.mrb[16].mxu0 %vm1156_vm2, %v1059_v37  ;;  %v5736_v37 = vpop.f32.mrb[0].mxu0 }
 0x13b   : > { %4822 = vmatprep.subr.bf16.mxu1 %v6649_v49  ;;  %4526 = vmatprep.mubr.msk.f32.mxu0 %vm1156_vm2, %v1062_v38  ;;  %v5738_v38 = vpop.f32.mrb[1].mxu0 }
 0x13e   : > { %4824 = vmatpush1.bf16.msra.mxu1 %v5663_v10  ;;  %4527 = vmatmul.mubr.msk.f32.gmra.mrb[18].mxu0 %vm1156_vm2, %v1065_v39  ;;  %v1125_v10 = vld [vmem:[#allocation2 + $0x2c8] sm:$0xff]  ;;  %v1075_v39 = vld [vmem:[#allocation2 + $0x138] sm:$0xff] }
 0x13f   : > { %4825 = vmatprep.subr.bf16.mxu1 %v6649_v49  ;;  %4529 = vmatprep.mubr.msk.f32.mxu0 %vm1156_vm2, %v1068_v40  ;;  %v1079_v40 = vld [vmem:[#allocation2 + $0x158] sm:$0xff] }
 0x142   : > { %4827 = vmatpush1.bf16.msra.mxu1 %v5667_v15  ;;  %4530 = vmatmul.mubr.msk.f32.gmra.mrb[20].mxu0 %vm1156_vm2, %v1071_v41  ;;  %v1134_v15 = vld [vmem:[#allocation2 + $0x310] sm:$0xff]  ;;  %v5740_v41 = vpop.f32.mrb[2].mxu0 }
 0x143   : > { %4828 = vmatprep.subr.bf16.mxu1 %v6649_v49  ;;  %4532 = vmatprep.mubr.msk.f32.mxu0 %vm1156_vm2, %v1074_v42  ;;  %v5742_v42 = vpop.f32.mrb[3].mxu0 }
 0x146   : > { %4830 = vmatpush1.bf16.msra.mxu1 %v4820_v20  ;;  %4533 = vmatmul.mubr.msk.f32.gmra.mrb[22].mxu0 %vm1156_vm2, %v1077_v43  ;;  %v1064_v20 = vld [vmem:[#allocation2 + $0xe0] sm:$0xff]  ;;  %v1078_v43 = vld [vmem:[#allocation2 + $0x150] sm:$0xff] }
 0x147   : > { %4831 = vmatprep.subr.bf16.mxu1 %v6649_v49  ;;  %4535 = vmatprep.mubr.msk.f32.mxu0 %vm1156_vm2, %v1080_v44  ;;  %v1082_v44 = vld [vmem:[#allocation2 + $0x170] sm:$0xff] }
 0x14a   : > { %4833 = vmatpush1.bf16.msra.mxu1 %v4832_v25  ;;  %4536 = vmatmul.mubr.msk.f32.gmra.mrb[24].mxu0 %vm1156_vm2, %v1083_v45  ;;  %v1143_v25 = vld [vmem:[#allocation2 + $0x358] sm:$0xff]  ;;  %v5744_v45 = vpop.f32.mrb[4].mxu0 }
 0x14b   : > { %4538 = vmatprep.mubr.msk.f32.mxu0 %vm1156_vm2, %v1086_v46  ;;  %v5746_v46 = vpop.f32.mrb[5].mxu0 }
 0x14d   : > { %1342 = vmatmul.mubr.f32.vlgmr.msra.gmra.mrb[16].mxu1 %v1036_v47  ;;  %v1081_v47 = vld [vmem:[#allocation2 + $0x168] sm:$0xff] }
 0x14e   : > { %1346 = vmatprep.mubr.f32.mxu1 %v1040_v48  ;;  %4539 = vmatmul.mubr.msk.f32.gmra.mrb[26].mxu0 %vm1156_vm2, %v1089_v50  ;;  %v1085_v48 = vld [vmem:[#allocation2 + $0x188] sm:$0xff]  ;;  %v5748_v50 = vpop.f32.mrb[6].mxu0 }
 0x14f   : > { %4541 = vmatprep.mubr.msk.f32.mxu0 %vm1156_vm2, %v1092_v51  ;;  %v5750_v51 = vpop.f32.mrb[7].mxu0 }
 0x151   : > { %1347 = vmatmul.mubr.f32.gmra.mrb[18].mxu1 %v1039_v52  ;;  %v1084_v52 = vld [vmem:[#allocation2 + $0x180] sm:$0xff] }
 0x152   : > { %1351 = vmatprep.mubr.f32.mxu1 %v1043_v53  ;;  %4542 = vmatmul.mubr.msk.f32.gmra.mrb[28].mxu0 %vm1156_vm2, %v1095_v54  ;;  %v1088_v53 = vld [vmem:[#allocation2 + $0x1a0] sm:$0xff] }
 0x153   : > { %4544 = vmatprep.mubr.msk.f32.mxu0 %vm1156_vm2, %v1098_v55  ;;  %v3970_v54 = vld [vmem:[%s6639_s4] ss:$0 sm:$0xff]  ;;  %v4471_v55 = vpop.f32.mrb[8].mxu0 }
 0x155   : > { %1352 = vmatmul.mubr.f32.gmra.mrb[20].mxu1 %v1042_v56  ;;  %v5755_v56 = vadd.f32 %v4471_v55, %v3970_v54 }
 0x156   : > { %1356 = vmatprep.mubr.f32.mxu1 %v1046_v57  ;;  %4545 = vmatmul.mubr.msk.f32.gmra.mrb[30].mxu0 %vm1156_vm2, %v1101_v58  ;;  %v729_v57 = vpop.f32.mrb[9].mxu0  ;;  %v1087_v58 = vld [vmem:[#allocation2 + $0x198] sm:$0xff] }
 0x157   : > { %4547 = vmatprep.mubr.msk.f32.mxu0 %vm1156_vm2, %v1104_v59  ;;  %v5757_v59 = vadd.f32 %v3970_v54, %v729_v57 }
 0x159   : > { %1357 = vmatmul.mubr.f32.gmra.mrb[22].mxu1 %v1045_v60  ;;  %6672 = vst [vmem:[#allocation5_spill] sm:$0xff] %v5757_v59  ;;  %v1091_v60 = vld [vmem:[#allocation2 + $0x1b8] sm:$0xff] }
 0x15a   : > { %1361 = vmatprep.mubr.f32.mxu1 %v1049_v61  ;;  %4548 = vmatmul.mubr.msk.f32.gmra.mrb[32].mxu0 %vm1156_vm2, %v1107_v62  ;;  %v1090_v61 = vld [vmem:[#allocation2 + $0x1b0] sm:$0xff] }
 0x15b   : > { %4550 = vmatprep.mubr.msk.f32.mxu0 %vm1156_vm2, %v1110_v63  ;;  %v1094_v62 = vld [vmem:[#allocation2 + $0x1d0] sm:$0xff]  ;;  %v1093_v63 = vld [vmem:[#allocation2 + $0x1c8] sm:$0xff] }
 0x15d   : > { %1362 = vmatmul.mubr.f32.gmra.mrb[24].mxu1 %v1048_v0  ;;  %v1097_v0 = vld [vmem:[#allocation2 + $0x1e8] sm:$0xff] }
 0x15e   : > { %1366 = vmatprep.mubr.f32.mxu1 %v1052_v1  ;;  %4551 = vmatmul.mubr.msk.f32.gmra.mrb[34].mxu0 %vm1156_vm2, %v1113_v2  ;;  %v1096_v1 = vld [vmem:[#allocation2 + $0x1e0] sm:$0xff] }
 0x15f   : > { %4553 = vmatprep.mubr.msk.f32.mxu0 %vm1156_vm2, %v1116_v3  ;;  %v1100_v2 = vld [vmem:[#allocation2 + $0x200] sm:$0xff]  ;;  %v1099_v3 = vld [vmem:[#allocation2 + $0x1f8] sm:$0xff] }
 0x161   : > { %1367 = vmatmul.mubr.f32.gmra.mrb[26].mxu1 %v1051_v4  ;;  %v1103_v4 = vld [vmem:[#allocation2 + $0x218] sm:$0xff] }
 0x162   : > { %1371 = vmatprep.mubr.f32.mxu1 %v1055_v5  ;;  %4554 = vmatmul.mubr.msk.f32.gmra.mrb[36].mxu0 %vm1156_vm2, %v1119_v6  ;;  %v1033_v5 = vld [vmem:[%s6642_s7 + $0x10] sm:$0xff]  ;;  %v1034_v6 = vld [vmem:[%s6642_s7 + $0x18] sm:$0xff] }
 0x163   : > { %4556 = vmatprep.mubr.msk.f32.mxu0 %vm1156_vm2, %v1122_v7  ;;  %v4854_v7 = vpack.c.bf16 %v1034_v6, %v1033_v5 }
 0x165   : > { %1372 = vmatmul.mubr.f32.gmra.mrb[28].mxu1 %v1054_v8  ;;  %v1102_v8 = vld [vmem:[#allocation2 + $0x210] sm:$0xff]  ;;  %4855 = vmatprep.subr.bf16.mxu0 %v4854_v7 }
 0x166   : > { %1376 = vmatprep.mubr.f32.mxu1 %v1058_v9  ;;  %4557 = vmatmul.mubr.msk.f32.gmra.mrb[38].mxu0 %vm1156_vm2, %v1125_v10  ;;  %v1106_v9 = vld [vmem:[#allocation2 + $0x230] sm:$0xff]  ;;  %v1105_v10 = vld [vmem:[#allocation2 + $0x228] sm:$0xff] }
 0x167   : > { %4559 = vmatprep.mubr.msk.f32.mxu0 %vm1156_vm2, %v1128_v11  ;;  %4857 = vmatpush3.bf16.msra.mxu0 %v4854_v7  ;;  %v1109_v11 = vld [vmem:[#allocation2 + $0x248] sm:$0xff] }
 0x168   : > { %4858 = vmatprep.subr.bf16.mxu0 %v6649_v49 }
 0x169   : > { %1377 = vmatmul.mubr.f32.gmra.mrb[30].mxu1 %v1057_v12  ;;  %v1108_v12 = vld [vmem:[#allocation2 + $0x240] sm:$0xff] }
 0x16a   : > { %1381 = vmatprep.mubr.f32.mxu1 %v1061_v13  ;;  %4560 = vmatmul.mubr.msk.f32.gmra.mrb[40].mxu0 %vm1156_vm2, %v1131_v14  ;;  %v1112_v13 = vld [vmem:[#allocation2 + $0x260] sm:$0xff]  ;;  %v1111_v14 = vld [vmem:[#allocation2 + $0x258] sm:$0xff] }
 0x16b   : > { %4562 = vmatprep.mubr.msk.f32.mxu0 %vm1156_vm2, %v1134_v15  ;;  %v1115_v15 = vld [vmem:[#allocation2 + $0x278] sm:$0xff] }
 0x16d   : > { %1382 = vmatmul.mubr.f32.gmra.mrb[32].mxu1 %v1060_v18  ;;  %v1117_v18 = vld [vmem:[#allocation2 + $0x288] sm:$0xff] }
 0x16e   : > { %1386 = vmatprep.mubr.f32.mxu1 %v1064_v20  ;;  %4563 = vmatmul.mubr.msk.f32.gmra.mrb[42].mxu0 %vm1156_vm2, %v1137_v21  ;;  %v1120_v20 = vld [vmem:[#allocation2 + $0x2a0] sm:$0xff] }
 0x16f   : > { %4565 = vmatprep.mubr.msk.f32.mxu0 %vm1156_vm2, %v1140_v22  ;;  %v1124_v21 = vld [vmem:[#allocation2 + $0x2c0] sm:$0xff]  ;;  %v1123_v22 = vld [vmem:[#allocation2 + $0x2b8] sm:$0xff] }
 0x171   : > { %1387 = vmatmul.mubr.f32.gmra.mrb[34].mxu1 %v1063_v23  ;;  %v1127_v23 = vld [vmem:[#allocation2 + $0x2d8] sm:$0xff] }
 0x172   : > { %1391 = vmatprep.mubr.f32.mxu1 %v1067_v24  ;;  %4566 = vmatmul.mubr.msk.f32.gmra.mrb[44].mxu0 %vm1156_vm2, %v1143_v25  ;;  %v1126_v24 = vld [vmem:[#allocation2 + $0x2d0] sm:$0xff] }
 0x173   : > { %4568 = vmatprep.mubr.msk.f32.mxu0 %vm1156_vm2, %v1146_v26  ;;  %v1130_v25 = vld [vmem:[#allocation2 + $0x2f0] sm:$0xff]  ;;  %v1129_v26 = vld [vmem:[#allocation2 + $0x2e8] sm:$0xff] }
 0x175   : > { %1392 = vmatmul.mubr.f32.gmra.mrb[36].mxu1 %v1066_v27  ;;  %v1133_v27 = vld [vmem:[#allocation2 + $0x308] sm:$0xff] }
 0x176   : > { %1396 = vmatprep.mubr.f32.mxu1 %v1070_v28  ;;  %4569 = vmatmul.mubr.msk.f32.gmra.mrb[46].mxu0 %vm1156_vm2, %v1149_v29  ;;  %v1132_v28 = vld [vmem:[#allocation2 + $0x300] sm:$0xff] }
 0x177   : > { %4571 = vmatprep.mubr.msk.f32.mxu0 %vm1156_vm2, %v1152_v30  ;;  %v1136_v29 = vld [vmem:[#allocation2 + $0x320] sm:$0xff]  ;;  %v1135_v30 = vld [vmem:[#allocation2 + $0x318] sm:$0xff] }
 0x179   : > { %1397 = vmatmul.mubr.f32.gmra.mrb[38].mxu1 %v1069_v31  ;;  %v1139_v31 = vld [vmem:[#allocation2 + $0x338] sm:$0xff] }
 0x17a   : > { %1401 = vmatprep.mubr.f32.mxu1 %v1073_v32  ;;  %4572 = vmatmul.mubr.msk.f32.gmra.mrb[48].mxu0 %vm1156_vm2, %v1155_v33  ;;  %v1138_v32 = vld [vmem:[#allocation2 + $0x330] sm:$0xff] }
 0x17b   : > { %v1142_v33 = vld [vmem:[#allocation2 + $0x350] sm:$0xff] }
 0x17d   : > { %1402 = vmatmul.mubr.f32.gmra.mrb[40].mxu1 %v1072_v34  ;;  %v1141_v34 = vld [vmem:[#allocation2 + $0x348] sm:$0xff] }
 0x17e   : > { %1406 = vmatprep.mubr.f32.mxu1 %v1076_v35  ;;  %v1145_v35 = vld [vmem:[#allocation2 + $0x368] sm:$0xff] }
 0x181   : > { %1407 = vmatmul.mubr.f32.gmra.mrb[42].mxu1 %v1075_v39  ;;  %v1144_v39 = vld [vmem:[#allocation2 + $0x360] sm:$0xff] }
 0x182   : > { %1411 = vmatprep.mubr.f32.mxu1 %v1079_v40  ;;  %v1148_v40 = vld [vmem:[#allocation2 + $0x380] sm:$0xff] }
 0x185   : > { %1412 = vmatmul.mubr.f32.gmra.mrb[44].mxu1 %v1078_v43  ;;  %v1147_v43 = vld [vmem:[#allocation2 + $0x378] sm:$0xff] }
 0x186   : > { %1416 = vmatprep.mubr.f32.mxu1 %v1082_v44  ;;  %v1151_v44 = vld [vmem:[#allocation2 + $0x398] sm:$0xff] }
 0x189   : > { %1417 = vmatmul.mubr.f32.gmra.mrb[46].mxu1 %v1081_v47  ;;  %v1150_v47 = vld [vmem:[#allocation2 + $0x390] sm:$0xff] }
 0x18a   : > { %1421 = vmatprep.mubr.f32.mxu1 %v1085_v48  ;;  %v1154_v48 = vld [vmem:[#allocation2 + $0x3b0] sm:$0xff] }
 0x18d   : > { %1422 = vmatmul.mubr.f32.gmra.mrb[48].mxu1 %v1084_v52  ;;  %v1153_v52 = vld [vmem:[#allocation2 + $0x3a8] sm:$0xff] }
 0x18e   : > { %1426 = vmatprep.mubr.f32.mxu1 %v1088_v53 }
 0x191   : > { %1427 = vmatmul.mubr.f32.gmra.mrb[50].mxu1 %v1087_v58 }
 0x192   : > { %1431 = vmatprep.mubr.f32.mxu1 %v1091_v60 }
 0x195   : > { %1432 = vmatmul.mubr.f32.gmra.mrb[52].mxu1 %v1090_v61 }
 0x196   : > { %1436 = vmatprep.mubr.f32.mxu1 %v1094_v62 }
 0x199   : > { %1437 = vmatmul.mubr.f32.gmra.mrb[54].mxu1 %v1093_v63 }
 0x19a   : > { %1441 = vmatprep.mubr.f32.mxu1 %v1097_v0 }
 0x19d   : > { %1442 = vmatmul.mubr.f32.gmra.mrb[56].mxu1 %v1096_v1 }
 0x19e   : > { %1446 = vmatprep.mubr.f32.mxu1 %v1100_v2 }
 0x1a1   : > { %1447 = vmatmul.mubr.f32.gmra.mrb[58].mxu1 %v1099_v3 }
 0x1a2   : > { %1451 = vmatprep.mubr.f32.mxu1 %v1103_v4 }
 0x1a5   : > { %1452 = vmatmul.mubr.f32.gmra.mrb[60].mxu1 %v1102_v8 }
 0x1a6   : > { %1456 = vmatprep.mubr.f32.mxu1 %v1106_v9 }
 0x1a9   : > { %1457 = vmatmul.mubr.f32.gmra.mrb[62].mxu1 %v1105_v10 }
 0x1aa   : > { %1461 = vmatprep.mubr.f32.mxu1 %v1109_v11 }
 0x1ad   : > { %1462 = vmatmul.mubr.f32.gmra.mrb[64].mxu1 %v1108_v12 }
 0x1ae   : > { %1466 = vmatprep.mubr.f32.mxu1 %v1112_v13 }
 0x1b1   : > { %1467 = vmatmul.mubr.f32.gmra.mrb[66].mxu1 %v1111_v14 }
 0x1b2   : > { %1471 = vmatprep.mubr.f32.mxu1 %v1115_v15 }
 0x1b5   : > { %1472 = vmatmul.mubr.f32.gmra.mrb[68].mxu1 %v1114_v16 }
 0x1b6   : > { %1476 = vmatprep.mubr.f32.mxu1 %v1118_v17 }
 0x1b9   : > { %1477 = vmatmul.mubr.f32.gmra.mrb[70].mxu1 %v1117_v18 }
 0x1ba   : > { %1481 = vmatprep.mubr.f32.mxu1 %v1121_v19 }
 0x1bd   : > { %1482 = vmatmul.mubr.f32.gmra.mrb[72].mxu1 %v1120_v20 }
 0x1be   : > { %1486 = vmatprep.mubr.f32.mxu1 %v1124_v21 }
 0x1c1   : > { %1487 = vmatmul.mubr.f32.gmra.mrb[74].mxu1 %v1123_v22 }
 0x1c2   : > { %1491 = vmatprep.mubr.f32.mxu1 %v1127_v23 }
 0x1c5   : > { %1492 = vmatmul.mubr.f32.gmra.mrb[76].mxu1 %v1126_v24 }
 0x1c6   : > { %1496 = vmatprep.mubr.f32.mxu1 %v1130_v25 }
 0x1c9   : > { %1497 = vmatmul.mubr.f32.gmra.mrb[78].mxu1 %v1129_v26 }
 0x1ca   : > { %1501 = vmatprep.mubr.f32.mxu1 %v1133_v27 }
 0x1cd   : > { %1502 = vmatmul.mubr.f32.gmra.mrb[80].mxu1 %v1132_v28 }
 0x1ce   : > { %1506 = vmatprep.mubr.f32.mxu1 %v1136_v29 }
 0x1d1   : > { %1507 = vmatmul.mubr.f32.gmra.mrb[82].mxu1 %v1135_v30 }
 0x1d2   : > { %1511 = vmatprep.mubr.f32.mxu1 %v1139_v31 }
 0x1d5   : > { %1512 = vmatmul.mubr.f32.gmra.mrb[84].mxu1 %v1138_v32 }
 0x1d6   : > { %1516 = vmatprep.mubr.f32.mxu1 %v1142_v33 }
 0x1d9   : > { %1517 = vmatmul.mubr.f32.gmra.mrb[86].mxu1 %v1141_v34 }
 0x1da   : > { %1521 = vmatprep.mubr.f32.mxu1 %v1145_v35 }
 0x1dd   : > { %1522 = vmatmul.mubr.f32.gmra.mrb[88].mxu1 %v1144_v39 }
 0x1de   : > { %1526 = vmatprep.mubr.f32.mxu1 %v1148_v40 }
 0x1e1   : > { %1527 = vmatmul.mubr.f32.gmra.mrb[90].mxu1 %v1147_v43 }
 0x1e2   : > { %1531 = vmatprep.mubr.f32.mxu1 %v1151_v44 }
 0x1e5   : > { %1532 = vmatmul.mubr.f32.gmra.mrb[92].mxu1 %v1150_v47 }
 0x1e6   : > { %1536 = vmatprep.mubr.f32.mxu1 %v1154_v48 }
 0x1e9   : > { %1537 = vmatmul.mubr.f32.gmra.mrb[94].mxu1 %v1153_v52 }
 0x1ea   : > { %4667 = vmatprep.mubr.msk.f32.mxu1 %vm1156_vm2, %v5684_v36 }
 0x201   : > { %v4516_v53 = vpop.f32.mrb[10].mxu0 }
 0x202   : > { %v1608_v54 = vpop.f32.mrb[11].mxu0 }
 0x205   : > { %v4519_v55 = vpop.f32.mrb[12].mxu0 }
 0x206   : > { %v1618_v57 = vpop.f32.mrb[13].mxu0 }
 0x209   : > { %v4522_v58 = vpop.f32.mrb[14].mxu0 }
 0x20a   : > { %v1628_v60 = vpop.f32.mrb[15].mxu0 }
 0x20d   : > { %v4525_v61 = vpop.f32.mrb[16].mxu0 }
 0x20e   : > { %v1638_v62 = vpop.f32.mrb[17].mxu0 }
 0x211   : > { %v5768_v63 = vpop.f32.mrb[18].mxu0 }
 0x212   : > { %v1648_v0 = vpop.f32.mrb[19].mxu0 }
 0x215   : > { %v5770_v1 = vpop.f32.mrb[20].mxu0 }
 0x216   : > { %v5772_v2 = vpop.f32.mrb[21].mxu0 }
 0x219   : > { %v5774_v3 = vpop.f32.mrb[22].mxu0 }
 0x21a   : > { %v5776_v4 = vpop.f32.mrb[23].mxu0 }
 0x21d   : > { %v5778_v36 = vpop.f32.mrb[24].mxu0 }
 0x21e   : > { %v5780_v5 = vpop.f32.mrb[25].mxu0 }
 0x220   : > { %v1343_v6 = vpop.f32.mrb[16].mxu1 }
 0x221   : > { %v1609_v7 = vadd.f32 %v1608_v54, %v1343_v6  ;;  %v1345_v8 = vpop.f32.mrb[17].mxu1  ;;  %v5782_v9 = vpop.f32.mrb[26].mxu0 }
 0x222   : > { %v5784_v10 = vpop.f32.mrb[27].mxu0 }
 0x223   : > { %4582 = vmatprep.mubr.msk.f32.mxu0 %vm1813_vm3, %v1609_v7 }
 0x224   : > { %v1348_v11 = vpop.f32.mrb[18].mxu1 }
 0x225   : > { %v1614_v12 = vadd.f32 %v4516_v53, %v1348_v11  ;;  %v1350_v13 = vpop.f32.mrb[19].mxu1  ;;  %v5787_v14 = vpop.f32.mrb[28].mxu0 }
 0x226   : > { %v5789_v15 = vpop.f32.mrb[29].mxu0 }
 0x227   : > { %4583 = vmatmul.mubr.msk.f32.vlgmr.msra.gmra.mrb[50].mxu0 %vm1813_vm3, %v1614_v12 }
 0x228   : > { %v1353_v16 = vpop.f32.mrb[20].mxu1 }
 0x229   : > { %v1619_v17 = vadd.f32 %v1618_v57, %v1353_v16  ;;  %v1355_v18 = vpop.f32.mrb[21].mxu1  ;;  %v5792_v19 = vpop.f32.mrb[30].mxu0 }
 0x22a   : > { %v5794_v20 = vpop.f32.mrb[31].mxu0 }
 0x22b   : > { %4585 = vmatprep.mubr.msk.f32.mxu0 %vm1813_vm3, %v1619_v17 }
 0x22c   : > { %v1358_v21 = vpop.f32.mrb[22].mxu1 }
 0x22d   : > { %v1624_v22 = vadd.f32 %v4519_v55, %v1358_v21  ;;  %v1360_v23 = vpop.f32.mrb[23].mxu1  ;;  %v5797_v24 = vpop.f32.mrb[32].mxu0 }
 0x22e   : > { %v5799_v25 = vpop.f32.mrb[33].mxu0 }
 0x22f   : > { %4586 = vmatmul.mubr.msk.f32.gmra.mrb[52].mxu0 %vm1813_vm3, %v1624_v22 }
 0x230   : > { %v1363_v26 = vpop.f32.mrb[24].mxu1 }
 0x231   : > { %v1629_v27 = vadd.f32 %v1628_v60, %v1363_v26  ;;  %v1365_v28 = vpop.f32.mrb[25].mxu1  ;;  %v5802_v29 = vpop.f32.mrb[34].mxu0 }
 0x232   : > { %v5804_v30 = vpop.f32.mrb[35].mxu0 }
 0x233   : > { %4588 = vmatprep.mubr.msk.f32.mxu0 %vm1813_vm3, %v1629_v27 }
 0x234   : > { %v1368_v31 = vpop.f32.mrb[26].mxu1 }
 0x235   : > { %v1634_v32 = vadd.f32 %v4522_v58, %v1368_v31  ;;  %v1370_v33 = vpop.f32.mrb[27].mxu1  ;;  %v5807_v34 = vpop.f32.mrb[36].mxu0 }
 0x236   : > { %v5809_v35 = vpop.f32.mrb[37].mxu0 }
 0x237   : > { %4589 = vmatmul.mubr.msk.f32.gmra.mrb[54].mxu0 %vm1813_vm3, %v1634_v32 }
 0x238   : > { %v1373_v39 = vpop.f32.mrb[28].mxu1 }
 0x239   : > { %v1639_v40 = vadd.f32 %v1638_v62, %v1373_v39  ;;  %v1375_v43 = vpop.f32.mrb[29].mxu1  ;;  %v5812_v44 = vpop.f32.mrb[38].mxu0 }
 0x23a   : > { %v5814_v47 = vpop.f32.mrb[39].mxu0 }
 0x23b   : > { %4591 = vmatprep.mubr.msk.f32.mxu0 %vm1813_vm3, %v1639_v40 }
 0x23c   : > { %v1378_v48 = vpop.f32.mrb[30].mxu1 }
 0x23d   : > { %v1644_v52 = vadd.f32 %v4525_v61, %v1378_v48  ;;  %v1380_v53 = vpop.f32.mrb[31].mxu1  ;;  %v5817_v54 = vpop.f32.mrb[40].mxu0 }
 0x23e   : > { %v5819_v55 = vpop.f32.mrb[41].mxu0 }
 0x23f   : > { %4592 = vmatmul.mubr.msk.f32.gmra.mrb[56].mxu0 %vm1813_vm3, %v1644_v52 }
 0x240   : > { %v1383_v57 = vpop.f32.mrb[32].mxu1 }
 0x241   : > { %v1649_v58 = vadd.f32 %v1648_v0, %v1383_v57  ;;  %v1385_v60 = vpop.f32.mrb[33].mxu1  ;;  %v5822_v62 = vpop.f32.mrb[42].mxu0 }
 0x242   : > { %v5824_v6 = vpop.f32.mrb[43].mxu0 }
 0x243   : > { %4594 = vmatprep.mubr.msk.f32.mxu0 %vm1813_vm3, %v1649_v58 }
 0x244   : > { %v1388_v7 = vpop.f32.mrb[34].mxu1 }
 0x245   : > { %v1654_v8 = vadd.f32 %v5768_v63, %v1388_v7  ;;  %v1390_v61 = vpop.f32.mrb[35].mxu1  ;;  %v5828_v11 = vpop.f32.mrb[44].mxu0 }
 0x246   : > { %v5830_v12 = vpop.f32.mrb[45].mxu0 }
 0x247   : > { %4595 = vmatmul.mubr.msk.f32.gmra.mrb[58].mxu0 %vm1813_vm3, %v1654_v8 }
 0x248   : > { %v1393_v13 = vpop.f32.mrb[36].mxu1 }
 0x249   : > { %v1659_v0 = vadd.f32 %v5772_v2, %v1393_v13  ;;  %v1395_v16 = vpop.f32.mrb[37].mxu1  ;;  %v5834_v17 = vpop.f32.mrb[46].mxu0 }
 0x24a   : > { %v5836_v18 = vpop.f32.mrb[47].mxu0 }
 0x24b   : > { %4597 = vmatprep.mubr.msk.f32.mxu0 %vm1813_vm3, %v1659_v0 }
 0x24c   : > { %v1398_v21 = vpop.f32.mrb[38].mxu1 }
 0x24d   : > { %v1664_v63 = vadd.f32 %v5770_v1, %v1398_v21  ;;  %v1400_v22 = vpop.f32.mrb[39].mxu1  ;;  %v5840_v23 = vpop.f32.mrb[48].mxu0 }
 0x24e   : > { %v5842_v26 = vpop.f32.mrb[49].mxu0 }
 0x24f   : > { %4598 = vmatmul.mubr.msk.f32.gmra.mrb[60].mxu0 %vm1813_vm3, %v1664_v63 }
 0x250   : > { %v1403_v27 = vpop.f32.mrb[40].mxu1 }
 0x251   : > { %v1669_v2 = vadd.f32 %v5776_v4, %v1403_v27  ;;  %v1405_v28 = vpop.f32.mrb[41].mxu1 }
 0x253   : > { %4600 = vmatprep.mubr.msk.f32.mxu0 %vm1813_vm3, %v1669_v2 }
 0x254   : > { %v1408_v31 = vpop.f32.mrb[42].mxu1 }
 0x255   : > { %v1674_v32 = vadd.f32 %v5774_v3, %v1408_v31  ;;  %v1410_v33 = vpop.f32.mrb[43].mxu1 }
 0x257   : > { %4601 = vmatmul.mubr.msk.f32.gmra.mrb[62].mxu0 %vm1813_vm3, %v1674_v32 }
 0x258   : > { %v1413_v1 = vpop.f32.mrb[44].mxu1 }
 0x259   : > { %v1679_v39 = vadd.f32 %v5780_v5, %v1413_v1  ;;  %v1415_v40 = vpop.f32.mrb[45].mxu1 }
 0x25b   : > { %4603 = vmatprep.mubr.msk.f32.mxu0 %vm1813_vm3, %v1679_v39 }
 0x25c   : > { %v1418_v43 = vpop.f32.mrb[46].mxu1 }
 0x25d   : > { %v1684_v48 = vadd.f32 %v5778_v36, %v1418_v43  ;;  %v1420_v52 = vpop.f32.mrb[47].mxu1 }
 0x25f   : > { %4604 = vmatmul.mubr.msk.f32.gmra.mrb[64].mxu0 %vm1813_vm3, %v1684_v48 }
 0x260   : > { %v1423_v4 = vpop.f32.mrb[48].mxu1 }
 0x261   : > { %v1689_v53 = vadd.f32 %v5784_v10, %v1423_v4  ;;  %v1425_v57 = vpop.f32.mrb[49].mxu1 }
 0x263   : > { %4606 = vmatprep.mubr.msk.f32.mxu0 %vm1813_vm3, %v1689_v53 }
 0x264   : > { %v1428_v3 = vpop.f32.mrb[50].mxu1 }
 0x265   : > { %v1694_v58 = vadd.f32 %v5782_v9, %v1428_v3  ;;  %v1430_v60 = vpop.f32.mrb[51].mxu1 }
 0x267   : > { %4607 = vmatmul.mubr.msk.f32.gmra.mrb[66].mxu0 %vm1813_vm3, %v1694_v58 }
 0x268   : > { %v1433_v5 = vpop.f32.mrb[52].mxu1 }
 0x269   : > { %v1699_v7 = vadd.f32 %v5789_v15, %v1433_v5  ;;  %v1435_v8 = vpop.f32.mrb[53].mxu1 }
 0x26b   : > { %4609 = vmatprep.mubr.msk.f32.mxu0 %vm1813_vm3, %v1699_v7 }
 0x26c   : > { %v1438_v36 = vpop.f32.mrb[54].mxu1 }
 0x26d   : > { %v1704_v61 = vadd.f32 %v5787_v14, %v1438_v36  ;;  %v1440_v13 = vpop.f32.mrb[55].mxu1 }
 0x26f   : > { %4610 = vmatmul.mubr.msk.f32.gmra.mrb[68].mxu0 %vm1813_vm3, %v1704_v61 }
 0x270   : > { %v1443_v10 = vpop.f32.mrb[56].mxu1 }
 0x271   : > { %v1709_v0 = vadd.f32 %v5794_v20, %v1443_v10  ;;  %v1445_v16 = vpop.f32.mrb[57].mxu1 }
 0x273   : > { %4612 = vmatprep.mubr.msk.f32.mxu0 %vm1813_vm3, %v1709_v0 }
 0x274   : > { %v1448_v9 = vpop.f32.mrb[58].mxu1 }
 0x275   : > { %v1714_v21 = vadd.f32 %v5792_v19, %v1448_v9  ;;  %v1450_v63 = vpop.f32.mrb[59].mxu1 }
 0x277   : > { %4613 = vmatmul.mubr.msk.f32.gmra.mrb[70].mxu0 %vm1813_vm3, %v1714_v21 }
 0x278   : > { %v1453_v15 = vpop.f32.mrb[60].mxu1 }
 0x279   : > { %v1719_v22 = vadd.f32 %v5799_v25, %v1453_v15  ;;  %v1455_v27 = vpop.f32.mrb[61].mxu1 }
 0x27b   : > { %4615 = vmatprep.mubr.msk.f32.mxu0 %vm1813_vm3, %v1719_v22 }
 0x27c   : > { %v1458_v14 = vpop.f32.mrb[62].mxu1 }
 0x27d   : > { %v1724_v2 = vadd.f32 %v5797_v24, %v1458_v14  ;;  %v1460_v28 = vpop.f32.mrb[63].mxu1 }
 0x27f   : > { %4616 = vmatmul.mubr.msk.f32.gmra.mrb[72].mxu0 %vm1813_vm3, %v1724_v2 }
 0x280   : > { %v1463_v20 = vpop.f32.mrb[64].mxu1 }
 0x281   : > { %v1729_v31 = vadd.f32 %v5804_v30, %v1463_v20  ;;  %v1465_v32 = vpop.f32.mrb[65].mxu1 }
 0x283   : > { %4618 = vmatprep.mubr.msk.f32.mxu0 %vm1813_vm3, %v1729_v31 }
 0x284   : > { %v1468_v19 = vpop.f32.mrb[66].mxu1 }
 0x285   : > { %v1734_v33 = vadd.f32 %v5802_v29, %v1468_v19  ;;  %v1470_v1 = vpop.f32.mrb[67].mxu1 }
 0x287   : > { %4619 = vmatmul.mubr.msk.f32.gmra.mrb[74].mxu0 %vm1813_vm3, %v1734_v33 }
 0x288   : > { %v1473_v25 = vpop.f32.mrb[68].mxu1 }
 0x289   : > { %v1739_v39 = vadd.f32 %v5809_v35, %v1473_v25  ;;  %v1475_v40 = vpop.f32.mrb[69].mxu1 }
 0x28b   : > { %4621 = vmatprep.mubr.msk.f32.mxu0 %vm1813_vm3, %v1739_v39 }
 0x28c   : > { %v1478_v24 = vpop.f32.mrb[70].mxu1 }
 0x28d   : > { %v1744_v43 = vadd.f32 %v5807_v34, %v1478_v24  ;;  %v1480_v48 = vpop.f32.mrb[71].mxu1 }
 0x28f   : > { %4622 = vmatmul.mubr.msk.f32.gmra.mrb[76].mxu0 %vm1813_vm3, %v1744_v43 }
 0x290   : > { %v1483_v30 = vpop.f32.mrb[72].mxu1 }
 0x291   : > { %v1749_v52 = vadd.f32 %v5814_v47, %v1483_v30  ;;  %v1485_v4 = vpop.f32.mrb[73].mxu1 }
 0x293   : > { %4624 = vmatprep.mubr.msk.f32.mxu0 %vm1813_vm3, %v1749_v52 }
 0x294   : > { %v1488_v29 = vpop.f32.mrb[74].mxu1 }
 0x295   : > { %v1754_v53 = vadd.f32 %v5812_v44, %v1488_v29  ;;  %v1490_v57 = vpop.f32.mrb[75].mxu1 }
 0x297   : > { %4625 = vmatmul.mubr.msk.f32.gmra.mrb[78].mxu0 %vm1813_vm3, %v1754_v53 }
 0x298   : > { %v1493_v35 = vpop.f32.mrb[76].mxu1 }
 0x299   : > { %v1759_v3 = vadd.f32 %v5819_v55, %v1493_v35  ;;  %v1495_v58 = vpop.f32.mrb[77].mxu1 }
 0x29b   : > { %4627 = vmatprep.mubr.msk.f32.mxu0 %vm1813_vm3, %v1759_v3 }
 0x29c   : > { %v1498_v34 = vpop.f32.mrb[78].mxu1 }
 0x29d   : > { %v1764_v60 = vadd.f32 %v5817_v54, %v1498_v34  ;;  %v1500_v5 = vpop.f32.mrb[79].mxu1 }
 0x29f   : > { %4628 = vmatmul.mubr.msk.f32.gmra.mrb[80].mxu0 %vm1813_vm3, %v1764_v60 }
 0x2a0   : > { %v1503_v47 = vpop.f32.mrb[80].mxu1 }
 0x2a1   : > { %v1769_v7 = vadd.f32 %v5824_v6, %v1503_v47  ;;  %v1505_v8 = vpop.f32.mrb[81].mxu1 }
 0x2a3   : > { %4630 = vmatprep.mubr.msk.f32.mxu0 %vm1813_vm3, %v1769_v7 }
 0x2a4   : > { %v1508_v44 = vpop.f32.mrb[82].mxu1 }
 0x2a5   : > { %v1774_v36 = vadd.f32 %v5822_v62, %v1508_v44  ;;  %v1510_v61 = vpop.f32.mrb[83].mxu1 }
 0x2a7   : > { %4631 = vmatmul.mubr.msk.f32.gmra.mrb[82].mxu0 %vm1813_vm3, %v1774_v36 }
 0x2a8   : > { %v1513_v55 = vpop.f32.mrb[84].mxu1 }
 0x2a9   : > { %v1515_v13 = vpop.f32.mrb[85].mxu1  ;;  %v1779_v10 = vadd.f32 %v5830_v12, %v1513_v55 }
 0x2ab   : > { %4633 = vmatprep.mubr.msk.f32.mxu0 %vm1813_vm3, %v1779_v10 }
 0x2ac   : > { %v1518_v54 = vpop.f32.mrb[86].mxu1 }
 0x2ad   : > { %v1784_v0 = vadd.f32 %v5828_v11, %v1518_v54  ;;  %v1520_v16 = vpop.f32.mrb[87].mxu1 }
 0x2af   : > { %4634 = vmatmul.mubr.msk.f32.gmra.mrb[84].mxu0 %vm1813_vm3, %v1784_v0 }
 0x2b0   : > { %v1523_v6 = vpop.f32.mrb[88].mxu1 }
 0x2b1   : > { %v1525_v9 = vpop.f32.mrb[89].mxu1  ;;  %v1789_v21 = vadd.f32 %v5836_v18, %v1523_v6  ;;  %v5233_v18 = vld [vmem:[#allocation2 + $0x8] sm:$0xff] }
 0x2b3   : > { %4636 = vmatprep.mubr.msk.f32.mxu0 %vm1813_vm3, %v1789_v21 }
 0x2b4   : > { %v1528_v62 = vpop.f32.mrb[90].mxu1 }
 0x2b5   : > { %v1794_v63 = vadd.f32 %v5834_v17, %v1528_v62  ;;  %v1530_v15 = vpop.f32.mrb[91].mxu1  ;;  %v5904_v17 = vld [vmem:[%s6643_s8] ss:$0 sm:$0xff] }
 0x2b7   : > { %4637 = vmatmul.mubr.msk.f32.gmra.mrb[86].mxu0 %vm1813_vm3, %v1794_v63 }
 0x2b8   : > { %v1533_v12 = vpop.f32.mrb[92].mxu1 }
 0x2b9   : > { %v1535_v22 = vpop.f32.mrb[93].mxu1  ;;  %v1799_v27 = vadd.f32 %v5842_v26, %v1533_v12 }
 0x2bb   : > { %4639 = vmatprep.mubr.msk.f32.mxu0 %vm1813_vm3, %v1799_v27 }
 0x2bc   : > { %v1538_v11 = vpop.f32.mrb[94].mxu1 }
 0x2bd   : > { %v1804_v14 = vadd.f32 %v5840_v23, %v1538_v11  ;;  %v1540_v2 = vpop.f32.mrb[95].mxu1 }
 0x2bf   : > { %4640 = vmatmul.mubr.msk.f32.gmra.mrb[88].mxu0 %vm1813_vm3, %v1804_v14 }
 0x2c0   : > { %2708 = vmatprep.mubr.f32.mxu0 %v5233_v18 }
 0x2fa   : > { %v4584_v28 = vpop.f32.mrb[50].mxu0 }
 0x2fb   : > { %v5907_v20 = vadd.f32 %v4584_v28, %v5904_v17  ;;  %v2000_v26 = vpop.f32.mrb[51].mxu0 }
 0x2fc   : > { %v5910_v31 = vadd.f32 %v5904_v17, %v2000_v26 }
 0x2fd   : > { %v4081_v23 = vmul.f32 -1.442695, %v5907_v20 }
 0x2fe   : > { %v4080_v32 = vmul.f32 -1.442695, %v5910_v31 }
 0x2ff   : > { %4973 = vpow2.f32 %v4081_v23 }
 0x300   : > { %4975 = vpow2.f32 %v4080_v32 }
 0x302   : > { %v4587_v19 = vpop.f32.mrb[52].mxu0 }
 0x303   : > { %v5915_v33 = vadd.f32 %v4587_v19, %v5904_v17  ;;  %v2010_v1 = vpop.f32.mrb[53].mxu0 }
 0x304   : > { %v5918_v25 = vadd.f32 %v5904_v17, %v2010_v1 }
 0x305   : > { %v4083_v39 = vmul.f32 -1.442695, %v5915_v33 }
 0x306   : > { %v4082_v40 = vmul.f32 -1.442695, %v5918_v25 }
 0x307   : > { %4977 = vpow2.f32 %v4083_v39 }
 0x308   : > { %4979 = vpow2.f32 %v4082_v40 }
 0x309   : > { %v4974_v24 = vpop.eup %4973 }
 0x30a   : > { %v4976_v43 = vpop.eup %4975  ;;  %v4590_v48 = vpop.f32.mrb[54].mxu0  ;;  %v2320_v53 = vadd.f32 1.0, %v4974_v24 }
 0x30b   : > { %v2319_v30 = vadd.f32 1.0, %v4976_v43  ;;  %v5923_v52 = vadd.f32 %v4590_v48, %v5904_v17  ;;  %v2020_v4 = vpop.f32.mrb[55].mxu0 }
 0x30c   : > { %v5926_v29 = vadd.f32 %v5904_v17, %v2020_v4 }
 0x30d   : > { %4981 = vrcp.f32 %v2319_v30  ;;  %v4085_v57 = vmul.f32 -1.442695, %v5923_v52 }
 0x30e   : > { %v4084_v35 = vmul.f32 -1.442695, %v5926_v29 }
 0x30f   : > { %4983 = vpow2.f32 %v4085_v57 }
 0x310   : > { %4985 = vpow2.f32 %v4084_v35 }
 0x311   : > { %v4978_v3 = vpop.eup %4977  ;;  %4987 = vrcp.f32 %v2320_v53 }
 0x312   : > { %v4980_v58 = vpop.eup %4979  ;;  %v2322_v34 = vadd.f32 1.0, %v4978_v3  ;;  %v4593_v60 = vpop.f32.mrb[56].mxu0 }
 0x313   : > { %v2321_v5 = vadd.f32 1.0, %v4980_v58  ;;  %v5931_v47 = vadd.f32 %v4593_v60, %v5904_v17  ;;  %v2030_v7 = vpop.f32.mrb[57].mxu0 }
 0x314   : > { %4989 = vrcp.f32 %v2322_v34  ;;  %v5934_v8 = vadd.f32 %v5904_v17, %v2030_v7 }
 0x315   : > { %v4087_v44 = vmul.f32 -1.442695, %v5931_v47  ;;  %4991 = vrcp.f32 %v2321_v5 }
 0x316   : > { %v4086_v36 = vmul.f32 -1.442695, %v5934_v8 }
 0x317   : > { %v4982_v61 = vpop.eup %4981  ;;  %4993 = vpow2.f32 %v4087_v44 }
 0x318   : > { %4995 = vpow2.f32 %v4086_v36  ;;  %2479 = vrot.lane.b32.xlu0 %v4982_v61, %s5397_s25 }
 0x319   : > { %v4984_v55 = vpop.eup %4983 }
 0x31a   : > { %v4986_v13 = vpop.eup %4985  ;;  %v2324_v10 = vadd.f32 1.0, %v4984_v55  ;;  %v4596_v54 = vpop.f32.mrb[58].mxu0 }
 0x31b   : > { %v4988_v0 = vpop.eup %4987  ;;  %v2323_v16 = vadd.f32 1.0, %v4986_v13  ;;  %v5940_v6 = vadd.f32 %v4596_v54, %v5904_v17  ;;  %v2040_v9 = vpop.f32.mrb[59].mxu0 }
 0x31c   : > { %4997 = vrcp.f32 %v2324_v10  ;;  %v5943_v21 = vadd.f32 %v5904_v17, %v2040_v9  ;;  %2481 = vrot.lane.b32.xlu0 %v4988_v0, %s5397_s25 }
 0x31d   : > { %4999 = vrcp.f32 %v2323_v16  ;;  %v4089_v62 = vmul.f32 -1.442695, %v5940_v6 }
 0x31e   : > { %v4990_v63 = vpop.eup %4989  ;;  %v4088_v15 = vmul.f32 -1.442695, %v5943_v21 }
 0x31f   : > { %5001 = vpow2.f32 %v4089_v62  ;;  %2485 = vrot.lane.b32.xlu1 %v4990_v63, %s5397_s25  ;;  %v4992_v12 = vpop.eup %4991 }
 0x320   : > { %5003 = vpow2.f32 %v4088_v15 }
 0x321   : > { %v4994_v22 = vpop.eup %4993 }
 0x322   : > { %v4996_v27 = vpop.eup %4995  ;;  %v2326_v11 = vadd.f32 1.0, %v4994_v22  ;;  %v4599_v14 = vpop.f32.mrb[60].mxu0 }
 0x323   : > { %v2325_v2 = vadd.f32 1.0, %v4996_v27  ;;  %v5950_v18 = vadd.f32 %v4599_v14, %v5904_v17  ;;  %v2050_v28 = vpop.f32.mrb[61].mxu0  ;;  %2483 = vrot.lane.b32.xlu1 %v4992_v12, %s5397_s25 }
 0x324   : > { %5005 = vrcp.f32 %v2326_v11  ;;  %v5954_v26 = vadd.f32 %v5904_v17, %v2050_v28 }
 0x325   : > { %5007 = vrcp.f32 %v2325_v2  ;;  %v4091_v23 = vmul.f32 -1.442695, %v5950_v18 }
 0x326   : > { %v4998_v32 = vpop.eup %4997  ;;  %v4090_v19 = vmul.f32 -1.442695, %v5954_v26 }
 0x327   : > { %v5000_v1 = vpop.eup %4999  ;;  %5009 = vpow2.f32 %v4091_v23  ;;  %2489 = vrot.lane.b32.xlu1 %v4998_v32, %s5397_s25 }
 0x328   : > { %5011 = vpow2.f32 %v4090_v19  ;;  %2487 = vrot.lane.b32.xlu0 %v5000_v1, %s5397_s25 }
 0x329   : > { %v5002_v39 = vpop.eup %5001 }
 0x32a   : > { %v5004_v40 = vpop.eup %5003  ;;  %v2328_v24 = vadd.f32 1.0, %v5002_v39  ;;  %v4602_v43 = vpop.f32.mrb[62].mxu0 }
 0x32b   : > { %v2327_v48 = vadd.f32 1.0, %v5004_v40  ;;  %v5961_v30 = vadd.f32 %v4602_v43, %v5904_v17  ;;  %v2060_v4 = vpop.f32.mrb[63].mxu0 }
 0x32c   : > { %5013 = vrcp.f32 %v2328_v24  ;;  %v5964_v53 = vadd.f32 %v5904_v17, %v2060_v4 }
 0x32d   : > { %5015 = vrcp.f32 %v2327_v48  ;;  %v4093_v57 = vmul.f32 -1.442695, %v5961_v30 }
 0x32e   : > { %v5006_v35 = vpop.eup %5005  ;;  %v4092_v3 = vmul.f32 -1.442695, %v5964_v53 }
 0x32f   : > { %v5008_v58 = vpop.eup %5007  ;;  %5017 = vpow2.f32 %v4093_v57  ;;  %2493 = vrot.lane.b32.xlu1 %v5006_v35, %s5397_s25 }
 0x330   : > { %5019 = vpow2.f32 %v4092_v3  ;;  %2491 = vrot.lane.b32.xlu0 %v5008_v58, %s5397_s25 }
 0x331   : > { %v5010_v34 = vpop.eup %5009 }
 0x332   : > { %v5012_v60 = vpop.eup %5011  ;;  %v2330_v5 = vadd.f32 1.0, %v5010_v34  ;;  %v4605_v7 = vpop.f32.mrb[64].mxu0 }
 0x333   : > { %v2329_v44 = vadd.f32 1.0, %v5012_v60  ;;  %v5971_v36 = vadd.f32 %v4605_v7, %v5904_v17  ;;  %v2070_v61 = vpop.f32.mrb[65].mxu0 }
 0x334   : > { %5021 = vrcp.f32 %v2330_v5  ;;  %v5974_v55 = vadd.f32 %v5904_v17, %v2070_v61 }
 0x335   : > { %5023 = vrcp.f32 %v2329_v44  ;;  %v4095_v13 = vmul.f32 -1.442695, %v5971_v36 }
 0x336   : > { %v5014_v10 = vpop.eup %5013  ;;  %v4094_v54 = vmul.f32 -1.442695, %v5974_v55 }
 0x337   : > { %v5016_v0 = vpop.eup %5015  ;;  %5025 = vpow2.f32 %v4095_v13  ;;  %2497 = vrot.lane.b32.xlu1 %v5014_v10, %s5397_s25 }
 0x338   : > { %5027 = vpow2.f32 %v4094_v54  ;;  %2495 = vrot.lane.b32.xlu0 %v5016_v0, %s5397_s25 }
 0x339   : > { %v5018_v16 = vpop.eup %5017 }
 0x33a   : > { %v5020_v9 = vpop.eup %5019  ;;  %v2332_v62 = vadd.f32 1.0, %v5018_v16  ;;  %v4608_v63 = vpop.f32.mrb[66].mxu0 }
 0x33b   : > { %v2331_v15 = vadd.f32 1.0, %v5020_v9  ;;  %v5981_v12 = vadd.f32 %v4608_v63, %v5904_v17  ;;  %v2080_v22 = vpop.f32.mrb[67].mxu0 }
 0x33c   : > { %5029 = vrcp.f32 %v2332_v62  ;;  %v5984_v27 = vadd.f32 %v5904_v17, %v2080_v22 }
 0x33d   : > { %5031 = vrcp.f32 %v2331_v15  ;;  %v4097_v11 = vmul.f32 -1.442695, %v5981_v12 }
 0x33e   : > { %v5022_v14 = vpop.eup %5021  ;;  %v4096_v2 = vmul.f32 -1.442695, %v5984_v27 }
 0x33f   : > { %v5024_v28 = vpop.eup %5023  ;;  %5033 = vpow2.f32 %v4097_v11  ;;  %2501 = vrot.lane.b32.xlu1 %v5022_v14, %s5397_s25 }
 0x340   : > { %5035 = vpow2.f32 %v4096_v2  ;;  %2499 = vrot.lane.b32.xlu0 %v5024_v28, %s5397_s25 }
 0x341   : > { %v5026_v23 = vpop.eup %5025 }
 0x342   : > { %v5028_v32 = vpop.eup %5027  ;;  %v2334_v19 = vadd.f32 1.0, %v5026_v23  ;;  %v4611_v1 = vpop.f32.mrb[68].mxu0 }
 0x343   : > { %v2333_v39 = vadd.f32 1.0, %v5028_v32  ;;  %v5991_v40 = vadd.f32 %v4611_v1, %v5904_v17  ;;  %v2090_v24 = vpop.f32.mrb[69].mxu0 }
 0x344   : > { %5037 = vrcp.f32 %v2334_v19  ;;  %v5994_v43 = vadd.f32 %v5904_v17, %v2090_v24 }
 0x345   : > { %5039 = vrcp.f32 %v2333_v39  ;;  %v4099_v48 = vmul.f32 -1.442695, %v5991_v40 }
 0x346   : > { %v5030_v4 = vpop.eup %5029  ;;  %v4098_v57 = vmul.f32 -1.442695, %v5994_v43 }
 0x347   : > { %v5032_v35 = vpop.eup %5031  ;;  %5041 = vpow2.f32 %v4099_v48  ;;  %2505 = vrot.lane.b32.xlu1 %v5030_v4, %s5397_s25 }
 0x348   : > { %5043 = vpow2.f32 %v4098_v57  ;;  %2503 = vrot.lane.b32.xlu0 %v5032_v35, %s5397_s25 }
 0x349   : > { %v5034_v3 = vpop.eup %5033 }
 0x34a   : > { %v5036_v58 = vpop.eup %5035  ;;  %v2336_v34 = vadd.f32 1.0, %v5034_v3  ;;  %v4614_v60 = vpop.f32.mrb[70].mxu0 }
 0x34b   : > { %v2335_v5 = vadd.f32 1.0, %v5036_v58  ;;  %v6001_v7 = vadd.f32 %v4614_v60, %v5904_v17  ;;  %v2100_v44 = vpop.f32.mrb[71].mxu0 }
 0x34c   : > { %5045 = vrcp.f32 %v2336_v34  ;;  %v6004_v61 = vadd.f32 %v5904_v17, %v2100_v44 }
 0x34d   : > { %5047 = vrcp.f32 %v2335_v5  ;;  %v4101_v13 = vmul.f32 -1.442695, %v6001_v7 }
 0x34e   : > { %v5038_v10 = vpop.eup %5037  ;;  %v4100_v54 = vmul.f32 -1.442695, %v6004_v61 }
 0x34f   : > { %v5040_v0 = vpop.eup %5039  ;;  %5049 = vpow2.f32 %v4101_v13  ;;  %2509 = vrot.lane.b32.xlu1 %v5038_v10, %s5397_s25 }
 0x350   : > { %5051 = vpow2.f32 %v4100_v54  ;;  %2507 = vrot.lane.b32.xlu0 %v5040_v0, %s5397_s25 }
 0x351   : > { %v5042_v16 = vpop.eup %5041 }
 0x352   : > { %v5044_v9 = vpop.eup %5043  ;;  %v2338_v62 = vadd.f32 1.0, %v5042_v16  ;;  %v4617_v63 = vpop.f32.mrb[72].mxu0 }
 0x353   : > { %v2337_v15 = vadd.f32 1.0, %v5044_v9  ;;  %v6011_v22 = vadd.f32 %v4617_v63, %v5904_v17  ;;  %v2110_v11 = vpop.f32.mrb[73].mxu0 }
 0x354   : > { %5053 = vrcp.f32 %v2338_v62  ;;  %v6014_v14 = vadd.f32 %v5904_v17, %v2110_v11 }
 0x355   : > { %5055 = vrcp.f32 %v2337_v15  ;;  %v4103_v2 = vmul.f32 -1.442695, %v6011_v22 }
 0x356   : > { %v5046_v28 = vpop.eup %5045  ;;  %v4102_v23 = vmul.f32 -1.442695, %v6014_v14 }
 0x357   : > { %v5048_v32 = vpop.eup %5047  ;;  %5057 = vpow2.f32 %v4103_v2  ;;  %2513 = vrot.lane.b32.xlu1 %v5046_v28, %s5397_s25 }
 0x358   : > { %5059 = vpow2.f32 %v4102_v23  ;;  %2511 = vrot.lane.b32.xlu0 %v5048_v32, %s5397_s25 }
 0x359   : > { %v5050_v19 = vpop.eup %5049 }
 0x35a   : > { %v5052_v1 = vpop.eup %5051  ;;  %v2340_v39 = vadd.f32 1.0, %v5050_v19  ;;  %v4620_v24 = vpop.f32.mrb[74].mxu0 }
 0x35b   : > { %v2339_v48 = vadd.f32 1.0, %v5052_v1  ;;  %v6021_v4 = vadd.f32 %v4620_v24, %v5904_v17  ;;  %v2120_v57 = vpop.f32.mrb[75].mxu0 }
 0x35c   : > { %5061 = vrcp.f32 %v2340_v39  ;;  %v6024_v35 = vadd.f32 %v5904_v17, %v2120_v57 }
 0x35d   : > { %5063 = vrcp.f32 %v2339_v48  ;;  %v4105_v3 = vmul.f32 -1.442695, %v6021_v4 }
 0x35e   : > { %v5054_v58 = vpop.eup %5053  ;;  %v4104_v34 = vmul.f32 -1.442695, %v6024_v35 }
 0x35f   : > { %v5056_v60 = vpop.eup %5055  ;;  %5065 = vpow2.f32 %v4105_v3  ;;  %2517 = vrot.lane.b32.xlu1 %v5054_v58, %s5397_s25 }
 0x360   : > { %5067 = vpow2.f32 %v4104_v34  ;;  %2515 = vrot.lane.b32.xlu0 %v5056_v60, %s5397_s25 }
 0x361   : > { %v5058_v5 = vpop.eup %5057 }
 0x362   : > { %v5060_v44 = vpop.eup %5059  ;;  %v2342_v13 = vadd.f32 1.0, %v5058_v5  ;;  %v4623_v10 = vpop.f32.mrb[76].mxu0 }
 0x363   : > { %v2341_v54 = vadd.f32 1.0, %v5060_v44  ;;  %v6031_v0 = vadd.f32 %v4623_v10, %v5904_v17  ;;  %v2130_v16 = vpop.f32.mrb[77].mxu0 }
 0x364   : > { %5069 = vrcp.f32 %v2342_v13  ;;  %v6034_v9 = vadd.f32 %v5904_v17, %v2130_v16 }
 0x365   : > { %5071 = vrcp.f32 %v2341_v54  ;;  %v4107_v62 = vmul.f32 -1.442695, %v6031_v0 }
 0x366   : > { %v5062_v63 = vpop.eup %5061  ;;  %v4106_v15 = vmul.f32 -1.442695, %v6034_v9 }
 0x367   : > { %v5064_v11 = vpop.eup %5063  ;;  %5073 = vpow2.f32 %v4107_v62  ;;  %2521 = vrot.lane.b32.xlu1 %v5062_v63, %s5397_s25 }
 0x368   : > { %5075 = vpow2.f32 %v4106_v15  ;;  %2519 = vrot.lane.b32.xlu0 %v5064_v11, %s5397_s25 }
 0x369   : > { %v5066_v2 = vpop.eup %5065 }
 0x36a   : > { %v5068_v28 = vpop.eup %5067  ;;  %v2344_v23 = vadd.f32 1.0, %v5066_v2  ;;  %v4626_v32 = vpop.f32.mrb[78].mxu0 }
 0x36b   : > { %v2343_v19 = vadd.f32 1.0, %v5068_v28  ;;  %v6041_v1 = vadd.f32 %v4626_v32, %v5904_v17  ;;  %v2140_v39 = vpop.f32.mrb[79].mxu0 }
 0x36c   : > { %5077 = vrcp.f32 %v2344_v23  ;;  %v6044_v24 = vadd.f32 %v5904_v17, %v2140_v39 }
 0x36d   : > { %5079 = vrcp.f32 %v2343_v19  ;;  %v4109_v48 = vmul.f32 -1.442695, %v6041_v1 }
 0x36e   : > { %v5070_v57 = vpop.eup %5069  ;;  %v4108_v3 = vmul.f32 -1.442695, %v6044_v24 }
 0x36f   : > { %v5072_v58 = vpop.eup %5071  ;;  %5081 = vpow2.f32 %v4109_v48  ;;  %2525 = vrot.lane.b32.xlu1 %v5070_v57, %s5397_s25 }
 0x370   : > { %5083 = vpow2.f32 %v4108_v3  ;;  %2523 = vrot.lane.b32.xlu0 %v5072_v58, %s5397_s25 }
 0x371   : > { %v5074_v34 = vpop.eup %5073 }
 0x372   : > { %v5076_v60 = vpop.eup %5075  ;;  %v2346_v5 = vadd.f32 1.0, %v5074_v34  ;;  %v4629_v44 = vpop.f32.mrb[80].mxu0 }
 0x373   : > { %v2345_v13 = vadd.f32 1.0, %v5076_v60  ;;  %v6051_v10 = vadd.f32 %v4629_v44, %v5904_v17  ;;  %v2150_v54 = vpop.f32.mrb[81].mxu0 }
 0x374   : > { %5085 = vrcp.f32 %v2346_v5  ;;  %v6054_v16 = vadd.f32 %v5904_v17, %v2150_v54 }
 0x375   : > { %5087 = vrcp.f32 %v2345_v13  ;;  %v4111_v62 = vmul.f32 -1.442695, %v6051_v10 }
 0x376   : > { %v5078_v63 = vpop.eup %5077  ;;  %v4110_v15 = vmul.f32 -1.442695, %v6054_v16 }
 0x377   : > { %v5080_v11 = vpop.eup %5079  ;;  %5089 = vpow2.f32 %v4111_v62  ;;  %2529 = vrot.lane.b32.xlu1 %v5078_v63, %s5397_s25 }
 0x378   : > { %5091 = vpow2.f32 %v4110_v15  ;;  %2527 = vrot.lane.b32.xlu0 %v5080_v11, %s5397_s25 }
 0x379   : > { %v5082_v2 = vpop.eup %5081 }
 0x37a   : > { %v5084_v28 = vpop.eup %5083  ;;  %v2348_v23 = vadd.f32 1.0, %v5082_v2  ;;  %v4632_v32 = vpop.f32.mrb[82].mxu0 }
 0x37b   : > { %v2347_v19 = vadd.f32 1.0, %v5084_v28  ;;  %v6061_v39 = vadd.f32 %v4632_v32, %v5904_v17  ;;  %v2160_v48 = vpop.f32.mrb[83].mxu0 }
 0x37c   : > { %5093 = vrcp.f32 %v2348_v23  ;;  %v6064_v57 = vadd.f32 %v5904_v17, %v2160_v48 }
 0x37d   : > { %5095 = vrcp.f32 %v2347_v19  ;;  %v4113_v3 = vmul.f32 -1.442695, %v6061_v39 }
 0x37e   : > { %v5086_v58 = vpop.eup %5085  ;;  %v4112_v34 = vmul.f32 -1.442695, %v6064_v57 }
 0x37f   : > { %v5088_v60 = vpop.eup %5087  ;;  %5097 = vpow2.f32 %v4113_v3  ;;  %2533 = vrot.lane.b32.xlu1 %v5086_v58, %s5397_s25 }
 0x380   : > { %5099 = vpow2.f32 %v4112_v34  ;;  %2531 = vrot.lane.b32.xlu0 %v5088_v60, %s5397_s25 }
 0x381   : > { %v5090_v5 = vpop.eup %5089 }
 0x382   : > { %v5092_v44 = vpop.eup %5091  ;;  %v2350_v13 = vadd.f32 1.0, %v5090_v5  ;;  %v4635_v54 = vpop.f32.mrb[84].mxu0 }
 0x383   : > { %v2349_v62 = vadd.f32 1.0, %v5092_v44  ;;  %v6071_v63 = vadd.f32 %v4635_v54, %v5904_v17  ;;  %v2170_v15 = vpop.f32.mrb[85].mxu0 }
 0x384   : > { %5101 = vrcp.f32 %v2350_v13  ;;  %v6074_v11 = vadd.f32 %v5904_v17, %v2170_v15 }
 0x385   : > { %5103 = vrcp.f32 %v2349_v62  ;;  %v4115_v2 = vmul.f32 -1.442695, %v6071_v63 }
 0x386   : > { %v5094_v28 = vpop.eup %5093  ;;  %v4114_v23 = vmul.f32 -1.442695, %v6074_v11 }
 0x387   : > { %v5096_v32 = vpop.eup %5095  ;;  %5105 = vpow2.f32 %v4115_v2  ;;  %2537 = vrot.lane.b32.xlu1 %v5094_v28, %s5397_s25 }
 0x388   : > { %5107 = vpow2.f32 %v4114_v23  ;;  %2535 = vrot.lane.b32.xlu0 %v5096_v32, %s5397_s25 }
 0x389   : > { %v5098_v19 = vpop.eup %5097 }
 0x38a   : > { %v5100_v48 = vpop.eup %5099  ;;  %v2352_v3 = vadd.f32 1.0, %v5098_v19  ;;  %v4638_v58 = vpop.f32.mrb[86].mxu0 }
 0x38b   : > { %v2480_v34 = vpop.permute.xlu0 %2479  ;;  %v2351_v60 = vadd.f32 1.0, %v5100_v48  ;;  %v6081_v5 = vadd.f32 %v4638_v58, %v5904_v17  ;;  %v2180_v44 = vpop.f32.mrb[87].mxu0 }
 0x38c   : > { %5109 = vrcp.f32 %v2352_v3  ;;  %v6084_v13 = vadd.f32 %v5904_v17, %v2180_v44  ;;  %v2599_v23 = vmul.f32 %v2480_v34, %v5910_v31  ;;  %v6673_v31 = vmov 0.0|0.0  }
 0x38d   : > { %5111 = vrcp.f32 %v2351_v60  ;;  %v4117_v54 = vmul.f32 -1.442695, %v6081_v5 }
 0x38e   : > { %v5102_v62 = vpop.eup %5101  ;;  %v4116_v15 = vmul.f32 -1.442695, %v6084_v13 }
 0x38f   : > { %v2482_v2 = vpop.permute.xlu0 %2481  ;;  %v5104_v28 = vpop.eup %5103  ;;  %5113 = vpow2.f32 %v4117_v54  ;;  %2541 = vrot.lane.b32.xlu1 %v5102_v62, %s5397_s25 }
 0x390   : > { %v2600_v32 = vmul.f32 %v2482_v2, %v5907_v20  ;;  %5115 = vpow2.f32 %v4116_v15  ;;  %2539 = vrot.lane.b32.xlu0 %v5104_v28, %s5397_s25 }
 0x391   : > { %v5106_v19 = vpop.eup %5105  ;;  %v2486_v3 = vpop.permute.xlu1 %2485 }
 0x392   : > { %v4859_v48 = vpack.c.bf16 %v2600_v32, %v2599_v23  ;;  %v5108_v58 = vpop.eup %5107  ;;  %v2354_v60 = vadd.f32 1.0, %v5106_v19  ;;  %v4641_v44 = vpop.f32.mrb[88].mxu0  ;;  %v6101_v2 = vmul.f32 %v2486_v3, %v5915_v33 }
 0x393   : > { %v2353_v49 = vadd.f32 1.0, %v5108_v58  ;;  %v6093_v59 = vadd.f32 %v4641_v44, %v5904_v17  ;;  %v2190_v54 = vpop.f32.mrb[89].mxu0 }
 0x394   : > { %4860 = vmatpush1.bf16.msra.mxu0 %v4859_v48  ;;  %5117 = vrcp.f32 %v2354_v60  ;;  %v6096_v20 = vadd.f32 %v5904_v17, %v2190_v54  ;;  %6674 = vst [vmem:[#allocation6_spill] sm:$0xff] %v6101_v2 }
 0x395   : > { %4861 = vmatprep.subr.bf16.mxu0 %v6673_v31  ;;  %5119 = vrcp.f32 %v2353_v49  ;;  %v4119_v34 = vmul.f32 -1.442695, %v6093_v59  ;;  %v2484_v62 = vpop.permute.xlu1 %2483 }
 0x396   : > { %v5110_v15 = vpop.eup %5109  ;;  %v4118_v28 = vmul.f32 -1.442695, %v6096_v20  ;;  %v6105_v23 = vmul.f32 %v2484_v62, %v5918_v25 }
 0x397   : > { %v5112_v32 = vpop.eup %5111  ;;  %5121 = vpow2.f32 %v4119_v34  ;;  %2545 = vrot.lane.b32.xlu1 %v5110_v15, %s5397_s25 }
 0x398   : > { %6675 = vst [vmem:[#allocation7_spill] sm:$0xff] %v6105_v23  ;;  %5123 = vpow2.f32 %v4118_v28  ;;  %v4862_v49 = vpack.c.bf16 %v6101_v2, %v6105_v23  ;;  %2543 = vrot.lane.b32.xlu0 %v5112_v32, %s5397_s25 }
 0x399   : > { %v5114_v17 = vpop.eup %5113  ;;  %v2490_v19 = vpop.permute.xlu1 %2489 }
 0x39a   : > { %v5116_v48 = vpop.eup %5115  ;;  %v2356_v33 = vadd.f32 1.0, %v5114_v17  ;;  %v2604_v3 = vmul.f32 %v2490_v19, %v5923_v52  ;;  %4863 = vmatpush1.bf16.msra.mxu0 %v4862_v49  ;;  %v2488_v58 = vpop.permute.xlu0 %2487  ;;  %v5234_v19 = vld [vmem:[%s6639_s4] ss:$0 sm:$0xff] }
 0x39b   : > { %v2355_v25 = vadd.f32 1.0, %v5116_v48  ;;  %v2603_v60 = vmul.f32 %v2488_v58, %v5926_v29  ;;  %4864 = vmatprep.subr.bf16.mxu0 %v6673_v31  ;;  %v6123_v48 = vadd.f32 %v5234_v19, %v5736_v37  ;;  %v6137_v37 = vadd.f32 %v5234_v19, %v5742_v42 }
 0x39c   : > { %5125 = vrcp.f32 %v2356_v33  ;;  %v6126_v33 = vadd.f32 %v5234_v19, %v5738_v38 }
 0x39d   : > { %5127 = vrcp.f32 %v2355_v25  ;;  %v4865_v44 = vpack.c.bf16 %v2604_v3, %v2603_v60  ;;  %6676 = vst [vmem:[#allocation8_spill] sm:$0xff] %v6137_v37 }
 0x39e   : > { %v5118_v54 = vpop.eup %5117 }
 0x39f   : > { %v5120_v34 = vpop.eup %5119  ;;  %2549 = vrot.lane.b32.xlu1 %v5118_v54, %s5397_s25  ;;  %4866 = vmatpush1.bf16.msra.mxu0 %v4865_v44  ;;  %v6147_v54 = vadd.f32 %v5234_v19, %v5746_v46 }
 0x3a0   : > { %2547 = vrot.lane.b32.xlu0 %v5120_v34, %s5397_s25  ;;  %4867 = vmatprep.subr.bf16.mxu0 %v6673_v31 }
 0x3a1   : > { %v5122_v52 = vpop.eup %5121  ;;  %v2494_v62 = vpop.permute.xlu1 %2493  ;;  %6678 = vst [vmem:[#allocation10_spill] sm:$0xff] %v6147_v54 }
 0x3a2   : > { %v5124_v15 = vpop.eup %5123  ;;  %v2358_v28 = vadd.f32 1.0, %v5122_v52  ;;  %v2606_v29 = vmul.f32 %v2494_v62, %v5931_v47  ;;  %v2492_v32 = vpop.permute.xlu0 %2491  ;;  %v6131_v47 = vadd.f32 %v5234_v19, %v5740_v41  ;;  %v6143_v41 = vadd.f32 %v5234_v19, %v5744_v45 }
 0x3a3   : > { %v2357_v49 = vadd.f32 1.0, %v5124_v15  ;;  %v2605_v17 = vmul.f32 %v2492_v32, %v5934_v8  ;;  %v6158_v45 = vadd.f32 %v5234_v19, %v5750_v51 }
 0x3a4   : > { %5129 = vrcp.f32 %v2358_v28  ;;  %6677 = vst [vmem:[#allocation9_spill] sm:$0xff] %v6143_v41 }
 0x3a5   : > { %5131 = vrcp.f32 %v2357_v49  ;;  %v4868_v3 = vpack.c.bf16 %v2606_v29, %v2605_v17  ;;  %6680 = vst [vmem:[#allocation12_spill] sm:$0xff] %v6158_v45 }
 0x3a6   : > { %v5126_v58 = vpop.eup %5125  ;;  %5133 = vtanh.f32 %v6123_v48 }
 0x3a7   : > { %v5128_v25 = vpop.eup %5127  ;;  %2553 = vrot.lane.b32.xlu1 %v5126_v58, %s5397_s25  ;;  %4869 = vmatpush1.bf16.msra.mxu0 %v4868_v3  ;;  %5135 = vtanh.f32 %v6126_v33 }
 0x3a8   : > { %2551 = vrot.lane.b32.xlu0 %v5128_v25, %s5397_s25  ;;  %4870 = vmatprep.subr.bf16.mxu0 %v6673_v31  ;;  %5137 = vtanh.f32 %v6131_v47 }
 0x3a9   : > { %v2498_v38 = vpop.permute.xlu1 %2497  ;;  %5139 = vtanh.f32 %v6137_v37 }
 0x3aa   : > { %v2608_v8 = vmul.f32 %v2498_v38, %v5940_v6  ;;  %v2496_v60 = vpop.permute.xlu0 %2495  ;;  %5141 = vtanh.f32 %v6143_v41  ;;  %v6152_v6 = vadd.f32 %v5234_v19, %v5748_v50 }
 0x3ab   : > { %v2607_v44 = vmul.f32 %v2496_v60, %v5943_v21  ;;  %5143 = vtanh.f32 %v6147_v54 }
 0x3ac   : > { %6679 = vst [vmem:[#allocation11_spill] sm:$0xff] %v6152_v6  ;;  %5145 = vtanh.f32 %v6152_v6 }
 0x3ad   : > { %v4871_v34 = vpack.c.bf16 %v2608_v8, %v2607_v44  ;;  %5147 = vtanh.f32 %v6158_v45 }
 0x3ae   : > { %v5130_v52 = vpop.eup %5129 }
 0x3af   : > { %v5132_v42 = vpop.eup %5131  ;;  %2557 = vrot.lane.b32.xlu1 %v5130_v52, %s5397_s25  ;;  %4872 = vmatpush1.bf16.msra.mxu0 %v4871_v34 }
 0x3b0   : > { %2555 = vrot.lane.b32.xlu0 %v5132_v42, %s5397_s25  ;;  %4873 = vmatprep.subr.bf16.mxu0 %v6673_v31  ;;  %v5134_v21 = vpop.eup %5133 }
 0x3b1   : > { %v2502_v46 = vpop.permute.xlu1 %2501  ;;  %v5136_v28 = vpop.eup %5135 }
 0x3b2   : > { %v6161_v62 = vmul.f32 %v2502_v46, %v5950_v18  ;;  %v2500_v15 = vpop.permute.xlu0 %2499  ;;  %v5138_v51 = vpop.eup %5137 }
 0x3b3   : > { %v6164_v29 = vmul.f32 %v2500_v15, %v5954_v26  ;;  %837 = vrot.lane.b32.xlu1 %v5134_v21, %s5397_s25  ;;  %v5140_v32 = vpop.eup %5139 }
 0x3b4   : > { %6681 = vst [vmem:[#allocation13_spill] sm:$0xff] %v6161_v62  ;;  %835 = vrot.lane.b32.xlu0 %v5136_v28, %s5397_s25  ;;  %v5142_v26 = vpop.eup %5141 }
 0x3b5   : > { %6682 = vst [vmem:[#allocation14_spill] sm:$0xff] %v6164_v29  ;;  %v4874_v50 = vpack.c.bf16 %v6161_v62, %v6164_v29  ;;  %v5144_v19 = vpop.eup %5143 }
 0x3b6   : > { %v5146_v25 = vpop.eup %5145 }
 0x3b7   : > { %841 = vrot.lane.b32.xlu1 %v5138_v51, %s5397_s25  ;;  %4875 = vmatpush1.bf16.msra.mxu0 %v4874_v50  ;;  %v5148_v38 = vpop.eup %5147 }
 0x3b8   : > { %839 = vrot.lane.b32.xlu0 %v5140_v32, %s5397_s25  ;;  %4876 = vmatprep.subr.bf16.mxu0 %v6673_v31 }
 0x3b9   : > { %v2506_v18 = vpop.permute.xlu1 %2505 }
 0x3ba   : > { %v2612_v49 = vmul.f32 %v2506_v18, %v5961_v30  ;;  %v2504_v17 = vpop.permute.xlu0 %2503 }
 0x3bb   : > { %v2611_v3 = vmul.f32 %v2504_v17, %v5964_v53  ;;  %845 = vrot.lane.b32.xlu1 %v5142_v26, %s5397_s25 }
 0x3bc   : > { %843 = vrot.lane.b32.xlu0 %v5144_v19, %s5397_s25 }
 0x3bd   : > { %v4877_v58 = vpack.c.bf16 %v2612_v49, %v2611_v3 }
 0x3bf   : > { %849 = vrot.lane.b32.xlu1 %v5146_v25, %s5397_s25  ;;  %4878 = vmatpush1.bf16.msra.mxu0 %v4877_v58 }
 0x3c0   : > { %847 = vrot.lane.b32.xlu0 %v5148_v38, %s5397_s25  ;;  %4879 = vmatprep.subr.bf16.mxu0 %v6673_v31 }
 0x3c1   : > { %v2510_v8 = vpop.permute.xlu1 %2509 }
 0x3c2   : > { %v2614_v30 = vmul.f32 %v2510_v8, %v5971_v36  ;;  %v2508_v60 = vpop.permute.xlu0 %2507 }
 0x3c3   : > { %v2613_v53 = vmul.f32 %v2508_v60, %v5974_v55 }
 0x3c5   : > { %v4880_v44 = vpack.c.bf16 %v2614_v30, %v2613_v53 }
 0x3c7   : > { %4881 = vmatpush1.bf16.msra.mxu0 %v4880_v44 }
 0x3c8   : > { %4882 = vmatprep.subr.bf16.mxu0 %v6673_v31 }
 0x3c9   : > { %v2514_v34 = vpop.permute.xlu1 %2513 }
 0x3ca   : > { %v2616_v52 = vmul.f32 %v2514_v34, %v5981_v12  ;;  %v2512_v42 = vpop.permute.xlu0 %2511 }
 0x3cb   : > { %v2615_v46 = vmul.f32 %v2512_v42, %v5984_v27 }
 0x3cd   : > { %v4883_v21 = vpack.c.bf16 %v2616_v52, %v2615_v46 }
 0x3cf   : > { %4884 = vmatpush1.bf16.msra.mxu0 %v4883_v21  ;;  %v5235_v21 = vld [vmem:[#allocation2] sm:$0xff] }
 0x3d0   : > { %4885 = vmatprep.subr.bf16.mxu0 %v6673_v31 }
 0x3d1   : > { %v2518_v15 = vpop.permute.xlu1 %2517 }
 0x3d2   : > { %v6189_v36 = vmul.f32 %v2518_v15, %v5991_v40  ;;  %v2516_v28 = vpop.permute.xlu0 %2515  ;;  %v5236_v15 = vld [vmem:[#allocation2 + $0x20] sm:$0xff] }
 0x3d3   : > { %v6192_v55 = vmul.f32 %v2516_v28, %v5994_v43 }
 0x3d4   : > { %6683 = vst [vmem:[#allocation15_spill] sm:$0xff] %v6189_v36 }
 0x3d5   : > { %6684 = vst [vmem:[#allocation16_spill] sm:$0xff] %v6192_v55  ;;  %v4886_v50 = vpack.c.bf16 %v6189_v36, %v6192_v55 }
 0x3d7   : > { %4887 = vmatpush1.bf16.msra.mxu0 %v4886_v50 }
 0x3d8   : > { %4888 = vmatprep.subr.bf16.mxu0 %v6673_v31 }
 0x3d9   : > { %v2522_v12 = vpop.permute.xlu1 %2521 }
 0x3da   : > { %v2620_v27 = vmul.f32 %v2522_v12, %v6001_v7  ;;  %v2520_v51 = vpop.permute.xlu0 %2519 }
 0x3db   : > { %v2619_v32 = vmul.f32 %v2520_v51, %v6004_v61 }
 0x3dd   : > { %v4889_v18 = vpack.c.bf16 %v2620_v27, %v2619_v32  ;;  %v5240_v27 = vld [vmem:[#allocation2 + $0x50] sm:$0xff]  ;;  %v5241_v32 = vld [vmem:[#allocation2 + $0x48] sm:$0xff] }
 0x3df   : > { %4890 = vmatpush1.bf16.msra.mxu0 %v4889_v18 }
 0x3e0   : > { %4891 = vmatprep.subr.bf16.mxu0 %v6673_v31 }
 0x3e1   : > { %v2526_v40 = vpop.permute.xlu1 %2525 }
 0x3e2   : > { %v2622_v43 = vmul.f32 %v2526_v40, %v6011_v22  ;;  %v2524_v26 = vpop.permute.xlu0 %2523 }
 0x3e3   : > { %v2621_v49 = vmul.f32 %v2524_v26, %v6014_v14 }
 0x3e5   : > { %v4892_v17 = vpack.c.bf16 %v2622_v43, %v2621_v49  ;;  %v5243_v43 = vld [vmem:[#allocation2 + $0x60] sm:$0xff] }
 0x3e6   : > { %v5244_v49 = vld [vmem:[#allocation2 + $0x80] sm:$0xff] }
 0x3e7   : > { %4893 = vmatpush1.bf16.msra.mxu0 %v4892_v17 }
 0x3e8   : > { %4894 = vmatprep.subr.bf16.mxu0 %v6673_v31 }
 0x3e9   : > { %v2530_v19 = vpop.permute.xlu1 %2529 }
 0x3ea   : > { %v2624_v7 = vmul.f32 %v2530_v19, %v6021_v4  ;;  %v2528_v3 = vpop.permute.xlu0 %2527  ;;  %v5245_v19 = vld [vmem:[#allocation2 + $0x78] sm:$0xff] }
 0x3eb   : > { %v2623_v61 = vmul.f32 %v2528_v3, %v6024_v35  ;;  %v5246_v3 = vld [vmem:[#allocation2 + $0x98] sm:$0xff] }
 0x3ed   : > { %v4895_v58 = vpack.c.bf16 %v2624_v7, %v2623_v61 }
 0x3ef   : > { %4896 = vmatpush1.bf16.msra.mxu0 %v4895_v58 }
 0x3f0   : > { %4897 = vmatprep.subr.bf16.mxu0 %v6673_v31 }
 0x3f1   : > { %v2534_v25 = vpop.permute.xlu1 %2533 }
 0x3f2   : > { %v6207_v22 = vmul.f32 %v2534_v25, %v6031_v0  ;;  %v2532_v38 = vpop.permute.xlu0 %2531 }
 0x3f3   : > { %v6210_v14 = vmul.f32 %v2532_v38, %v6034_v9 }
 0x3f4   : > { %6685 = vst [vmem:[#allocation17_spill] sm:$0xff] %v6207_v22 }
 0x3f5   : > { %6686 = vst [vmem:[#allocation18_spill] sm:$0xff] %v6210_v14  ;;  %v4898_v8 = vpack.c.bf16 %v6207_v22, %v6210_v14 }
 0x3f7   : > { %4899 = vmatpush1.bf16.msra.mxu0 %v4898_v8  ;;  %v5249_v8 = vld [vmem:[#allocation2 + $0xa8] sm:$0xff] }
 0x3f8   : > { %4900 = vmatprep.subr.bf16.mxu0 %v6673_v31 }
 0x3f9   : > { %v2538_v4 = vpop.permute.xlu1 %2537 }
 0x3fa   : > { %v2628_v35 = vmul.f32 %v2538_v4, %v6041_v1  ;;  %v2536_v30 = vpop.permute.xlu0 %2535  ;;  %v5250_v4 = vld [vmem:[#allocation2 + $0xc8] sm:$0xff] }
 0x3fb   : > { %v2627_v60 = vmul.f32 %v2536_v30, %v6044_v24  ;;  %v5252_v30 = vld [vmem:[#allocation2 + $0xb8] sm:$0xff] }
 0x3fd   : > { %v4901_v53 = vpack.c.bf16 %v2628_v35, %v2627_v60  ;;  %v5251_v35 = vld [vmem:[#allocation2 + $0xc0] sm:$0xff]  ;;  %v5254_v60 = vld [vmem:[#allocation2 + $0xd0] sm:$0xff] }
 0x3ff   : > { %4902 = vmatpush1.bf16.msra.mxu0 %v4901_v53  ;;  %v5256_v53 = vld [vmem:[#allocation2 + $0xe8] sm:$0xff] }
 0x400   : > { %4903 = vmatprep.subr.bf16.mxu0 %v6673_v31  ;;  %v5237_v31 = vld [vmem:[#allocation2 + $0x18] sm:$0xff] }
 0x401   : > { %v2542_v0 = vpop.permute.xlu1 %2541 }
 0x402   : > { %v2630_v9 = vmul.f32 %v2542_v0, %v6051_v10  ;;  %v2540_v44 = vpop.permute.xlu0 %2539  ;;  %v5257_v0 = vld [vmem:[#allocation2 + $0xf8] sm:$0xff] }
 0x403   : > { %v2629_v34 = vmul.f32 %v2540_v44, %v6054_v16  ;;  %v5238_v16 = vld [vmem:[#allocation2 + $0x38] sm:$0xff]  ;;  %v5259_v44 = vld [vmem:[#allocation2 + $0xf0] sm:$0xff] }
 0x405   : > { %v4904_v52 = vpack.c.bf16 %v2630_v9, %v2629_v34  ;;  %v5258_v9 = vld [vmem:[#allocation2 + $0x100] sm:$0xff]  ;;  %v5260_v34 = vld [vmem:[#allocation2 + $0x110] sm:$0xff] }
 0x407   : > { %4905 = vmatpush1.bf16.msra.mxu0 %v4904_v52  ;;  %v5261_v52 = vld [vmem:[#allocation2 + $0x118] sm:$0xff] }
 0x409   : > { %v2546_v42 = vpop.permute.xlu1 %2545 }
 0x40a   : > { %v2632_v46 = vmul.f32 %v2546_v42, %v6061_v39  ;;  %2709 = vmatmul.mubr.f32.vlgmr.msra.gmra.mrb[90].mxu0 %v5235_v21  ;;  %v2544_v1 = vpop.permute.xlu0 %2543  ;;  %v5239_v39 = vld [vmem:[#allocation2 + $0x30] sm:$0xff]  ;;  %v5264_v21 = vld [vmem:[#allocation2 + $0x128] sm:$0xff] }
 0x40b   : > { %v2631_v24 = vmul.f32 %v2544_v1, %v6064_v57  ;;  %2713 = vmatprep.mubr.f32.mxu0 %v5236_v15  ;;  %v5262_v42 = vld [vmem:[#allocation2 + $0x130] sm:$0xff]  ;;  %v5265_v1 = vld [vmem:[#allocation2 + $0x148] sm:$0xff]  ;;  %v5267_v15 = vld [vmem:[#allocation2 + $0x120] sm:$0xff] }
 0x40d   : > { %v4906_v28 = vpack.c.bf16 %v2632_v46, %v2631_v24  ;;  %v5263_v46 = vld [vmem:[#allocation2 + $0x108] sm:$0xff]  ;;  %v5266_v24 = vld [vmem:[#allocation2 + $0x160] sm:$0xff] }
 0x40e   : > { %2714 = vmatmul.mubr.f32.gmra.mrb[92].mxu0 %v5237_v31  ;;  %v5269_v31 = vld [vmem:[#allocation2 + $0x178] sm:$0xff] }
 0x40f   : > { %4907 = vmatprep.subr.bf16.mxu0 %v4906_v28  ;;  %4930 = vmatprep.subr.bf16.mxu1 %v4906_v28 }
 0x410   : > { %4909 = vmatpush3.bf16.msra.mxu0 %v4906_v28  ;;  %4934 = vmatpush3.bf16.msra.mxu1 %v4906_v28  ;;  %v5268_v28 = vld [vmem:[#allocation2 + $0x140] sm:$0xff] }
 0x411   : > { %v2550_v10 = vpop.permute.xlu1 %2549  ;;  %2718 = vmatprep.mubr.f32.mxu0 %v5238_v16  ;;  %v5271_v16 = vld [vmem:[#allocation2 + $0x138] sm:$0xff] }
 0x412   : > { %v6223_v50 = vmul.f32 %v2550_v10, %v6071_v63  ;;  %2719 = vmatmul.mubr.f32.gmra.mrb[94].mxu0 %v5239_v39  ;;  %v2548_v12 = vpop.permute.xlu0 %2547  ;;  %v5242_v63 = vld [vmem:[#allocation2 + $0x68] sm:$0xff]  ;;  %v5270_v10 = vld [vmem:[#allocation2 + $0x190] sm:$0xff]  ;;  %v5272_v39 = vld [vmem:[#allocation2 + $0x158] sm:$0xff] }
 0x413   : > { %v6226_v57 = vmul.f32 %v2548_v12, %v6074_v11  ;;  %2723 = vmatprep.mubr.f32.mxu0 %v5240_v27  ;;  %v5273_v12 = vld [vmem:[#allocation2 + $0x1a8] sm:$0xff]  ;;  %v5274_v27 = vld [vmem:[#allocation2 + $0x1c0] sm:$0xff] }
 0x414   : > { %6687 = vst [vmem:[#allocation19_spill] sm:$0xff] %v6223_v50 }
 0x415   : > { %6688 = vst [vmem:[#allocation20_spill] sm:$0xff] %v6226_v57  ;;  %v4910_v51 = vpack.c.bf16 %v6223_v50, %v6226_v57 }
 0x416   : > { %2724 = vmatmul.mubr.f32.gmra.mrb[96].mxu0 %v5241_v32  ;;  %v5276_v32 = vld [vmem:[#allocation2 + $0x170] sm:$0xff] }
 0x417   : > { %4911 = vmatprep.subr.bf16.mxu0 %v4910_v51  ;;  %4931 = vmatprep.subr.bf16.mxu1 %v4910_v51 }
 0x418   : > { %4913 = vmatpush3.bf16.msra.mxu0 %v4910_v51  ;;  %4935 = vmatpush3.bf16.msra.mxu1 %v4910_v51  ;;  %v5275_v51 = vld [vmem:[#allocation2 + $0x150] sm:$0xff] }
 0x419   : > { %v2554_v18 = vpop.permute.xlu1 %2553  ;;  %2728 = vmatprep.mubr.f32.mxu0 %v5242_v63  ;;  %v5278_v63 = vld [vmem:[#allocation2 + $0x1f0] sm:$0xff] }
 0x41a   : > { %v2636_v40 = vmul.f32 %v2554_v18, %v6081_v5  ;;  %2729 = vmatmul.mubr.f32.gmra.mrb[98].mxu0 %v5243_v43  ;;  %v2552_v11 = vpop.permute.xlu0 %2551  ;;  %v5247_v5 = vld [vmem:[#allocation2 + $0x90] sm:$0xff]  ;;  %v5277_v18 = vld [vmem:[#allocation2 + $0x1d8] sm:$0xff]  ;;  %v5280_v43 = vld [vmem:[#allocation2 + $0x188] sm:$0xff] }
 0x41b   : > { %v2635_v26 = vmul.f32 %v2552_v11, %v6084_v13  ;;  %2733 = vmatprep.mubr.f32.mxu0 %v5244_v49  ;;  %v5248_v13 = vld [vmem:[#allocation2 + $0xb0] sm:$0xff]  ;;  %v5281_v11 = vld [vmem:[#allocation2 + $0x208] sm:$0xff]  ;;  %v5283_v49 = vld [vmem:[#allocation2 + $0x180] sm:$0xff] }
 0x41d   : > { %v4914_v17 = vpack.c.bf16 %v2636_v40, %v2635_v26  ;;  %v5279_v40 = vld [vmem:[#allocation2 + $0x168] sm:$0xff]  ;;  %v5282_v26 = vld [vmem:[#allocation2 + $0x220] sm:$0xff] }
 0x41e   : > { %2734 = vmatmul.mubr.f32.gmra.mrb[100].mxu0 %v5245_v19  ;;  %v5285_v19 = vld [vmem:[#allocation2 + $0x238] sm:$0xff] }
 0x41f   : > { %4915 = vmatprep.subr.bf16.mxu0 %v4914_v17  ;;  %4932 = vmatprep.subr.bf16.mxu1 %v4914_v17 }
 0x420   : > { %4917 = vmatpush3.bf16.msra.mxu0 %v4914_v17  ;;  %4936 = vmatpush3.bf16.msra.mxu1 %v4914_v17  ;;  %v5284_v17 = vld [vmem:[#allocation2 + $0x1a0] sm:$0xff] }
 0x421   : > { %v2558_v7 = vpop.permute.xlu1 %2557  ;;  %2738 = vmatprep.mubr.f32.mxu0 %v5246_v3  ;;  %v5287_v3 = vld [vmem:[#allocation2 + $0x198] sm:$0xff] }
 0x422   : > { %v2638_v61 = vmul.f32 %v2558_v7, %v6093_v59  ;;  %2739 = vmatmul.mubr.f32.gmra.mrb[102].mxu0 %v5247_v5  ;;  %v2556_v58 = vpop.permute.xlu0 %2555  ;;  %v5253_v59 = vld [vmem:[#allocation2 + $0xe0] sm:$0xff]  ;;  %v5286_v7 = vld [vmem:[#allocation2 + $0x250] sm:$0xff]  ;;  %v5289_v5 = vld [vmem:[#allocation2 + $0x268] sm:$0xff] }
 0x423   : > { %v2637_v25 = vmul.f32 %v2556_v58, %v6096_v20  ;;  %2743 = vmatprep.mubr.f32.mxu0 %v5248_v13  ;;  %v5255_v20 = vld [vmem:[#allocation2 + $0xd8] sm:$0xff]  ;;  %v5290_v58 = vld [vmem:[#allocation2 + $0x280] sm:$0xff]  ;;  %v5292_v13 = vld [vmem:[#allocation2 + $0x1d0] sm:$0xff] }
 0x425   : > { %v4918_v38 = vpack.c.bf16 %v2638_v61, %v2637_v25  ;;  %v5288_v61 = vld [vmem:[#allocation2 + $0x1b8] sm:$0xff]  ;;  %v5291_v25 = vld [vmem:[#allocation2 + $0x1b0] sm:$0xff] }
 0x426   : > { %2744 = vmatmul.mubr.f32.gmra.mrb[104].mxu0 %v5249_v8  ;;  %v5294_v8 = vld [vmem:[#allocation2 + $0x2b0] sm:$0xff] }
 0x427   : > { %4919 = vmatprep.subr.bf16.mxu0 %v4918_v38  ;;  %4933 = vmatprep.subr.bf16.mxu1 %v4918_v38 }
 0x428   : > { %4921 = vmatpush3.bf16.msra.mxu0 %v4918_v38  ;;  %4937 = vmatpush3.bf16.msra.mxu1 %v4918_v38  ;;  %v5293_v38 = vld [vmem:[#allocation2 + $0x298] sm:$0xff] }
 0x429   : > { %2748 = vmatprep.mubr.f32.mxu0 %v5250_v4  ;;  %v5295_v4 = vld [vmem:[#allocation2 + $0x1c8] sm:$0xff] }
 0x42a   : > { %2749 = vmatmul.mubr.f32.gmra.mrb[106].mxu0 %v5251_v35  ;;  %v5296_v35 = vld [vmem:[#allocation2 + $0x1e8] sm:$0xff] }
 0x42b   : > { %4668 = vmatmul.mubr.msk.f32.vlgmr.msra.gmra.mrb[96].mxu1 %vm1156_vm2, %v5252_v30  ;;  %2753 = vmatprep.mubr.f32.mxu0 %v5253_v59  ;;  %v5297_v30 = vld [vmem:[#allocation2 + $0x2c8] sm:$0xff]  ;;  %v5298_v59 = vld [vmem:[#allocation2 + $0x2e0] sm:$0xff] }
 0x42c   : > { %4670 = vmatprep.mubr.msk.f32.mxu1 %vm1156_vm2, %v5254_v60  ;;  %v5299_v60 = vld [vmem:[#allocation2 + $0x1e0] sm:$0xff] }
 0x42e   : > { %2754 = vmatmul.mubr.f32.gmra.mrb[108].mxu0 %v5255_v20  ;;  %v5300_v20 = vld [vmem:[#allocation2 + $0x200] sm:$0xff] }
 0x42f   : > { %4671 = vmatmul.mubr.msk.f32.gmra.mrb[98].mxu1 %vm1156_vm2, %v5256_v53  ;;  %2758 = vmatprep.mubr.f32.mxu0 %v5257_v0  ;;  %v5301_v53 = vld [vmem:[#allocation2 + $0x2f8] sm:$0xff]  ;;  %v5302_v0 = vld [vmem:[#allocation2 + $0x310] sm:$0xff] }
 0x430   : > { %4673 = vmatprep.mubr.msk.f32.mxu1 %vm1156_vm2, %v5258_v9  ;;  %v5303_v9 = vld [vmem:[#allocation2 + $0x1f8] sm:$0xff] }
 0x432   : > { %2759 = vmatmul.mubr.f32.gmra.mrb[110].mxu0 %v5259_v44  ;;  %v5304_v44 = vld [vmem:[#allocation2 + $0x218] sm:$0xff] }
 0x433   : > { %2763 = vmatprep.mubr.f32.mxu0 %v5260_v34  ;;  %4674 = vmatmul.mubr.msk.f32.gmra.mrb[100].mxu1 %vm1156_vm2, %v5261_v52  ;;  %v5305_v34 = vld [vmem:[#allocation2 + $0x328] sm:$0xff]  ;;  %v5306_v52 = vld [vmem:[#allocation2 + $0x340] sm:$0xff] }
 0x434   : > { %4676 = vmatprep.mubr.msk.f32.mxu1 %vm1156_vm2, %v5262_v42  ;;  %v5307_v42 = vld [vmem:[#allocation2 + $0x210] sm:$0xff] }
 0x436   : > { %2764 = vmatmul.mubr.f32.gmra.mrb[112].mxu0 %v5263_v46  ;;  %v5308_v46 = vld [vmem:[#allocation2 + $0x230] sm:$0xff] }
 0x437   : > { %2768 = vmatprep.mubr.f32.mxu0 %v5264_v21  ;;  %4677 = vmatmul.mubr.msk.f32.gmra.mrb[102].mxu1 %vm1156_vm2, %v5265_v1  ;;  %v5309_v21 = vld [vmem:[#allocation2 + $0x358] sm:$0xff]  ;;  %v5310_v1 = vld [vmem:[#allocation2 + $0x370] sm:$0xff] }
 0x438   : > { %4679 = vmatprep.mubr.msk.f32.mxu1 %vm1156_vm2, %v5266_v24  ;;  %v5311_v24 = vld [vmem:[#allocation2 + $0x228] sm:$0xff] }
 0x43a   : > { %2769 = vmatmul.mubr.f32.gmra.mrb[114].mxu0 %v5267_v15  ;;  %v5312_v15 = vld [vmem:[#allocation2 + $0x248] sm:$0xff] }
 0x43b   : > { %2773 = vmatprep.mubr.f32.mxu0 %v5268_v28  ;;  %4680 = vmatmul.mubr.msk.f32.gmra.mrb[104].mxu1 %vm1156_vm2, %v5269_v31  ;;  %v5313_v28 = vld [vmem:[#allocation2 + $0x388] sm:$0xff]  ;;  %v5314_v31 = vld [vmem:[#allocation2 + $0x3a0] sm:$0xff] }
 0x43c   : > { %4682 = vmatprep.mubr.msk.f32.mxu1 %vm1156_vm2, %v5270_v10  ;;  %v5315_v10 = vld [vmem:[#allocation2 + $0x240] sm:$0xff] }
 0x43e   : > { %2774 = vmatmul.mubr.f32.gmra.mrb[116].mxu0 %v5271_v16  ;;  %v5316_v16 = vld [vmem:[#allocation2 + $0x260] sm:$0xff] }
 0x43f   : > { %2778 = vmatprep.mubr.f32.mxu0 %v5272_v39  ;;  %4683 = vmatmul.mubr.msk.f32.gmra.mrb[106].mxu1 %vm1156_vm2, %v5273_v12  ;;  %v5317_v39 = vld [vmem:[#allocation2 + $0x3b8] sm:$0xff] }
 0x440   : > { %4685 = vmatprep.mubr.msk.f32.mxu1 %vm1156_vm2, %v5274_v27  ;;  %v5318_v12 = vld [vmem:[#allocation2 + $0x258] sm:$0xff] }
 0x441   : > { %v5319_v27 = vld [vmem:[#allocation2 + $0x278] sm:$0xff] }
 0x442   : > { %2779 = vmatmul.mubr.f32.gmra.mrb[118].mxu0 %v5275_v51  ;;  %v5320_v51 = vld [vmem:[#allocation2 + $0x270] sm:$0xff] }
 0x443   : > { %2783 = vmatprep.mubr.f32.mxu0 %v5276_v32  ;;  %4686 = vmatmul.mubr.msk.f32.gmra.mrb[108].mxu1 %vm1156_vm2, %v5277_v18  ;;  %v5321_v32 = vld [vmem:[#allocation2 + $0x290] sm:$0xff]  ;;  %v5322_v18 = vld [vmem:[#allocation2 + $0x288] sm:$0xff] }
 0x444   : > { %4688 = vmatprep.mubr.msk.f32.mxu1 %vm1156_vm2, %v5278_v63  ;;  %v5323_v63 = vld [vmem:[#allocation2 + $0x2a8] sm:$0xff] }
 0x446   : > { %2784 = vmatmul.mubr.f32.gmra.mrb[120].mxu0 %v5279_v40  ;;  %v5324_v40 = vld [vmem:[#allocation2 + $0x2a0] sm:$0xff] }
 0x447   : > { %2788 = vmatprep.mubr.f32.mxu0 %v5280_v43  ;;  %4689 = vmatmul.mubr.msk.f32.gmra.mrb[110].mxu1 %vm1156_vm2, %v5281_v11  ;;  %v5325_v43 = vld [vmem:[#allocation2 + $0x2c0] sm:$0xff]  ;;  %v5326_v11 = vld [vmem:[#allocation2 + $0x2b8] sm:$0xff] }
 0x448   : > { %4691 = vmatprep.mubr.msk.f32.mxu1 %vm1156_vm2, %v5282_v26  ;;  %v5327_v26 = vld [vmem:[#allocation2 + $0x2d8] sm:$0xff] }
 0x44a   : > { %2789 = vmatmul.mubr.f32.gmra.mrb[122].mxu0 %v5283_v49  ;;  %v5328_v49 = vld [vmem:[#allocation2 + $0x2d0] sm:$0xff] }
 0x44b   : > { %2793 = vmatprep.mubr.f32.mxu0 %v5284_v17  ;;  %4692 = vmatmul.mubr.msk.f32.gmra.mrb[112].mxu1 %vm1156_vm2, %v5285_v19  ;;  %v5329_v17 = vld [vmem:[#allocation2 + $0x2f0] sm:$0xff]  ;;  %v5330_v19 = vld [vmem:[#allocation2 + $0x2e8] sm:$0xff] }
 0x44c   : > { %4694 = vmatprep.mubr.msk.f32.mxu1 %vm1156_vm2, %v5286_v7  ;;  %v5331_v7 = vld [vmem:[#allocation2 + $0x308] sm:$0xff] }
 0x44e   : > { %2794 = vmatmul.mubr.f32.gmra.mrb[124].mxu0 %v5287_v3  ;;  %v5332_v3 = vld [vmem:[#allocation2 + $0x300] sm:$0xff] }
 0x44f   : > { %2798 = vmatprep.mubr.f32.mxu0 %v5288_v61  ;;  %4695 = vmatmul.mubr.msk.f32.gmra.mrb[114].mxu1 %vm1156_vm2, %v5289_v5  ;;  %v5333_v61 = vld [vmem:[#allocation2 + $0x320] sm:$0xff]  ;;  %v5334_v5 = vld [vmem:[#allocation2 + $0x318] sm:$0xff] }
 0x450   : > { %4697 = vmatprep.mubr.msk.f32.mxu1 %vm1156_vm2, %v5290_v58  ;;  %v5335_v58 = vld [vmem:[#allocation2 + $0x338] sm:$0xff] }
 0x452   : > { %2799 = vmatmul.mubr.f32.gmra.mrb[126].mxu0 %v5291_v25  ;;  %v5336_v25 = vld [vmem:[#allocation2 + $0x330] sm:$0xff] }
 0x453   : > { %2803 = vmatprep.mubr.f32.mxu0 %v5292_v13  ;;  %4698 = vmatmul.mubr.msk.f32.gmra.mrb[116].mxu1 %vm1156_vm2, %v5293_v38  ;;  %v5337_v13 = vld [vmem:[#allocation2 + $0x350] sm:$0xff]  ;;  %v5338_v38 = vld [vmem:[#allocation2 + $0x348] sm:$0xff] }
 0x454   : > { %4700 = vmatprep.mubr.msk.f32.mxu1 %vm1156_vm2, %v5294_v8  ;;  %v5339_v8 = vld [vmem:[#allocation2 + $0x368] sm:$0xff] }
 0x456   : > { %2804 = vmatmul.mubr.f32.gmra.mrb[128].mxu0 %v5295_v4  ;;  %v5340_v4 = vld [vmem:[#allocation2 + $0x360] sm:$0xff] }
 0x457   : > { %2808 = vmatprep.mubr.f32.mxu0 %v5296_v35  ;;  %4701 = vmatmul.mubr.msk.f32.gmra.mrb[118].mxu1 %vm1156_vm2, %v5297_v30  ;;  %v5341_v35 = vld [vmem:[#allocation2 + $0x380] sm:$0xff]  ;;  %v5342_v30 = vld [vmem:[#allocation2 + $0x378] sm:$0xff] }
 0x458   : > { %4703 = vmatprep.mubr.msk.f32.mxu1 %vm1156_vm2, %v5298_v59  ;;  %v5343_v59 = vld [vmem:[#allocation2 + $0x398] sm:$0xff] }
 0x45a   : > { %2809 = vmatmul.mubr.f32.gmra.mrb[130].mxu0 %v5299_v60  ;;  %v5344_v60 = vld [vmem:[#allocation2 + $0x390] sm:$0xff] }
 0x45b   : > { %2813 = vmatprep.mubr.f32.mxu0 %v5300_v20  ;;  %4704 = vmatmul.mubr.msk.f32.gmra.mrb[120].mxu1 %vm1156_vm2, %v5301_v53  ;;  %v5345_v20 = vld [vmem:[#allocation2 + $0x3b0] sm:$0xff]  ;;  %v5346_v53 = vld [vmem:[#allocation2 + $0x3a8] sm:$0xff] }
 0x45c   : > { %4706 = vmatprep.mubr.msk.f32.mxu1 %vm1156_vm2, %v5302_v0  ;;  %v5347_v0 = vld [vmem:[#allocation2 + $0x10] sm:$0xff] }
 0x45e   : > { %2814 = vmatmul.mubr.f32.gmra.mrb[132].mxu0 %v5303_v9  ;;  %v5348_v9 = vld [vmem:[#allocation2 + $0x28] sm:$0xff] }
 0x45f   : > { %2818 = vmatprep.mubr.f32.mxu0 %v5304_v44  ;;  %4707 = vmatmul.mubr.msk.f32.gmra.mrb[122].mxu1 %vm1156_vm2, %v5305_v34  ;;  %v5349_v44 = vld [vmem:[#allocation2 + $0x40] sm:$0xff]  ;;  %v5350_v34 = vld [vmem:[#allocation2 + $0x58] sm:$0xff] }
 0x460   : > { %4709 = vmatprep.mubr.msk.f32.mxu1 %vm1156_vm2, %v5306_v52  ;;  %v5351_v52 = vld [vmem:[#allocation2 + $0x70] sm:$0xff] }
 0x462   : > { %2819 = vmatmul.mubr.f32.gmra.mrb[134].mxu0 %v5307_v42  ;;  %v5352_v42 = vld [vmem:[#allocation2 + $0x88] sm:$0xff] }
 0x463   : > { %2823 = vmatprep.mubr.f32.mxu0 %v5308_v46  ;;  %4710 = vmatmul.mubr.msk.f32.gmra.mrb[124].mxu1 %vm1156_vm2, %v5309_v21  ;;  %v2639_v46 = vld [vmem:[%s6644_s9] sm:$0xff]  ;;  %v2640_v21 = vld [vmem:[%s6644_s9 + $0x8] sm:$0xff] }
 0x464   : > { %4712 = vmatprep.mubr.msk.f32.mxu1 %vm1156_vm2, %v5310_v1  ;;  %v4922_v1 = vpack.c.bf16 %v2640_v21, %v2639_v46 }
 0x466   : > { %2824 = vmatmul.mubr.f32.gmra.mrb[136].mxu0 %v5311_v24  ;;  %4923 = vmatprep.subr.bf16.mxu1 %v4922_v1 }
 0x467   : > { %2828 = vmatprep.mubr.f32.mxu0 %v5312_v15  ;;  %4713 = vmatmul.mubr.msk.f32.gmra.mrb[126].mxu1 %vm1156_vm2, %v5313_v28  ;;  %v2641_v28 = vld [vmem:[%s6644_s9 + $0x10] sm:$0xff] }
 0x468   : > { %4715 = vmatprep.mubr.msk.f32.mxu1 %vm1156_vm2, %v5314_v31  ;;  %4925 = vmatpush3.bf16.msra.mxu1 %v4922_v1  ;;  %v2642_v31 = vld [vmem:[%s6644_s9 + $0x18] sm:$0xff] }
 0x46a   : > { %2829 = vmatmul.mubr.f32.gmra.mrb[138].mxu0 %v5315_v10  ;;  %v4926_v10 = vpack.c.bf16 %v2642_v31, %v2641_v28 }
 0x46b   : > { %2833 = vmatprep.mubr.f32.mxu0 %v5316_v16  ;;  %4716 = vmatmul.mubr.msk.f32.gmra.mrb[128].mxu1 %vm1156_vm2, %v5317_v39 }
 0x46c   : > { %4927 = vmatprep.subr.bf16.mxu1 %v4926_v10 }
 0x46d   : > { %4929 = vmatpush3.bf16.msra.mxu1 %v4926_v10 }
 0x46e   : > { %2834 = vmatmul.mubr.f32.gmra.mrb[140].mxu0 %v5318_v12 }
 0x46f   : > { %2838 = vmatprep.mubr.f32.mxu0 %v5319_v27 }
 0x472   : > { %2839 = vmatmul.mubr.f32.gmra.mrb[142].mxu0 %v5320_v51 }
 0x473   : > { %2843 = vmatprep.mubr.f32.mxu0 %v5321_v32 }
 0x476   : > { %2844 = vmatmul.mubr.f32.gmra.mrb[144].mxu0 %v5322_v18 }
 0x477   : > { %2848 = vmatprep.mubr.f32.mxu0 %v5323_v63 }
 0x47a   : > { %2849 = vmatmul.mubr.f32.gmra.mrb[146].mxu0 %v5324_v40 }
 0x47b   : > { %2853 = vmatprep.mubr.f32.mxu0 %v5325_v43 }
 0x47e   : > { %2854 = vmatmul.mubr.f32.gmra.mrb[148].mxu0 %v5326_v11 }
 0x47f   : > { %2858 = vmatprep.mubr.f32.mxu0 %v5327_v26 }
 0x482   : > { %2859 = vmatmul.mubr.f32.gmra.mrb[150].mxu0 %v5328_v49 }
 0x483   : > { %2863 = vmatprep.mubr.f32.mxu0 %v5329_v17 }
 0x486   : > { %2864 = vmatmul.mubr.f32.gmra.mrb[152].mxu0 %v5330_v19 }
 0x487   : > { %2868 = vmatprep.mubr.f32.mxu0 %v5331_v7 }
 0x48a   : > { %2869 = vmatmul.mubr.f32.gmra.mrb[154].mxu0 %v5332_v3 }
 0x48b   : > { %2873 = vmatprep.mubr.f32.mxu0 %v5333_v61 }
 0x48e   : > { %2874 = vmatmul.mubr.f32.gmra.mrb[156].mxu0 %v5334_v5 }
 0x48f   : > { %2878 = vmatprep.mubr.f32.mxu0 %v5335_v58 }
 0x492   : > { %2879 = vmatmul.mubr.f32.gmra.mrb[158].mxu0 %v5336_v25 }
 0x493   : > { %2883 = vmatprep.mubr.f32.mxu0 %v5337_v13 }
 0x496   : > { %2884 = vmatmul.mubr.f32.gmra.mrb[160].mxu0 %v5338_v38 }
 0x497   : > { %2888 = vmatprep.mubr.f32.mxu0 %v5339_v8 }
 0x49a   : > { %2889 = vmatmul.mubr.f32.gmra.mrb[162].mxu0 %v5340_v4 }
 0x49b   : > { %2893 = vmatprep.mubr.f32.mxu0 %v5341_v35 }
 0x49e   : > { %2894 = vmatmul.mubr.f32.gmra.mrb[164].mxu0 %v5342_v30 }
 0x49f   : > { %2898 = vmatprep.mubr.f32.mxu0 %v5343_v59 }
 0x4a2   : > { %2899 = vmatmul.mubr.f32.gmra.mrb[166].mxu0 %v5344_v60 }
 0x4a3   : > { %2903 = vmatprep.mubr.f32.mxu0 %v5345_v20 }
 0x4a6   : > { %2904 = vmatmul.mubr.f32.gmra.mrb[168].mxu0 %v5346_v53 }
 0x4a7   : > { %4658 = vmatprep.mubr.msk.f32.mxu0 %vm1156_vm2, %v5347_v0 }
 0x4aa   : > { %4659 = vmatmul.mubr.msk.f32.vlgmr.msra.gmra.mrb[170].mxu0 %vm1156_vm2, %v5348_v9 }
 0x4ab   : > { %4661 = vmatprep.mubr.msk.f32.mxu0 %vm1156_vm2, %v5349_v44 }
 0x4ae   : > { %4662 = vmatmul.mubr.msk.f32.gmra.mrb[172].mxu0 %vm1156_vm2, %v5350_v34 }
 0x4af   : > { %4664 = vmatprep.mubr.msk.f32.mxu0 %vm1156_vm2, %v5351_v52 }
 0x4b2   : > { %4665 = vmatmul.mubr.msk.f32.gmra.mrb[174].mxu0 %vm1156_vm2, %v5352_v42 }
 0x4dd   : > { %v6279_v24 = vpop.f32.mrb[90].mxu0 }
 0x4de   : > { %v2712_v15 = vpop.f32.mrb[91].mxu0 }
 0x4e1   : > { %v6287_v16 = vpop.f32.mrb[92].mxu0 }
 0x4e2   : > { %v2717_v39 = vpop.f32.mrb[93].mxu0 }
 0x4e5   : > { %v6289_v12 = vpop.f32.mrb[94].mxu0 }
 0x4e6   : > { %v2722_v27 = vpop.f32.mrb[95].mxu0 }
 0x4e9   : > { %v6291_v51 = vpop.f32.mrb[96].mxu0 }
 0x4ea   : > { %v2727_v32 = vpop.f32.mrb[97].mxu0 }
 0x4ed   : > { %v6293_v18 = vpop.f32.mrb[98].mxu0 }
 0x4ee   : > { %v2732_v63 = vpop.f32.mrb[99].mxu0 }
 0x4f1   : > { %v6295_v40 = vpop.f32.mrb[100].mxu0 }
 0x4f2   : > { %v2737_v43 = vpop.f32.mrb[101].mxu0 }
 0x4f5   : > { %v2740_v11 = vpop.f32.mrb[102].mxu0 }
 0x4f6   : > { %v2742_v26 = vpop.f32.mrb[103].mxu0 }
 0x4f9   : > { %v2745_v49 = vpop.f32.mrb[104].mxu0 }
 0x4fa   : > { %v2747_v17 = vpop.f32.mrb[105].mxu0 }
 0x4fd   : > { %v2750_v19 = vpop.f32.mrb[106].mxu0 }
 0x4fe   : > { %v4669_v7 = vpop.f32.mrb[96].mxu1  ;;  %v2752_v3 = vpop.f32.mrb[107].mxu0 }
 0x4ff   : > { %v6297_v61 = vadd.f32 %v4669_v7, %v2745_v49  ;;  %v3005_v5 = vpop.f32.mrb[97].mxu1 }
 0x500   : > { %v6299_v58 = vadd.f32 %v3005_v5, %v2740_v11 }
 0x501   : > { %v2755_v25 = vpop.f32.mrb[108].mxu0 }
 0x502   : > { %v4672_v13 = vpop.f32.mrb[98].mxu1  ;;  %v2757_v38 = vpop.f32.mrb[109].mxu0 }
 0x503   : > { %v3015_v8 = vpop.f32.mrb[99].mxu1  ;;  %v6301_v4 = vadd.f32 %v4672_v13, %v2755_v25 }
 0x504   : > { %v6303_v35 = vadd.f32 %v3015_v8, %v2750_v19 }
 0x505   : > { %v2760_v30 = vpop.f32.mrb[110].mxu0 }
 0x506   : > { %v4675_v59 = vpop.f32.mrb[100].mxu1  ;;  %v2762_v60 = vpop.f32.mrb[111].mxu0 }
 0x507   : > { %v3025_v20 = vpop.f32.mrb[101].mxu1 }
 0x508   : > { %v6305_v53 = vadd.f32 %v3025_v20, %v2760_v30 }
 0x509   : > { %v2765_v0 = vpop.f32.mrb[112].mxu0 }
 0x50a   : > { %v6307_v9 = vadd.f32 %v4675_v59, %v2765_v0  ;;  %v2767_v44 = vpop.f32.mrb[113].mxu0  ;;  %v4678_v34 = vpop.f32.mrb[102].mxu1 }
 0x50b   : > { %v3035_v52 = vpop.f32.mrb[103].mxu1 }
 0x50d   : > { %v2770_v42 = vpop.f32.mrb[114].mxu0 }
 0x50e   : > { %v2772_v46 = vpop.f32.mrb[115].mxu0  ;;  %v6309_v21 = vadd.f32 %v3035_v52, %v2770_v42  ;;  %v4681_v1 = vpop.f32.mrb[104].mxu1 }
 0x50f   : > { %v3045_v15 = vpop.f32.mrb[105].mxu1 }
 0x511   : > { %v2775_v28 = vpop.f32.mrb[116].mxu0 }
 0x512   : > { %v6311_v31 = vadd.f32 %v4678_v34, %v2775_v28  ;;  %v2777_v10 = vpop.f32.mrb[117].mxu0  ;;  %v4684_v39 = vpop.f32.mrb[106].mxu1 }
 0x513   : > { %v3055_v27 = vpop.f32.mrb[107].mxu1 }
 0x515   : > { %v2780_v32 = vpop.f32.mrb[118].mxu0 }
 0x516   : > { %v2782_v63 = vpop.f32.mrb[119].mxu0  ;;  %v6313_v43 = vadd.f32 %v3045_v15, %v2780_v32  ;;  %v4687_v11 = vpop.f32.mrb[108].mxu1 }
 0x517   : > { %v3065_v26 = vpop.f32.mrb[109].mxu1 }
 0x519   : > { %v2785_v49 = vpop.f32.mrb[120].mxu0 }
 0x51a   : > { %v6315_v17 = vadd.f32 %v4681_v1, %v2785_v49  ;;  %v2787_v19 = vpop.f32.mrb[121].mxu0  ;;  %v4690_v7 = vpop.f32.mrb[110].mxu1 }
 0x51b   : > { %v3075_v3 = vpop.f32.mrb[111].mxu1 }
 0x51d   : > { %v2790_v5 = vpop.f32.mrb[122].mxu0 }
 0x51e   : > { %v2792_v25 = vpop.f32.mrb[123].mxu0  ;;  %v6317_v13 = vadd.f32 %v3055_v27, %v2790_v5  ;;  %v4693_v38 = vpop.f32.mrb[112].mxu1 }
 0x51f   : > { %v3085_v8 = vpop.f32.mrb[113].mxu1 }
 0x521   : > { %v2795_v30 = vpop.f32.mrb[124].mxu0 }
 0x522   : > { %v6319_v59 = vadd.f32 %v4684_v39, %v2795_v30  ;;  %v2797_v60 = vpop.f32.mrb[125].mxu0  ;;  %v4696_v20 = vpop.f32.mrb[114].mxu1 }
 0x523   : > { %v3095_v0 = vpop.f32.mrb[115].mxu1 }
 0x525   : > { %v2800_v44 = vpop.f32.mrb[126].mxu0 }
 0x526   : > { %v2802_v34 = vpop.f32.mrb[127].mxu0  ;;  %v6321_v52 = vadd.f32 %v3065_v26, %v2800_v44  ;;  %v4699_v42 = vpop.f32.mrb[116].mxu1 }
 0x527   : > { %v3105_v46 = vpop.f32.mrb[117].mxu1 }
 0x529   : > { %v2805_v1 = vpop.f32.mrb[128].mxu0 }
 0x52a   : > { %v6323_v15 = vadd.f32 %v4687_v11, %v2805_v1  ;;  %v2807_v28 = vpop.f32.mrb[129].mxu0  ;;  %v4702_v10 = vpop.f32.mrb[118].mxu1 }
 0x52b   : > { %v3115_v27 = vpop.f32.mrb[119].mxu1 }
 0x52d   : > { %v2810_v32 = vpop.f32.mrb[130].mxu0 }
 0x52e   : > { %v2812_v63 = vpop.f32.mrb[131].mxu0  ;;  %v6325_v49 = vadd.f32 %v3075_v3, %v2810_v32  ;;  %v4705_v39 = vpop.f32.mrb[120].mxu1 }
 0x52f   : > { %v3125_v19 = vpop.f32.mrb[121].mxu1 }
 0x531   : > { %v2815_v5 = vpop.f32.mrb[132].mxu0 }
 0x532   : > { %v6327_v25 = vadd.f32 %v4690_v7, %v2815_v5  ;;  %v2817_v30 = vpop.f32.mrb[133].mxu0  ;;  %v4708_v26 = vpop.f32.mrb[122].mxu1 }
 0x533   : > { %v3135_v60 = vpop.f32.mrb[123].mxu1 }
 0x535   : > { %v2820_v44 = vpop.f32.mrb[134].mxu0 }
 0x536   : > { %v2822_v34 = vpop.f32.mrb[135].mxu0  ;;  %v6329_v57 = vadd.f32 %v3085_v8, %v2820_v44  ;;  %v4711_v11 = vpop.f32.mrb[124].mxu1 }
 0x537   : > { %v3145_v1 = vpop.f32.mrb[125].mxu1 }
 0x539   : > { %v2825_v28 = vpop.f32.mrb[136].mxu0 }
 0x53a   : > { %v6331_v50 = vadd.f32 %v4693_v38, %v2825_v28  ;;  %v2827_v63 = vpop.f32.mrb[137].mxu0  ;;  %v4714_v3 = vpop.f32.mrb[126].mxu1 }
 0x53b   : > { %v3155_v32 = vpop.f32.mrb[127].mxu1 }
 0x53d   : > { %v2830_v14 = vpop.f32.mrb[138].mxu0 }
 0x53e   : > { %v2832_v22 = vpop.f32.mrb[139].mxu0  ;;  %v6333_v55 = vadd.f32 %v3095_v0, %v2830_v14  ;;  %v4717_v7 = vpop.f32.mrb[128].mxu1 }
 0x53f   : > { %v3165_v5 = vpop.f32.mrb[129].mxu1 }
 0x541   : > { %v2835_v30 = vpop.f32.mrb[140].mxu0 }
 0x542   : > { %v6335_v36 = vadd.f32 %v4696_v20, %v2835_v30  ;;  %v2837_v34 = vpop.f32.mrb[141].mxu0 }
 0x545   : > { %v2840_v8 = vpop.f32.mrb[142].mxu0 }
 0x546   : > { %v2842_v44 = vpop.f32.mrb[143].mxu0  ;;  %v6337_v29 = vadd.f32 %v3105_v46, %v2840_v8 }
 0x549   : > { %v2845_v62 = vpop.f32.mrb[144].mxu0 }
 0x54a   : > { %v6339_v38 = vadd.f32 %v4699_v42, %v2845_v62  ;;  %v2847_v28 = vpop.f32.mrb[145].mxu0 }
 0x54d   : > { %v2850_v63 = vpop.f32.mrb[146].mxu0 }
 0x54e   : > { %v2852_v23 = vpop.f32.mrb[147].mxu0  ;;  %v6341_v45 = vadd.f32 %v3115_v27, %v2850_v63 }
 0x551   : > { %v2855_v22 = vpop.f32.mrb[148].mxu0 }
 0x552   : > { %v6343_v14 = vadd.f32 %v4702_v10, %v2855_v22  ;;  %v2857_v0 = vpop.f32.mrb[149].mxu0 }
 0x555   : > { %v2860_v2 = vpop.f32.mrb[150].mxu0 }
 0x556   : > { %v2862_v20 = vpop.f32.mrb[151].mxu0  ;;  %v6345_v30 = vadd.f32 %v3125_v19, %v2860_v2 }
 0x559   : > { %v2865_v34 = vpop.f32.mrb[152].mxu0 }
 0x55a   : > { %v6347_v44 = vadd.f32 %v4705_v39, %v2865_v34  ;;  %v2867_v46 = vpop.f32.mrb[153].mxu0 }
 0x55d   : > { %v2870_v8 = vpop.f32.mrb[154].mxu0 }
 0x55e   : > { %v2872_v62 = vpop.f32.mrb[155].mxu0  ;;  %v6349_v42 = vadd.f32 %v3135_v60, %v2870_v8 }
 0x561   : > { %v2875_v28 = vpop.f32.mrb[156].mxu0 }
 0x562   : > { %v6351_v23 = vadd.f32 %v4708_v26, %v2875_v28  ;;  %v2877_v27 = vpop.f32.mrb[157].mxu0 }
 0x565   : > { %v2880_v63 = vpop.f32.mrb[158].mxu0 }
 0x566   : > { %v2882_v10 = vpop.f32.mrb[159].mxu0  ;;  %v3146_v22 = vadd.f32 %v3145_v1, %v2880_v63 }
 0x569   : > { %v2885_v0 = vpop.f32.mrb[160].mxu0 }
 0x56a   : > { %v3151_v6 = vadd.f32 %v4711_v11, %v2885_v0  ;;  %v2887_v20 = vpop.f32.mrb[161].mxu0 }
 0x56d   : > { %v2890_v2 = vpop.f32.mrb[162].mxu0 }
 0x56e   : > { %v2892_v19 = vpop.f32.mrb[163].mxu0  ;;  %v3156_v54 = vadd.f32 %v3155_v32, %v2890_v2 }
 0x571   : > { %v2895_v39 = vpop.f32.mrb[164].mxu0 }
 0x572   : > { %v3161_v34 = vadd.f32 %v4714_v3, %v2895_v39  ;;  %v2897_v46 = vpop.f32.mrb[165].mxu0 }
 0x575   : > { %v2900_v41 = vpop.f32.mrb[166].mxu0 }
 0x576   : > { %v2902_v62 = vpop.f32.mrb[167].mxu0  ;;  %v3166_v60 = vadd.f32 %v3165_v5, %v2900_v41 }
 0x579   : > { %v2905_v8 = vpop.f32.mrb[168].mxu0 }
 0x57a   : > { %v3171_v37 = vadd.f32 %v4717_v7, %v2905_v8  ;;  %v2907_v26 = vpop.f32.mrb[169].mxu0 }
 0x57d   : > { %v4660_v28 = vpop.f32.mrb[170].mxu0 }
 0x57e   : > { %v2981_v27 = vadd.f32 %v4660_v28, %v6287_v16  ;;  %v2975_v10 = vpop.f32.mrb[171].mxu0 }
 0x57f   : > { %v2976_v1 = vadd.f32 %v2975_v10, %v6279_v24 }
 0x581   : > { %v4663_v11 = vpop.f32.mrb[172].mxu0  ;;  %4726 = vmatprep.mubr.msk.f32.mxu1 %vm1813_vm3, %v2976_v1 }
 0x582   : > { %v2991_v32 = vadd.f32 %v4663_v11, %v6291_v51  ;;  %v2985_v63 = vpop.f32.mrb[173].mxu0  ;;  %4727 = vmatmul.mubr.msk.f32.vlgmr.msra.gmra.mrb[130].mxu1 %vm1813_vm3, %v2981_v27 }
 0x583   : > { %v2986_v3 = vadd.f32 %v2985_v63, %v6289_v12 }
 0x585   : > { %v4666_v41 = vpop.f32.mrb[174].mxu0  ;;  %4729 = vmatprep.mubr.msk.f32.mxu1 %vm1813_vm3, %v2986_v3 }
 0x586   : > { %v3001_v7 = vadd.f32 %v4666_v41, %v6295_v40  ;;  %v2995_v5 = vpop.f32.mrb[175].mxu0  ;;  %4730 = vmatmul.mubr.msk.f32.gmra.mrb[132].mxu1 %vm1813_vm3, %v2991_v32 }
 0x587   : > { %v2996_v24 = vadd.f32 %v2995_v5, %v6293_v18 }
 0x589   : > { %4732 = vmatprep.mubr.msk.f32.mxu1 %vm1813_vm3, %v2996_v24 }
 0x58a   : > { %4733 = vmatmul.mubr.msk.f32.gmra.mrb[134].mxu1 %vm1813_vm3, %v3001_v7 }
 0x58b   : > { %4735 = vmatprep.mubr.msk.f32.mxu1 %vm1813_vm3, %v6299_v58 }
 0x58e   : > { %4736 = vmatmul.mubr.msk.f32.gmra.mrb[136].mxu1 %vm1813_vm3, %v6297_v61 }
 0x58f   : > { %4738 = vmatprep.mubr.msk.f32.mxu1 %vm1813_vm3, %v6303_v35 }
 0x592   : > { %4739 = vmatmul.mubr.msk.f32.gmra.mrb[138].mxu1 %vm1813_vm3, %v6301_v4 }
 0x593   : > { %4741 = vmatprep.mubr.msk.f32.mxu1 %vm1813_vm3, %v6305_v53 }
 0x596   : > { %4742 = vmatmul.mubr.msk.f32.gmra.mrb[140].mxu1 %vm1813_vm3, %v6307_v9 }
 0x597   : > { %4744 = vmatprep.mubr.msk.f32.mxu1 %vm1813_vm3, %v6309_v21 }
 0x59a   : > { %4745 = vmatmul.mubr.msk.f32.gmra.mrb[142].mxu1 %vm1813_vm3, %v6311_v31 }
 0x59b   : > { %4747 = vmatprep.mubr.msk.f32.mxu1 %vm1813_vm3, %v6313_v43 }
 0x59e   : > { %4748 = vmatmul.mubr.msk.f32.gmra.mrb[144].mxu1 %vm1813_vm3, %v6315_v17 }
 0x59f   : > { %4750 = vmatprep.mubr.msk.f32.mxu1 %vm1813_vm3, %v6317_v13 }
 0x5a2   : > { %4751 = vmatmul.mubr.msk.f32.gmra.mrb[146].mxu1 %vm1813_vm3, %v6319_v59 }
 0x5a3   : > { %4753 = vmatprep.mubr.msk.f32.mxu1 %vm1813_vm3, %v6321_v52 }
 0x5a6   : > { %4754 = vmatmul.mubr.msk.f32.gmra.mrb[148].mxu1 %vm1813_vm3, %v6323_v15 }
 0x5a7   : > { %4756 = vmatprep.mubr.msk.f32.mxu1 %vm1813_vm3, %v6325_v49 }
 0x5aa   : > { %4757 = vmatmul.mubr.msk.f32.gmra.mrb[150].mxu1 %vm1813_vm3, %v6327_v25 }
 0x5ab   : > { %4759 = vmatprep.mubr.msk.f32.mxu1 %vm1813_vm3, %v6329_v57 }
 0x5ae   : > { %4760 = vmatmul.mubr.msk.f32.gmra.mrb[152].mxu1 %vm1813_vm3, %v6331_v50 }
 0x5af   : > { %4762 = vmatprep.mubr.msk.f32.mxu1 %vm1813_vm3, %v6333_v55 }
 0x5b2   : > { %4763 = vmatmul.mubr.msk.f32.gmra.mrb[154].mxu1 %vm1813_vm3, %v6335_v36  ;;  %v6430_v36 = vld [vmem:[%s6645_s10] ss:$0 sm:$0xff] }
 0x5b3   : > { %4765 = vmatprep.mubr.msk.f32.mxu1 %vm1813_vm3, %v6337_v29 }
 0x5b6   : > { %4766 = vmatmul.mubr.msk.f32.gmra.mrb[156].mxu1 %vm1813_vm3, %v6339_v38 }
 0x5b7   : > { %4768 = vmatprep.mubr.msk.f32.mxu1 %vm1813_vm3, %v6341_v45 }
 0x5ba   : > { %4769 = vmatmul.mubr.msk.f32.gmra.mrb[158].mxu1 %vm1813_vm3, %v6343_v14 }
 0x5bb   : > { %4771 = vmatprep.mubr.msk.f32.mxu1 %vm1813_vm3, %v6345_v30 }
 0x5be   : > { %4772 = vmatmul.mubr.msk.f32.gmra.mrb[160].mxu1 %vm1813_vm3, %v6347_v44 }
 0x5bf   : > { %4774 = vmatprep.mubr.msk.f32.mxu1 %vm1813_vm3, %v6349_v42 }
 0x5c2   : > { %4775 = vmatmul.mubr.msk.f32.gmra.mrb[162].mxu1 %vm1813_vm3, %v6351_v23 }
 0x5c3   : > { %4777 = vmatprep.mubr.msk.f32.mxu1 %vm1813_vm3, %v3146_v22 }
 0x5c6   : > { %4778 = vmatmul.mubr.msk.f32.gmra.mrb[164].mxu1 %vm1813_vm3, %v3151_v6 }
 0x5c7   : > { %4780 = vmatprep.mubr.msk.f32.mxu1 %vm1813_vm3, %v3156_v54 }
 0x5ca   : > { %4781 = vmatmul.mubr.msk.f32.gmra.mrb[166].mxu1 %vm1813_vm3, %v3161_v34 }
 0x5cb   : > { %4783 = vmatprep.mubr.msk.f32.mxu1 %vm1813_vm3, %v3166_v60 }
 0x5ce   : > { %4784 = vmatmul.mubr.msk.f32.gmra.mrb[168].mxu1 %vm1813_vm3, %v3171_v37 }
 0x655   : > { %v4728_v45 = vpop.f32.mrb[130].mxu1 }
 0x656   : > { %v3366_v29 = vpop.f32.mrb[131].mxu1 }
 0x659   : > { %v4731_v55 = vpop.f32.mrb[132].mxu1 }
 0x65a   : > { %v6433_v50 = vadd.f32 %v4731_v55, %v6430_v36  ;;  %v3374_v6 = vpop.f32.mrb[133].mxu1 }
 0x65b   : > { %v6436_v54 = vadd.f32 %v6430_v36, %v3374_v6 }
 0x65c   : > { %v4202_v57 = vmul.f32 -1.442695, %v6433_v50 }
 0x65d   : > { %v4201_v16 = vmul.f32 -1.442695, %v6436_v54  ;;  %v4734_v37 = vpop.f32.mrb[134].mxu1 }
 0x65e   : > { %5149 = vpow2.f32 %v4202_v57  ;;  %v3384_v12 = vpop.f32.mrb[135].mxu1 }
 0x65f   : > { %5151 = vpow2.f32 %v4201_v16 }
 0x661   : > { %v4737_v51 = vpop.f32.mrb[136].mxu1 }
 0x662   : > { %v3392_v18 = vpop.f32.mrb[137].mxu1 }
 0x665   : > { %v4740_v40 = vpop.f32.mrb[138].mxu1 }
 0x666   : > { %v3400_v61 = vpop.f32.mrb[139].mxu1 }
 0x668   : > { %v5150_v58 = vpop.eup %5149 }
 0x669   : > { %v5152_v4 = vpop.eup %5151  ;;  %v3566_v35 = vadd.f32 1.0, %v5150_v58  ;;  %v4743_v53 = vpop.f32.mrb[140].mxu1 }
 0x66a   : > { %v3565_v9 = vadd.f32 1.0, %v5152_v4  ;;  %v6441_v21 = vadd.f32 %v4743_v53, %v6430_v36  ;;  %v3408_v31 = vpop.f32.mrb[141].mxu1 }
 0x66b   : > { %5153 = vrcp.f32 %v3566_v35  ;;  %v6444_v43 = vadd.f32 %v6430_v36, %v3408_v31 }
 0x66c   : > { %5155 = vrcp.f32 %v3565_v9  ;;  %v4204_v17 = vmul.f32 -1.442695, %v6441_v21 }
 0x66d   : > { %v4203_v13 = vmul.f32 -1.442695, %v6444_v43  ;;  %v4746_v59 = vpop.f32.mrb[142].mxu1 }
 0x66e   : > { %5157 = vpow2.f32 %v4204_v17  ;;  %v3418_v52 = vpop.f32.mrb[143].mxu1 }
 0x66f   : > { %5159 = vpow2.f32 %v4203_v13 }
 0x671   : > { %v4749_v15 = vpop.f32.mrb[144].mxu1 }
 0x672   : > { %v3426_v49 = vpop.f32.mrb[145].mxu1 }
 0x675   : > { %v5154_v25 = vpop.eup %5153  ;;  %v4752_v38 = vpop.f32.mrb[146].mxu1 }
 0x676   : > { %v5156_v14 = vpop.eup %5155  ;;  %3607 = vrot.lane.b32.xlu1 %v5154_v25, %s5397_s25  ;;  %v3434_v30 = vpop.f32.mrb[147].mxu1 }
 0x677   : > { %3605 = vrot.lane.b32.xlu0 %v5156_v14, %s5397_s25 }
 0x678   : > { %v5158_v44 = vpop.eup %5157 }
 0x679   : > { %v5160_v42 = vpop.eup %5159  ;;  %v3568_v23 = vadd.f32 1.0, %v5158_v44  ;;  %v4755_v22 = vpop.f32.mrb[148].mxu1  ;;  %v6689_v44 = vld [vmem:[#allocation5_spill] sm:$0xff] }
 0x67a   : > { %v3567_v0 = vadd.f32 1.0, %v5160_v42  ;;  %v6451_v20 = vadd.f32 %v4755_v22, %v6430_v36  ;;  %v3442_v2 = vpop.f32.mrb[149].mxu1 }
 0x67b   : > { %5161 = vrcp.f32 %v3568_v23  ;;  %v6454_v19 = vadd.f32 %v6430_v36, %v3442_v2  ;;  %v3972_v2 = vmul.f32 -1.442695, %v6123_v48 }
 0x67c   : > { %5163 = vrcp.f32 %v3567_v0  ;;  %v4206_v39 = vmul.f32 -1.442695, %v6451_v20 }
 0x67d   : > { %v4205_v34 = vmul.f32 -1.442695, %v6454_v19  ;;  %v4758_v46 = vpop.f32.mrb[150].mxu1 }
 0x67e   : > { %5165 = vpow2.f32 %v4206_v39  ;;  %v3452_v62 = vpop.f32.mrb[151].mxu1  ;;  %v3971_v39 = vmul.f32 -1.442695, %v6126_v33  ;;  %v836_v46 = vpop.permute.xlu0 %835 }
 0x67f   : > { %5167 = vpow2.f32 %v4205_v34  ;;  %v838_v34 = vpop.permute.xlu1 %837  ;;  %v3974_v62 = vmul.f32 -1.442695, %v6131_v47 }
 0x681   : > { %v4761_v60 = vpop.f32.mrb[152].mxu1 }
 0x682   : > { %v3460_v8 = vpop.f32.mrb[153].mxu1  ;;  %v6690_v60 = vld [vmem:[#allocation8_spill] sm:$0xff] }
 0x683   : > { %v3973_v8 = vmul.f32 -1.442695, %v6690_v60 }
 0x685   : > { %v5162_v26 = vpop.eup %5161  ;;  %v4764_v28 = vpop.f32.mrb[154].mxu1 }
 0x686   : > { %v5164_v27 = vpop.eup %5163  ;;  %3611 = vrot.lane.b32.xlu1 %v5162_v26, %s5397_s25  ;;  %v3468_v10 = vpop.f32.mrb[155].mxu1 }
 0x687   : > { %3609 = vrot.lane.b32.xlu0 %v5164_v27, %s5397_s25  ;;  %v842_v26 = vpop.permute.xlu1 %841  ;;  %v840_v28 = vpop.permute.xlu0 %839 }
 0x688   : > { %v5166_v1 = vpop.eup %5165 }
 0x689   : > { %v5168_v11 = vpop.eup %5167  ;;  %v3570_v32 = vadd.f32 1.0, %v5166_v1  ;;  %v4767_v63 = vpop.f32.mrb[156].mxu1 }
 0x68a   : > { %v3569_v3 = vadd.f32 1.0, %v5168_v11  ;;  %v6461_v41 = vadd.f32 %v4767_v63, %v6430_v36  ;;  %v3476_v7 = vpop.f32.mrb[157].mxu1  ;;  %v6691_v11 = vld [vmem:[#allocation9_spill] sm:$0xff] }
 0x68b   : > { %5169 = vrcp.f32 %v3570_v32  ;;  %v6464_v5 = vadd.f32 %v6430_v36, %v3476_v7  ;;  %v6490_v27 = vpop.permute.xlu1 %845  ;;  %v6492_v1 = vpop.permute.xlu0 %843  ;;  %v3976_v33 = vmul.f32 -1.442695, %v6691_v11  ;;  %v6692_v32 = vld [vmem:[#allocation10_spill] sm:$0xff] }
 0x68c   : > { %5171 = vrcp.f32 %v3569_v3  ;;  %v4208_v24 = vmul.f32 -1.442695, %v6461_v41  ;;  %v3975_v63 = vmul.f32 -1.442695, %v6692_v32 }
 0x68d   : > { %v4207_v45 = vmul.f32 -1.442695, %v6464_v5  ;;  %v4770_v29 = vpop.f32.mrb[158].mxu1 }
 0x68e   : > { %5173 = vpow2.f32 %v4208_v24  ;;  %v3486_v55 = vpop.f32.mrb[159].mxu1 }
 0x68f   : > { %5175 = vpow2.f32 %v4207_v45  ;;  %v6496_v45 = vpop.permute.xlu1 %849  ;;  %v6498_v29 = vpop.permute.xlu0 %847 }
 0x691   : > { %v4773_v6 = vpop.f32.mrb[160].mxu1 }
 0x692   : > { %v3494_v57 = vpop.f32.mrb[161].mxu1 }
 0x695   : > { %v5170_v16 = vpop.eup %5169  ;;  %v4776_v37 = vpop.f32.mrb[162].mxu1 }
 0x696   : > { %v5172_v12 = vpop.eup %5171  ;;  %3615 = vrot.lane.b32.xlu1 %v5170_v16, %s5397_s25  ;;  %v3502_v51 = vpop.f32.mrb[163].mxu1 }
 0x697   : > { %3613 = vrot.lane.b32.xlu0 %v5172_v12, %s5397_s25 }
 0x698   : > { %v5174_v18 = vpop.eup %5173 }
 0x699   : > { %v5176_v40 = vpop.eup %5175  ;;  %v3572_v61 = vadd.f32 1.0, %v5174_v18  ;;  %v4779_v58 = vpop.f32.mrb[164].mxu1 }
 0x69a   : > { %v3571_v4 = vadd.f32 1.0, %v5176_v40  ;;  %v6471_v35 = vadd.f32 %v4779_v58, %v6430_v36  ;;  %v3510_v53 = vpop.f32.mrb[165].mxu1  ;;  %v6693_v40 = vld [vmem:[#allocation11_spill] sm:$0xff]  ;;  %v6694_v58 = vld [vmem:[#allocation6_spill] sm:$0xff] }
 0x69b   : > { %5177 = vrcp.f32 %v3572_v61  ;;  %v6474_v9 = vadd.f32 %v6430_v36, %v3510_v53  ;;  %v3978_v61 = vmul.f32 -1.442695, %v6693_v40 }
 0x69c   : > { %5179 = vrcp.f32 %v3571_v4  ;;  %v4210_v31 = vmul.f32 -1.442695, %v6471_v35 }
 0x69d   : > { %v4209_v17 = vmul.f32 -1.442695, %v6474_v9  ;;  %v4782_v13 = vpop.f32.mrb[166].mxu1 }
 0x69e   : > { %5181 = vpow2.f32 %v4210_v31  ;;  %v3520_v59 = vpop.f32.mrb[167].mxu1  ;;  %v6695_v31 = vld [vmem:[#allocation12_spill] sm:$0xff]  ;;  %v6696_v13 = vld [vmem:[#allocation7_spill] sm:$0xff] }
 0x69f   : > { %5183 = vpow2.f32 %v4209_v17  ;;  %v3977_v17 = vmul.f32 -1.442695, %v6695_v31 }
 0x6a1   : > { %v4785_v52 = vpop.f32.mrb[168].mxu1 }
 0x6a2   : > { %v3528_v15 = vpop.f32.mrb[169].mxu1 }
 0x6a5   : > { %v5178_v49 = vpop.eup %5177 }
 0x6a6   : > { %v5180_v25 = vpop.eup %5179  ;;  %3619 = vrot.lane.b32.xlu1 %v5178_v49, %s5397_s25 }
 0x6a7   : > { %3617 = vrot.lane.b32.xlu0 %v5180_v25, %s5397_s25 }
 0x6a8   : > { %v5182_v38 = vpop.eup %5181 }
 0x6a9   : > { %v5184_v36 = vpop.eup %5183  ;;  %v3574_v14 = vadd.f32 1.0, %v5182_v38 }
 0x6aa   : > { %v3573_v30 = vadd.f32 1.0, %v5184_v36 }
 0x6ab   : > { %5185 = vrcp.f32 %v3574_v14 }
 0x6ac   : > { %5187 = vrcp.f32 %v3573_v30 }
 0x6ad   : > { %5189 = vtanh.f32 %v5755_v56 }
 0x6ae   : > { %5191 = vtanh.f32 %v6689_v44 }
 0x6af   : > { %5193 = vpow2.f32 %v3972_v2 }
 0x6b0   : > { %5195 = vpow2.f32 %v3971_v39 }
 0x6b1   : > { %5197 = vpow2.f32 %v3974_v62 }
 0x6b2   : > { %5199 = vpow2.f32 %v3973_v8 }
 0x6b3   : > { %5201 = vpow2.f32 %v3976_v33 }
 0x6b4   : > { %5203 = vpow2.f32 %v3975_v63 }
 0x6b5   : > { %v5186_v42 = vpop.eup %5185 }
 0x6b6   : > { %v5188_v23 = vpop.eup %5187  ;;  %3623 = vrot.lane.b32.xlu1 %v5186_v42, %s5397_s25 }
 0x6b7   : > { %3621 = vrot.lane.b32.xlu0 %v5188_v23, %s5397_s25  ;;  %v5190_v22 = vpop.eup %5189 }
 0x6b8   : > { %v5192_v0 = vpop.eup %5191 }
 0x6b9   : > { %v5194_v10 = vpop.eup %5193 }
 0x6ba   : > { %853 = vrot.lane.b32.xlu1 %v5190_v22, %s5397_s25  ;;  %v5196_v48 = vpop.eup %5195  ;;  %v786_v3 = vadd.f32 1.0, %v5194_v10 }
 0x6bb   : > { %851 = vrot.lane.b32.xlu0 %v5192_v0, %s5397_s25  ;;  %v5198_v7 = vpop.eup %5197  ;;  %v785_v47 = vadd.f32 1.0, %v5196_v48 }
 0x6bc   : > { %v5200_v24 = vpop.eup %5199  ;;  %5205 = vrcp.f32 %v786_v3  ;;  %v788_v55 = vadd.f32 1.0, %v5198_v7 }
 0x6bd   : > { %5207 = vrcp.f32 %v785_v47  ;;  %v787_v6 = vadd.f32 1.0, %v5200_v24  ;;  %v5202_v51 = vpop.eup %5201 }
 0x6be   : > { %5209 = vrcp.f32 %v788_v55  ;;  %v5204_v18 = vpop.eup %5203  ;;  %v790_v15 = vadd.f32 1.0, %v5202_v51 }
 0x6bf   : > { %5211 = vrcp.f32 %v787_v6  ;;  %v789_v25 = vadd.f32 1.0, %v5204_v18 }
 0x6c0   : > { %5213 = vpow2.f32 %v3978_v61 }
 0x6c1   : > { %5215 = vpow2.f32 %v3977_v17 }
 0x6c2   : > { %5217 = vrcp.f32 %v790_v15 }
 0x6c3   : > { %5219 = vrcp.f32 %v789_v25 }
 0x6c6   : > { %v5206_v53 = vpop.eup %5205 }
 0x6c7   : > { %v5208_v52 = vpop.eup %5207  ;;  %v866_v49 = vmul.f32 %v5206_v53, %v838_v34 }
 0x6c8   : > { %v865_v38 = vmul.f32 %v5208_v52, %v836_v46  ;;  %v6697_v46 = vld [vmem:[#allocation13_spill] sm:$0xff] }
 0x6e8   : > { %v3608_v57 = vpop.permute.xlu1 %3607 }
 0x6e9   : > { %v3606_v16 = vpop.permute.xlu0 %3605  ;;  %v3636_v37 = vmul.f32 %v3608_v57, %v6433_v50 }
 0x6ea   : > { %v3635_v12 = vmul.f32 %v3606_v16, %v6436_v54  ;;  %v5210_v54 = vpop.eup %5209 }
 0x6eb   : > { %v3646_v4 = vmax.f32 %v6694_v58, %v3636_v37  ;;  %v5212_v14 = vpop.eup %5211  ;;  %v868_v42 = vmul.f32 %v5210_v54, %v842_v26  ;;  %v6698_v26 = vld [vmem:[#allocation14_spill] sm:$0xff] }
 0x6ec   : > { %v3645_v59 = vmax.f32 %v6696_v13, %v3635_v12  ;;  %v867_v23 = vmul.f32 %v5212_v14, %v840_v28  ;;  %v5214_v37 = vpop.eup %5213 }
 0x6ed   : > { %v6506_v50 = vadd.f32 %v3646_v4, %v866_v49  ;;  %v5216_v61 = vpop.eup %5215 }
 0x6ee   : > { %v6508_v36 = vadd.f32 %v3645_v59, %v865_v38  ;;  %v5218_v17 = vpop.eup %5217 }
 0x6ef   : > { %v3817_v39 = vrot.slane %v6506_v50, 5  ;;  %v3775_v34 = vrot.slane %v6506_v50, 1  ;;  %v3829_v60 = vrot.slane %v6506_v50, 6  ;;  %v3786_v8 = vrot.slane %v6506_v50, 2  ;;  %v5220_v49 = vpop.eup %5219 }
 0x6f0   : > { %v3725_v10 = vrot.slane %v6508_v36, 5  ;;  %v3737_v48 = vrot.slane %v6508_v36, 6  ;;  %v3749_v33 = vrot.slane %v6508_v36, 7  ;;  %v3705_v32 = vrot.slane %v6508_v36, 3 }
 0x6f1   : > { %v3841_v63 = vrot.slane %v6506_v50, 7  ;;  %v3797_v7 = vrot.slane %v6506_v50, 3  ;;  %v3808_v47 = vrot.slane %v6506_v50, 4  ;;  %v3716_v24 = vrot.slane %v6508_v36, 4 }
 0x6f8   : > { %v3612_v30 = vpop.permute.xlu1 %3611 }
 0x6f9   : > { %v3638_v22 = vmul.f32 %v3612_v30, %v6441_v21  ;;  %v3610_v0 = vpop.permute.xlu0 %3609  ;;  %v3683_v21 = vrot.slane %v6508_v36, 1 }
 0x6fa   : > { %v3637_v2 = vmul.f32 %v3610_v0, %v6444_v43  ;;  %v3694_v43 = vrot.slane %v6508_v36, 2 }
 0x6fb   : > { %v3648_v62 = vmax.f32 %v6697_v46, %v3638_v22 }
 0x6fc   : > { %v3647_v28 = vmax.f32 %v6698_v26, %v3637_v2  ;;  %v792_v26 = vadd.f32 1.0, %v5214_v37 }
 0x6fd   : > { %v3658_v11 = vadd.f32 %v3648_v62, %v868_v42 }
 0x6fe   : > { %v3657_v3 = vadd.f32 %v3647_v28, %v867_v23 }
 0x6ff   : > { %v3818_v55 = vrot.slane %v3658_v11, 4  ;;  %v3776_v6 = vsel %vm3671_vm4, %v3658_v11, %v3775_v34  ;;  %v3830_v57 = vrot.slane %v3658_v11, 5  ;;  %v3787_v16 = vrot.slane %v3658_v11, 1 }
 0x700   : > { %v3726_v12 = vrot.slane %v3657_v3, 4  ;;  %v3684_v51 = vsel %vm3671_vm4, %v3657_v3, %v3683_v21  ;;  %v3738_v18 = vrot.slane %v3657_v3, 5  ;;  %v3695_v40 = vrot.slane %v3657_v3, 1 }
 0x701   : > { %v3819_v58 = vsel %vm3671_vm4, %v3818_v55, %v3817_v39  ;;  %v3831_v4 = vsel %vm3671_vm4, %v3830_v57, %v3829_v60  ;;  %v3788_v53 = vsel %vm3671_vm4, %v3787_v16, %v3786_v8  ;;  %v3750_v31 = vrot.slane %v3657_v3, 6 }
 0x702   : > { %v3727_v13 = vsel %vm3671_vm4, %v3726_v12, %v3725_v10  ;;  %v3739_v59 = vsel %vm3671_vm4, %v3738_v18, %v3737_v48  ;;  %v3696_v52 = vsel %vm3671_vm4, %v3695_v40, %v3694_v43  ;;  %v3706_v15 = vrot.slane %v3657_v3, 2 }
 0x703   : > { %v3751_v25 = vsel %vm3671_vm4, %v3750_v31, %v3749_v33  ;;  %v3842_v38 = vrot.slane %v3658_v11, 6  ;;  %v3798_v54 = vrot.slane %v3658_v11, 2  ;;  %v3809_v14 = vrot.slane %v3658_v11, 3 }
 0x704   : > { %v3707_v30 = vsel %vm3671_vm4, %v3706_v15, %v3705_v32  ;;  %v3766_v42 = vrot.slane %v3658_v11, 7  ;;  %v3717_v23 = vrot.slane %v3657_v3, 3  ;;  %v3670_v22 = vrot.slane %v3657_v3, 7  ;;  %v6699_v11 = vld [vmem:[#allocation15_spill] sm:$0xff]  ;;  %v6700_v32 = vld [vmem:[#allocation16_spill] sm:$0xff] }
 0x705   : > { %v3843_v0 = vsel %vm3671_vm4, %v3842_v38, %v3841_v63  ;;  %v3799_v2 = vsel %vm3671_vm4, %v3798_v54, %v3797_v7  ;;  %v3810_v39 = vsel %vm3671_vm4, %v3809_v14, %v3808_v47  ;;  %v3980_v60 = vmul.f32 -1.442695, %v5755_v56 }
 0x706   : > { %v3767_v34 = vsel %vm3671_vm4, %v3766_v42, %v6506_v50  ;;  %v3718_v46 = vsel %vm3671_vm4, %v3717_v23, %v3716_v24  ;;  %v3672_v62 = vsel %vm3671_vm4, %v3670_v22, %v6508_v36  ;;  %v3979_v8 = vmul.f32 -1.442695, %v6689_v44 }
 0x707   : > { %v791_v48 = vadd.f32 1.0, %v5216_v61  ;;  %5221 = vpow2.f32 %v3980_v60  ;;  %v870_v50 = vmul.f32 %v5218_v17, %v6490_v27  ;;  %v869_v36 = vmul.f32 %v5220_v49, %v6492_v1 }
 0x708   : > { %v3616_v10 = vpop.permute.xlu1 %3615  ;;  %5223 = vpow2.f32 %v3979_v8 }
 0x709   : > { %v3640_v28 = vmul.f32 %v3616_v10, %v6451_v20  ;;  %v3614_v21 = vpop.permute.xlu0 %3613  ;;  %5225 = vrcp.f32 %v792_v26 }
 0x70a   : > { %v3639_v43 = vmul.f32 %v3614_v21, %v6454_v19  ;;  %5227 = vrcp.f32 %v791_v48 }
 0x70b   : > { %v3650_v33 = vmax.f32 %v6699_v11, %v3640_v28  ;;  %v6702_v28 = vld [vmem:[#allocation18_spill] sm:$0xff] }
 0x70c   : > { %v3649_v56 = vmax.f32 %v6700_v32, %v3639_v43 }
 0x70d   : > { %v3660_v44 = vadd.f32 %v3650_v33, %v870_v50 }
 0x70e   : > { %v3659_v63 = vadd.f32 %v3649_v56, %v869_v36 }
 0x70f   : > { %v3820_v20 = vrot.slane %v3660_v44, 3  ;;  %v3777_v3 = vrot.slane %v3660_v44, 7  ;;  %v3832_v7 = vrot.slane %v3660_v44, 4  ;;  %v3789_v19 = vsel %vm3674_vm5, %v3660_v44, %v3788_v53 }
 0x710   : > { %v3728_v47 = vrot.slane %v3659_v63, 3  ;;  %v3685_v24 = vrot.slane %v3659_v63, 7  ;;  %v3740_v27 = vrot.slane %v3659_v63, 4  ;;  %v3697_v55 = vsel %vm3674_vm5, %v3659_v63, %v3696_v52 }
 0x711   : > { %v3821_v57 = vsel %vm3674_vm5, %v3820_v20, %v3819_v58  ;;  %v3778_v1 = vsel %vm3674_vm5, %v3777_v3, %v3776_v6  ;;  %v3833_v16 = vsel %vm3674_vm5, %v3832_v7, %v3831_v4  ;;  %v3752_v37 = vrot.slane %v3659_v63, 5  ;;  %v5222_v38 = vpop.eup %5221 }
 0x712   : > { %v3729_v12 = vsel %vm3674_vm5, %v3728_v47, %v3727_v13  ;;  %v3686_v18 = vsel %vm3674_vm5, %v3685_v24, %v3684_v51  ;;  %v3741_v40 = vsel %vm3674_vm5, %v3740_v27, %v3739_v59  ;;  %v3708_v61 = vrot.slane %v3659_v63, 1  ;;  %v5224_v54 = vpop.eup %5223 }
 0x713   : > { %v3753_v53 = vsel %vm3674_vm5, %v3752_v37, %v3751_v25  ;;  %v3844_v31 = vrot.slane %v3660_v44, 5  ;;  %v3800_v17 = vrot.slane %v3660_v44, 1  ;;  %v3811_v15 = vrot.slane %v3660_v44, 2  ;;  %v5226_v42 = vpop.eup %5225 }
 0x714   : > { %v3709_v52 = vsel %vm3674_vm5, %v3708_v61, %v3707_v30  ;;  %v3768_v58 = vrot.slane %v3660_v44, 6  ;;  %v3719_v49 = vrot.slane %v3659_v63, 2  ;;  %v3673_v6 = vrot.slane %v3659_v63, 6  ;;  %v5228_v23 = vpop.eup %5227 }
 0x715   : > { %v3845_v4 = vsel %vm3674_vm5, %v3844_v31, %v3843_v0  ;;  %v3801_v13 = vsel %vm3674_vm5, %v3800_v17, %v3799_v2  ;;  %v3812_v51 = vsel %vm3674_vm5, %v3811_v15, %v3810_v39  ;;  %v794_v22 = vadd.f32 1.0, %v5222_v38  ;;  %v6701_v39 = vld [vmem:[#allocation17_spill] sm:$0xff] }
 0x716   : > { %v3769_v59 = vsel %vm3674_vm5, %v3768_v58, %v3767_v34  ;;  %v3720_v25 = vsel %vm3674_vm5, %v3719_v49, %v3718_v46  ;;  %v3675_v14 = vsel %vm3674_vm5, %v3673_v6, %v3672_v62  ;;  %v793_v10 = vadd.f32 1.0, %v5224_v54 }
 0x717   : > { %v872_v2 = vmul.f32 %v5226_v42, %v6496_v45  ;;  %v871_v34 = vmul.f32 %v5228_v23, %v6498_v29  ;;  %5229 = vrcp.f32 %v794_v22 }
 0x718   : > { %v3620_v30 = vpop.permute.xlu1 %3619  ;;  %5231 = vrcp.f32 %v793_v10 }
 0x719   : > { %v3642_v60 = vmul.f32 %v3620_v30, %v6461_v41  ;;  %v3618_v8 = vpop.permute.xlu0 %3617 }
 0x71a   : > { %v3641_v0 = vmul.f32 %v3618_v8, %v6464_v5 }
 0x71b   : > { %v3652_v26 = vmax.f32 %v6701_v39, %v3642_v60 }
 0x71c   : > { %v3651_v46 = vmax.f32 %v6702_v28, %v3641_v0 }
 0x71d   : > { %v3662_v62 = vadd.f32 %v3652_v26, %v872_v2 }
 0x71e   : > { %v3661_v21 = vadd.f32 %v3651_v46, %v871_v34 }
 0x71f   : > { %v3822_v48 = vrot.slane %v3662_v62, 2  ;;  %v3779_v43 = vrot.slane %v3662_v62, 6  ;;  %v3834_v41 = vrot.slane %v3662_v62, 3  ;;  %v3790_v50 = vrot.slane %v3662_v62, 7 }
 0x720   : > { %v3730_v11 = vrot.slane %v3661_v21, 2  ;;  %v3687_v33 = vrot.slane %v3661_v21, 6  ;;  %v3742_v5 = vrot.slane %v3661_v21, 3  ;;  %v3698_v36 = vrot.slane %v3661_v21, 7 }
 0x721   : > { %v3823_v45 = vsel %vm3677_vm6, %v3822_v48, %v3821_v57  ;;  %v3780_v32 = vsel %vm3677_vm6, %v3779_v43, %v3778_v1  ;;  %v3835_v29 = vsel %vm3677_vm6, %v3834_v41, %v3833_v16  ;;  %v3791_v56 = vsel %vm3677_vm6, %v3790_v50, %v3789_v19  ;;  %v5230_v31 = vpop.eup %5229 }
 0x722   : > { %v3731_v44 = vsel %vm3677_vm6, %v3730_v11, %v3729_v12  ;;  %v3688_v63 = vsel %vm3677_vm6, %v3687_v33, %v3686_v18  ;;  %v3743_v20 = vsel %vm3677_vm6, %v3742_v5, %v3741_v40  ;;  %v3699_v3 = vsel %vm3677_vm6, %v3698_v36, %v3697_v55  ;;  %v5232_v17 = vpop.eup %5231 }
 0x723   : > { %v3754_v7 = vrot.slane %v3661_v21, 4  ;;  %v3710_v47 = vsel %vm3677_vm6, %v3661_v21, %v3709_v52  ;;  %v3846_v24 = vrot.slane %v3662_v62, 4  ;;  %v3802_v27 = vsel %vm3677_vm6, %v3662_v62, %v3801_v13 }
 0x724   : > { %v3813_v57 = vrot.slane %v3662_v62, 1  ;;  %v3770_v1 = vrot.slane %v3662_v62, 5  ;;  %v3721_v37 = vrot.slane %v3661_v21, 1  ;;  %v3676_v16 = vrot.slane %v3661_v21, 5 }
 0x725   : > { %v3755_v19 = vsel %vm3677_vm6, %v3754_v7, %v3753_v53  ;;  %v3847_v12 = vsel %vm3677_vm6, %v3846_v24, %v3845_v4  ;;  %v6703_v53 = vld [vmem:[#allocation19_spill] sm:$0xff] }
 0x726   : > { %v3814_v18 = vsel %vm3677_vm6, %v3813_v57, %v3812_v51  ;;  %v3771_v40 = vsel %vm3677_vm6, %v3770_v1, %v3769_v59  ;;  %v3722_v55 = vsel %vm3677_vm6, %v3721_v37, %v3720_v25  ;;  %v3678_v61 = vsel %vm3677_vm6, %v3676_v16, %v3675_v14  ;;  %v6704_v51 = vld [vmem:[#allocation20_spill] sm:$0xff] }
 0x728   : > { %v3624_v15 = vpop.permute.xlu1 %3623 }
 0x729   : > { %v3644_v52 = vmul.f32 %v3624_v15, %v6471_v35  ;;  %v3622_v58 = vpop.permute.xlu0 %3621 }
 0x72a   : > { %v3643_v49 = vmul.f32 %v3622_v58, %v6474_v9 }
 0x72b   : > { %v3654_v38 = vmax.f32 %v6703_v53, %v3644_v52 }
 0x72c   : > { %v854_v6 = vpop.permute.xlu1 %853  ;;  %v3653_v54 = vmax.f32 %v6704_v51, %v3643_v49 }
 0x72d   : > { %v874_v4 = vmul.f32 %v5230_v31, %v854_v6  ;;  %v852_v13 = vpop.permute.xlu0 %851 }
 0x72e   : > { %v873_v59 = vmul.f32 %v5232_v17, %v852_v13 }
 0x72f   : > { %v3664_v42 = vadd.f32 %v3654_v38, %v874_v4 }
 0x730   : > { %v3663_v25 = vadd.f32 %v3653_v54, %v873_v59 }
 0x731   : > { %v3824_v14 = vrot.slane %v3664_v42, 1  ;;  %v3781_v23 = vrot.slane %v3664_v42, 5  ;;  %v3836_v30 = vrot.slane %v3664_v42, 2  ;;  %v3792_v22 = vrot.slane %v3664_v42, 6 }
 0x732   : > { %v3732_v60 = vrot.slane %v3663_v25, 1  ;;  %v3689_v35 = vrot.slane %v3663_v25, 5  ;;  %v3744_v8 = vrot.slane %v3663_v25, 2  ;;  %v3700_v10 = vrot.slane %v3663_v25, 6 }
 0x733   : > { %v3825_v9 = vsel %vm3680_vm7, %v3824_v14, %v3823_v45  ;;  %v3782_v0 = vsel %vm3680_vm7, %v3781_v23, %v3780_v32  ;;  %v3837_v2 = vsel %vm3680_vm7, %v3836_v30, %v3835_v29  ;;  %v3793_v39 = vsel %vm3680_vm7, %v3792_v22, %v3791_v56 }
 0x734   : > { %3826 = vrot.lane.b32.xlu1 %v3825_v9, %s5398_s22  ;;  %3783 = vrot.lane.b32.xlu0 %v3782_v0, %s5398_s22  ;;  %v3733_v26 = vsel %vm3680_vm7, %v3732_v60, %v3731_v44  ;;  %v3690_v34 = vsel %vm3680_vm7, %v3689_v35, %v3688_v63  ;;  %v3745_v28 = vsel %vm3680_vm7, %v3744_v8, %v3743_v20  ;;  %v3756_v46 = vrot.slane %v3663_v25, 3 }
 0x735   : > { %v3701_v62 = vsel %vm3680_vm7, %v3700_v10, %v3699_v3  ;;  %v3711_v21 = vrot.slane %v3663_v25, 7  ;;  %v3848_v48 = vrot.slane %v3664_v42, 3  ;;  %v3803_v43 = vrot.slane %v3664_v42, 7 }
 0x736   : > { %v3757_v41 = vsel %vm3680_vm7, %v3756_v46, %v3755_v19  ;;  %v3815_v50 = vsel %vm3680_vm7, %v3664_v42, %v3814_v18  ;;  %v3772_v11 = vrot.slane %v3664_v42, 4  ;;  %v3723_v33 = vsel %vm3680_vm7, %v3663_v25, %v3722_v55 }
 0x737   : > { %v3712_v5 = vsel %vm3680_vm7, %v3711_v21, %v3710_v47  ;;  %v3849_v36 = vsel %vm3680_vm7, %v3848_v48, %v3847_v12  ;;  %v3804_v45 = vsel %vm3680_vm7, %v3803_v43, %v3802_v27  ;;  %v3679_v32 = vrot.slane %v3663_v25, 4 }
 0x738   : > { %3838 = vrot.lane.b32.xlu1 %v3837_v2, %s5399_s21  ;;  %3794 = vrot.lane.b32.xlu0 %v3793_v39, %s5399_s21  ;;  %v3773_v29 = vsel %vm3680_vm7, %v3772_v11, %v3771_v40 }
 0x739   : > { %v3681_v56 = vsel %vm3680_vm7, %v3679_v32, %v3678_v61 }
 0x73c   : > { %3734 = vrot.lane.b32.xlu1 %v3733_v26, %s5398_s22  ;;  %3691 = vrot.lane.b32.xlu0 %v3690_v34, %s5398_s22 }
 0x740   : > { %3746 = vrot.lane.b32.xlu1 %v3745_v28, %s5399_s21  ;;  %3702 = vrot.lane.b32.xlu0 %v3701_v62, %s5399_s21 }
 0x744   : > { %3758 = vrot.lane.b32.xlu1 %v3757_v41, %s5397_s25  ;;  %3713 = vrot.lane.b32.xlu0 %v3712_v5, %s5397_s25 }
 0x748   : > { %3850 = vrot.lane.b32.xlu1 %v3849_v36, %s5397_s25  ;;  %3805 = vrot.lane.b32.xlu0 %v3804_v45, %s5397_s25 }
 0x7a6   : > { %v3827_v44 = vpop.permute.xlu1 %3826  ;;  %v3784_v63 = vpop.permute.xlu0 %3783 }
 0x7a7   : > { %v3863_v55 = vsel %vm1813_vm3, %v3815_v50, %v3827_v44  ;;  %v3860_v61 = vsel %vm1813_vm3, %v3773_v29, %v3784_v63 }
 0x7aa   : > { %v3839_v20 = vpop.permute.xlu1 %3838  ;;  %v3795_v3 = vpop.permute.xlu0 %3794 }
 0x7ab   : > { %v3864_v31 = vsel %vm1156_vm2, %v3863_v55, %v3839_v20  ;;  %v3861_v17 = vsel %vm1156_vm2, %v3860_v61, %v3795_v3 }
 0x7ae   : > { %v3735_v7 = vpop.permute.xlu1 %3734  ;;  %v3692_v47 = vpop.permute.xlu0 %3691 }
 0x7af   : > { %v3857_v57 = vsel %vm1813_vm3, %v3723_v33, %v3735_v7  ;;  %v3853_v1 = vsel %vm1813_vm3, %v3681_v56, %v3692_v47 }
 0x7b2   : > { %v3747_v24 = vpop.permute.xlu1 %3746  ;;  %v3703_v27 = vpop.permute.xlu0 %3702 }
 0x7b3   : > { %v3858_v37 = vsel %vm1156_vm2, %v3857_v57, %v3747_v24  ;;  %v3854_v16 = vsel %vm1156_vm2, %v3853_v1, %v3703_v27 }
 0x7b6   : > { %v3759_v19 = vpop.permute.xlu1 %3758  ;;  %v3714_v12 = vpop.permute.xlu0 %3713 }
 0x7b7   : > { %v3859_v18 = vsel %vm3855_vm8, %v3858_v37, %v3759_v19  ;;  %v3856_v40 = vsel %vm3855_vm8, %v3854_v16, %v3714_v12 }
 0x7b8   : > { %3867 = vst [vmem:[%s401_s26 + $0x8] sm:$0x1f] %v3859_v18  ;;  %3866 = vst [vmem:[%s401_s26] sm:$0x1f] %v3856_v40 }
 0x7ba   : > { %v3851_v15 = vpop.permute.xlu1 %3850  ;;  %v3806_v52 = vpop.permute.xlu0 %3805 }
 0x7bb   : > { %v3865_v58 = vsel %vm3855_vm8, %v3864_v31, %v3851_v15  ;;  %v3862_v49 = vsel %vm3855_vm8, %v3861_v17, %v3806_v52 }
 0x7bc   : > { %3869 = vst [vmem:[%s401_s26 + $0x18] sm:$0x1f] %v3865_v58  ;;  %3868 = vst [vmem:[%s401_s26 + $0x10] sm:$0x1f] %v3862_v49 }
 0x7bd PF: > { %s22_s17 = sadd.s32 1, %s5391_s17  }
 0x7be   : > { %p19_p3 = scmp.ge.s32.totalorder %s22_s17, 4  }
 0x7c0   :  { %21 = sbr.rel (!%p19_p3) target bundleno = 1 (0x1), region = 99 }
 0x7c7   :  { %3891 = vsyncpa [#allocation3], 1 }
 0x7c8   :  { %3893 = vsyncpa [#allocation3 + $0x1], 1 }

</bundles_post_ra>
